<compile_context>
chip_gen: v5e
topology: v5e:2x2
jax: 0.10.0
libtpu: 0.0.40
codegen_flags: <defaults>
</compile_context>

<pallas_src>
import functools

import jax
import jax.numpy as jnp
from jax import lax
from jax.experimental import pallas as pl
from jax.experimental.pallas import tpu as pltpu


# ----------------------------- Pallas kernel ------------------------------- #

def _basic_block_kernel(x_ref, w1_ref, w2_ref, sb_ref, o_ref,
                        xpad_ref, hpad_ref, *, W, cin, cout, band, lp, rp):
    """Fused BasicBlock forward for one (image, row-band) grid step.

    x_ref   : (1, H, W, cin)          full image (resident across the band axis)
    w1_ref  : (9, cin, cout)          conv1 weights, one (cin,cout) tile per tap
    w2_ref  : (9, cout, cout)         conv2 weights
    sb_ref  : (4, 1, cout) f32        rows = [scale1, bias1, scale2, bias2] (folded BN)
    o_ref   : (1, band, W*cout)       lane-dense output slab for this band
    xpad_ref: (band+4, lp+W+rp, cin)  padded conv1 input (2-row vertical halo)
    hpad_ref: (band+2, lp+W+rp, cout) padded conv2 input (1-row vertical halo)
    """
    cdt = xpad_ref.dtype
    hb = pl.program_id(1)
    nb = pl.num_programs(1)
    row0 = pl.multiple_of(hb * band, 8) if band % 8 == 0 else hb * band

    # ---- stage the input band (+/- 2-row halo) into xpad ----------------------
    # Halo-only zeroing: the column strips containing cols lp-1 and lp+W, plus the
    # vertical halo rows.  The interior is fully overwritten every step.
    xpad_ref[:, pl.ds(0, lp), :] = jnp.zeros((band + 4, lp, cin), cdt)
    xpad_ref[:, pl.ds(lp + W, rp), :] = jnp.zeros((band + 4, rp, cin), cdt)
    zrows_x = jnp.zeros((2, W, cin), cdt)
    xpad_ref[pl.ds(0, 2), pl.ds(lp, W), :] = zrows_x
    xpad_ref[pl.ds(band + 2, 2), pl.ds(lp, W), :] = zrows_x

    x_band = x_ref[0, pl.ds(row0, band), :, :]            # (band, W, cin), input dtype
    xpad_ref[pl.ds(2, band), pl.ds(lp, W), :] = x_band.astype(cdt)

    @pl.when(hb > 0)
    def _():   # top halo rows row0-2, row0-1 exist -> copy (else stay zero)
        xpad_ref[pl.ds(0, 2), pl.ds(lp, W), :] = (
            x_ref[0, pl.ds(row0 - 2, 2), :, :].astype(cdt))

    @pl.when(hb < nb - 1)
    def _():   # bottom halo rows row0+band, row0+band+1 exist -> copy
        xpad_ref[pl.ds(band + 2, 2), pl.ds(lp, W), :] = (
            x_ref[0, pl.ds(row0 + band, 2), :, :].astype(cdt))

    # ---- 3x3 conv = 9 shifted-window matmuls accumulated in f32 --------------
    def conv3x3(pad_ref, w_ref, rows, c):
        acc = jnp.zeros((rows * W, cout), jnp.float32)
        for dy in range(3):
            for dx in range(3):
                win = pad_ref[pl.ds(dy, rows), pl.ds(lp - 1 + dx, W), :]
                acc = acc + jnp.dot(win.reshape(rows * W, c),
                                    w_ref[dy * 3 + dx],
                                    preferred_element_type=jnp.float32)
        return acc

    # conv1 over the extended band (band+2 rows: global rows row0-1 .. row0+band),
    # which directly provides conv2's 1-row vertical halo.
    h = conv3x3(xpad_ref, w1_ref, band + 2, cin)           # ((band+2)*W, cout) f32
    h = jnp.maximum(h * sb_ref[0] + sb_ref[1], 0.0)        # folded bn1 + relu (f32)

    # ---- stage h into hpad (horizontal zero padding; halo-only zeroing) -------
    hpad_ref[:, pl.ds(0, lp), :] = jnp.zeros((band + 2, lp, cout), cdt)
    hpad_ref[:, pl.ds(lp + W, rp), :] = jnp.zeros((band + 2, rp, cout), cdt)
    hpad_ref[:, pl.ds(lp, W), :] = h.reshape(band + 2, W, cout).astype(cdt)

    # conv2's SAME padding must see zeros outside the *image*, not the conv1
    # values extrapolated at the global top/bottom boundary.
    @pl.when(hb == 0)
    def _():
        hpad_ref[pl.ds(0, 1), pl.ds(lp, W), :] = jnp.zeros((1, W, cout), cdt)

    @pl.when(hb == nb - 1)
    def _():
        hpad_ref[pl.ds(band + 1, 1), pl.ds(lp, W), :] = jnp.zeros((1, W, cout), cdt)

    # ---- conv2 -> folded bn2 -> residual add -> relu -> lane-dense store ------
    y = conv3x3(hpad_ref, w2_ref, band, cout)              # (band*W, cout) f32
    y = y.reshape(band, W, cout) * sb_ref[2] + sb_ref[3]
    y = jnp.maximum(y + x_band.astype(jnp.float32), 0.0)   # identity add (cin==cout)
    o_ref[...] = y.reshape(1, band, W * cout).astype(o_ref.dtype)


# ------------------------------- wrappers ----------------------------------- #

def basic_block_forward_nhwc(x, params, *, compute_dtype=jnp.bfloat16,
                             band=None, lp=8, rp=8,
                             vmem_limit_bytes=32 * 1024 * 1024):
    """BasicBlock forward, NHWC end-to-end (no layout transposes). Returns NHWC."""
    N, H, W, cin = x.shape
    cout = params["w1"].shape[-1]
    if cin != cout:
        # TODO(synk): stride != 1 / downsample path not implemented.
        raise NotImplementedError("only stride=1, downsample=None (cin == cout)")

    # Row-band height: multiple of 8 (sublane tiling) dividing H; smaller bands
    # give more grid steps (better pipelining / megacore split) at the cost of
    # a 2-row conv1 halo recompute per band.  Re-derive for v7x's 64 MiB VMEM
    # at real ResNet feature-map sizes.
    if band is None:
        band = 8 if H % 8 == 0 else H
    assert H % band == 0 and (band % 8 == 0 or band == H)

    w1 = params["w1"].reshape(9, cin, cout).astype(compute_dtype)
    w2 = params["w2"].reshape(9, cout, cout).astype(compute_dtype)
    # Folded BN scale/bias kept f32 for the epilogue (safe on v5e: no bf16 VPU).
    sb = jnp.stack([params["s1"], params["b1"], params["s2"], params["b2"]], 0)
    sb = sb.reshape(4, 1, cout).astype(jnp.float32)

    wpad = lp + W + rp
    kernel = functools.partial(_basic_block_kernel, W=W, cin=cin, cout=cout,
                               band=band, lp=lp, rp=rp)

    y = pl.pallas_call(
        kernel,
        # Lane-dense output layout: last dim W*cout (>=128 multiple for real C).
        out_shape=jax.ShapeDtypeStruct((N, H, W * cout), x.dtype),
        grid_spec=pltpu.PrefetchScalarGridSpec(
            num_scalar_prefetch=0,
            grid=(N, H // band),
            in_specs=[
                # Full image resident across the band axis (index map ignores h).
                pl.BlockSpec((1, H, W, cin), lambda n, h: (n, 0, 0, 0)),
                pl.BlockSpec((9, cin, cout), lambda n, h: (0, 0, 0)),
                pl.BlockSpec((9, cout, cout), lambda n, h: (0, 0, 0)),
                pl.BlockSpec((4, 1, cout), lambda n, h: (0, 0, 0)),
            ],
            out_specs=pl.BlockSpec((1, band, W * cout), lambda n, h: (n, h, 0)),
            scratch_shapes=[
                pltpu.VMEM((band + 4, wpad, cin), compute_dtype),
                pltpu.VMEM((band + 2, wpad, cout), compute_dtype),
            ],
        ),
        compiler_params=pltpu.CompilerParams(
            dimension_semantics=("parallel", "parallel"),
            vmem_limit_bytes=vmem_limit_bytes),
    )(x, w1, w2, sb)

    return y.reshape(N, H, W, cout)


def basic_block_forward(x_nchw, params, **kw):
    """NCHW adapter for PyTorch-module parity only (boundary transposes).
    Production code should call basic_block_forward_nhwc directly."""
    x = jnp.transpose(x_nchw, (0, 2, 3, 1))
    y = basic_block_forward_nhwc(x, params, **kw)
    return jnp.transpose(y, (0, 3, 1, 2))


# ------------------------ deterministic parameters -------------------------- #

def make_params(key, inplanes, planes, eps=1e-5):
    ks = jax.random.split(key, 8)
    w1 = jax.random.normal(ks[0], (3, 3, inplanes, planes), jnp.float32) * 0.1
    w2 = jax.random.normal(ks[1], (3, 3, planes, planes), jnp.float32) * 0.1
    g1 = 1.0 + 0.1 * jax.random.normal(ks[2], (planes,), jnp.float32)
    be1 = 0.1 * jax.random.normal(ks[3], (planes,), jnp.float32)
    m1 = 0.1 * jax.random.normal(ks[4], (planes,), jnp.float32)
    v1 = jnp.abs(1.0 + 0.1 * jax.random.normal(ks[5], (planes,), jnp.float32))
    g2 = 1.0 + 0.1 * jax.random.normal(ks[6], (planes,), jnp.float32)
    be2 = 0.1 * jax.random.normal(ks[7], (planes,), jnp.float32)
    m2 = jnp.zeros((planes,), jnp.float32)
    v2 = jnp.ones((planes,), jnp.float32)
    s1 = g1 / jnp.sqrt(v1 + eps)
    b1 = be1 - m1 * s1
    s2 = g2 / jnp.sqrt(v2 + eps)
    b2 = be2 - m2 * s2
    return dict(w1=w1, w2=w2, s1=s1, b1=b1, s2=s2, b2=b2)


# ------------------------------ JAX reference ------------------------------- #

def _ref_forward_nhwc(x, p):
    def conv(inp, w):
        return lax.conv_general_dilated(
            inp, w, window_strides=(1, 1), padding="SAME",
            dimension_numbers=("NHWC", "HWIO", "NHWC"))
    h = jnp.maximum(conv(x, p["w1"]) * p["s1"] + p["b1"], 0.0)
    y = conv(h, p["w2"]) * p["s2"] + p["b2"] + x
    return jnp.maximum(y, 0.0)


# --------------------------------- main ------------------------------------- #

if __name__ == "__main__":
    key = jax.random.PRNGKey(0)
    kx, kp = jax.random.split(key)

    N, C, H, W = 2, 32, 16, 16          # inplanes == planes == 32, stride=1
    x_nchw = jax.random.normal(kx, (N, C, H, W), jnp.float32)
    params = make_params(kp, inplanes=C, planes=C)

    x_nhwc = jnp.transpose(x_nchw, (0, 2, 3, 1))
    ref = jax.block_until_ready(_ref_forward_nhwc(x_nhwc, params))

    # f32 compute path: exact-semantics check of the fused kernel + halo logic.
    out_f32 = jax.block_until_ready(
        basic_block_forward_nhwc(x_nhwc, params, compute_dtype=jnp.float32))
    assert out_f32.shape == (N, H, W, C)
    assert jnp.allclose(out_f32, ref, atol=1e-3, rtol=1e-3), "f32 mismatch"

    # Default path: bf16 MXU operands, f32 accumulation, f32 BN/ReLU epilogue.
    out_bf16 = jax.block_until_ready(basic_block_forward_nhwc(x_nhwc, params))
    assert out_bf16.shape == (N, H, W, C)
    assert jnp.allclose(out_bf16, ref, atol=1e-1, rtol=5e-2), "bf16 mismatch"

    # NCHW adapter (PyTorch module convention) — boundary transposes only.
    out_nchw = jax.block_until_ready(basic_block_forward(x_nchw, params))
    assert out_nchw.shape == (N, C, H, W)
    assert jnp.allclose(out_nchw, jnp.transpose(ref, (0, 3, 1, 2)),
                        atol=1e-1, rtol=5e-2), "NCHW adapter mismatch"

    print("KERNEL_OK")
</pallas_src>

<mosaic_0001>
module attributes {stable_mosaic.version = 11 : i64} {
  func.func @_basic_block_kernel(%arg0: i32, %arg1: i32, %arg2: memref<1x16x16x32xf32, #tpu.memory_space<vmem>>, %arg3: memref<9x32x32xf32, #tpu.memory_space<vmem>>, %arg4: memref<9x32x32xf32, #tpu.memory_space<vmem>>, %arg5: memref<4x1x32xf32, #tpu.memory_space<vmem>>, %arg6: memref<1x8x512xf32, #tpu.memory_space<vmem>>, %arg7: memref<12x32x32xf32, #tpu.memory_space<vmem>>, %arg8: memref<10x32x32xf32, #tpu.memory_space<vmem>>) attributes {dimension_semantics = [#tpu.dimension_semantics<parallel>, #tpu.dimension_semantics<parallel>], iteration_bounds = array<i64: 2, 2>, scalar_prefetch = 0 : i64, scratch_operands = 2 : i64, tpu.core_type = #tpu.core_type<tc>, window_params = [{transform_indices = @transform_0, window_bounds = array<i64: 1, 16, 16, 32>}, {pipeline_mode = #tpu.pipeline_mode<synchronous>, transform_indices = @transform_1, window_bounds = array<i64: 9, 32, 32>}, {pipeline_mode = #tpu.pipeline_mode<synchronous>, transform_indices = @transform_2, window_bounds = array<i64: 9, 32, 32>}, {pipeline_mode = #tpu.pipeline_mode<synchronous>, transform_indices = @transform_3, window_bounds = array<i64: 4, 1, 32>}, {transform_indices = @transform_4, window_bounds = array<i64: 1, 8, 512>}]} {
    %c8_i32 = arith.constant 8 : i32
    %0 = arith.muli %arg1, %c8_i32 : i32
    %1 = tpu.assume_multiple %0, 8 : i32
    %cst = arith.constant 0.000000e+00 : f32
    %2 = vector.broadcast %cst : f32 to vector<12x8x32xf32>
    %c0 = arith.constant 0 : index
    %c0_0 = arith.constant 0 : index
    %c0_1 = arith.constant 0 : index
    %3 = vector.load %arg7[%c0, %c0_0, %c0_1] : memref<12x32x32xf32, #tpu.memory_space<vmem>>, vector<12x8x32xf32>
    tpu.vector_store %arg7[%c0, %c0_0, %c0_1], %2 {strides = array<i32>} : memref<12x32x32xf32, #tpu.memory_space<vmem>>, vector<12x8x32xf32>,
    %cst_2 = arith.constant 0.000000e+00 : f32
    %4 = vector.broadcast %cst_2 : f32 to vector<12x8x32xf32>
    %c0_3 = arith.constant 0 : index
    %c24 = arith.constant 24 : index
    %c0_4 = arith.constant 0 : index
    %5 = vector.load %arg7[%c0_3, %c24, %c0_4] : memref<12x32x32xf32, #tpu.memory_space<vmem>>, vector<12x8x32xf32>
    tpu.vector_store %arg7[%c0_3, %c24, %c0_4], %4 {strides = array<i32>} : memref<12x32x32xf32, #tpu.memory_space<vmem>>, vector<12x8x32xf32>,
    %cst_5 = arith.constant 0.000000e+00 : f32
    %6 = vector.broadcast %cst_5 : f32 to vector<2x16x32xf32>
    %c0_6 = arith.constant 0 : index
    %c8 = arith.constant 8 : index
    %c0_7 = arith.constant 0 : index
    %7 = vector.load %arg7[%c0_6, %c8, %c0_7] : memref<12x32x32xf32, #tpu.memory_space<vmem>>, vector<2x16x32xf32>
    tpu.vector_store %arg7[%c0_6, %c8, %c0_7], %6 {strides = array<i32>} : memref<12x32x32xf32, #tpu.memory_space<vmem>>, vector<2x16x32xf32>,
    %c10 = arith.constant 10 : index
    %c8_8 = arith.constant 8 : index
    %c0_9 = arith.constant 0 : index
    %8 = vector.load %arg7[%c10, %c8_8, %c0_9] : memref<12x32x32xf32, #tpu.memory_space<vmem>>, vector<2x16x32xf32>
    tpu.vector_store %arg7[%c10, %c8_8, %c0_9], %6 {strides = array<i32>} : memref<12x32x32xf32, #tpu.memory_space<vmem>>, vector<2x16x32xf32>,
    %c0_10 = arith.constant 0 : index
    %9 = arith.index_cast %1 : i32 to index
    %c0_11 = arith.constant 0 : index
    %c0_12 = arith.constant 0 : index
    %10 = vector.load %arg2[%c0_10, %9, %c0_11, %c0_12] : memref<1x16x16x32xf32, #tpu.memory_space<vmem>>, vector<1x8x16x32xf32>
    %11 = vector.shape_cast %10 : vector<1x8x16x32xf32> to vector<8x16x32xf32>
    %c2 = arith.constant 2 : index
    %c8_13 = arith.constant 8 : index
    %c0_14 = arith.constant 0 : index
    %12 = vector.load %arg7[%c2, %c8_13, %c0_14] : memref<12x32x32xf32, #tpu.memory_space<vmem>>, vector<8x16x32xf32>
    tpu.vector_store %arg7[%c2, %c8_13, %c0_14], %11 {strides = array<i32>} : memref<12x32x32xf32, #tpu.memory_space<vmem>>, vector<8x16x32xf32>,
    %c0_i32 = arith.constant 0 : i32
    %13 = arith.cmpi sgt, %arg1, %c0_i32 : i32
    %14 = arith.extui %13 : i1 to i32
    %c0_i32_15 = arith.constant 0 : i32
    %15 = arith.cmpi ne, %14, %c0_i32_15 : i32
    scf.if %15 {
      %c2_i32 = arith.constant 2 : i32
      %167 = arith.subi %1, %c2_i32 : i32
      %c0_170 = arith.constant 0 : index
      %168 = arith.index_cast %167 : i32 to index
      %c0_171 = arith.constant 0 : index
      %c0_172 = arith.constant 0 : index
      %169 = vector.load %arg2[%c0_170, %168, %c0_171, %c0_172] : memref<1x16x16x32xf32, #tpu.memory_space<vmem>>, vector<1x2x16x32xf32>
      %170 = vector.shape_cast %169 : vector<1x2x16x32xf32> to vector<2x16x32xf32>
      %c0_173 = arith.constant 0 : index
      %c8_174 = arith.constant 8 : index
      %c0_175 = arith.constant 0 : index
      %171 = vector.load %arg7[%c0_173, %c8_174, %c0_175] : memref<12x32x32xf32, #tpu.memory_space<vmem>>, vector<2x16x32xf32>
      tpu.vector_store %arg7[%c0_173, %c8_174, %c0_175], %170 {strides = array<i32>} : memref<12x32x32xf32, #tpu.memory_space<vmem>>, vector<2x16x32xf32>,
    } else {
    }
    %c1_i32 = arith.constant 1 : i32
    %16 = arith.cmpi slt, %arg1, %c1_i32 : i32
    %17 = arith.extui %16 : i1 to i32
    %c0_i32_16 = arith.constant 0 : i32
    %18 = arith.cmpi ne, %17, %c0_i32_16 : i32
    scf.if %18 {
      %c8_i32_170 = arith.constant 8 : i32
      %167 = arith.addi %1, %c8_i32_170 : i32
      %c0_171 = arith.constant 0 : index
      %168 = arith.index_cast %167 : i32 to index
      %c0_172 = arith.constant 0 : index
      %c0_173 = arith.constant 0 : index
      %169 = vector.load %arg2[%c0_171, %168, %c0_172, %c0_173] : memref<1x16x16x32xf32, #tpu.memory_space<vmem>>, vector<1x2x16x32xf32>
      %170 = vector.shape_cast %169 : vector<1x2x16x32xf32> to vector<2x16x32xf32>
      %c10_174 = arith.constant 10 : index
      %c8_175 = arith.constant 8 : index
      %c0_176 = arith.constant 0 : index
      %171 = vector.load %arg7[%c10_174, %c8_175, %c0_176] : memref<12x32x32xf32, #tpu.memory_space<vmem>>, vector<2x16x32xf32>
      tpu.vector_store %arg7[%c10_174, %c8_175, %c0_176], %170 {strides = array<i32>} : memref<12x32x32xf32, #tpu.memory_space<vmem>>, vector<2x16x32xf32>,
    } else {
    }
    %cst_17 = arith.constant 0.000000e+00 : f32
    %19 = vector.broadcast %cst_17 : f32 to vector<160x32xf32>
    %c0_18 = arith.constant 0 : index
    %c7 = arith.constant 7 : index
    %c0_19 = arith.constant 0 : index
    %20 = vector.load %arg7[%c0_18, %c7, %c0_19] : memref<12x32x32xf32, #tpu.memory_space<vmem>>, vector<10x16x32xf32>
    %21 = vector.shape_cast %20 : vector<10x16x32xf32> to vector<160x32xf32>
    %c0_20 = arith.constant 0 : index
    %c0_21 = arith.constant 0 : index
    %c0_22 = arith.constant 0 : index
    %22 = vector.load %arg3[%c0_20, %c0_21, %c0_22] : memref<9x32x32xf32, #tpu.memory_space<vmem>>, vector<1x32x32xf32>
    %23 = vector.shape_cast %22 : vector<1x32x32xf32> to vector<32x32xf32>
    %cst_23 = arith.constant dense<0.000000e+00> : vector<160x32xf32>
    %24 = tpu.matmul %21, %23, %cst_23 {dimension_numbers = #tpu.dot_dimension_numbers<[1], [0], [0], [1], [0, 0, 1, 1], [], []>} : vector<160x32xf32>, vector<32x32xf32>, vector<160x32xf32> -> vector<160x32xf32>
    %25 = arith.addf %19, %24 : vector<160x32xf32>
    %c0_24 = arith.constant 0 : index
    %c8_25 = arith.constant 8 : index
    %c0_26 = arith.constant 0 : index
    %26 = vector.load %arg7[%c0_24, %c8_25, %c0_26] : memref<12x32x32xf32, #tpu.memory_space<vmem>>, vector<10x16x32xf32>
    %27 = vector.shape_cast %26 : vector<10x16x32xf32> to vector<160x32xf32>
    %c1 = arith.constant 1 : index
    %c0_27 = arith.constant 0 : index
    %c0_28 = arith.constant 0 : index
    %28 = vector.load %arg3[%c1, %c0_27, %c0_28] : memref<9x32x32xf32, #tpu.memory_space<vmem>>, vector<1x32x32xf32>
    %29 = vector.shape_cast %28 : vector<1x32x32xf32> to vector<32x32xf32>
    %cst_29 = arith.constant dense<0.000000e+00> : vector<160x32xf32>
    %30 = tpu.matmul %27, %29, %cst_29 {dimension_numbers = #tpu.dot_dimension_numbers<[1], [0], [0], [1], [0, 0, 1, 1], [], []>} : vector<160x32xf32>, vector<32x32xf32>, vector<160x32xf32> -> vector<160x32xf32>
    %31 = arith.addf %25, %30 : vector<160x32xf32>
    %c0_30 = arith.constant 0 : index
    %c9 = arith.constant 9 : index
    %c0_31 = arith.constant 0 : index
    %32 = vector.load %arg7[%c0_30, %c9, %c0_31] : memref<12x32x32xf32, #tpu.memory_space<vmem>>, vector<10x16x32xf32>
    %33 = vector.shape_cast %32 : vector<10x16x32xf32> to vector<160x32xf32>
    %c2_32 = arith.constant 2 : index
    %c0_33 = arith.constant 0 : index
    %c0_34 = arith.constant 0 : index
    %34 = vector.load %arg3[%c2_32, %c0_33, %c0_34] : memref<9x32x32xf32, #tpu.memory_space<vmem>>, vector<1x32x32xf32>
    %35 = vector.shape_cast %34 : vector<1x32x32xf32> to vector<32x32xf32>
    %cst_35 = arith.constant dense<0.000000e+00> : vector<160x32xf32>
    %36 = tpu.matmul %33, %35, %cst_35 {dimension_numbers = #tpu.dot_dimension_numbers<[1], [0], [0], [1], [0, 0, 1, 1], [], []>} : vector<160x32xf32>, vector<32x32xf32>, vector<160x32xf32> -> vector<160x32xf32>
    %37 = arith.addf %31, %36 : vector<160x32xf32>
    %c1_36 = arith.constant 1 : index
    %c7_37 = arith.constant 7 : index
    %c0_38 = arith.constant 0 : index
    %38 = vector.load %arg7[%c1_36, %c7_37, %c0_38] : memref<12x32x32xf32, #tpu.memory_space<vmem>>, vector<10x16x32xf32>
    %39 = vector.shape_cast %38 : vector<10x16x32xf32> to vector<160x32xf32>
    %c3 = arith.constant 3 : index
    %c0_39 = arith.constant 0 : index
    %c0_40 = arith.constant 0 : index
    %40 = vector.load %arg3[%c3, %c0_39, %c0_40] : memref<9x32x32xf32, #tpu.memory_space<vmem>>, vector<1x32x32xf32>
    %41 = vector.shape_cast %40 : vector<1x32x32xf32> to vector<32x32xf32>
    %cst_41 = arith.constant dense<0.000000e+00> : vector<160x32xf32>
    %42 = tpu.matmul %39, %41, %cst_41 {dimension_numbers = #tpu.dot_dimension_numbers<[1], [0], [0], [1], [0, 0, 1, 1], [], []>} : vector<160x32xf32>, vector<32x32xf32>, vector<160x32xf32> -> vector<160x32xf32>
    %43 = arith.addf %37, %42 : vector<160x32xf32>
    %c1_42 = arith.constant 1 : index
    %c8_43 = arith.constant 8 : index
    %c0_44 = arith.constant 0 : index
    %44 = vector.load %arg7[%c1_42, %c8_43, %c0_44] : memref<12x32x32xf32, #tpu.memory_space<vmem>>, vector<10x16x32xf32>
    %45 = vector.shape_cast %44 : vector<10x16x32xf32> to vector<160x32xf32>
    %c4 = arith.constant 4 : index
    %c0_45 = arith.constant 0 : index
    %c0_46 = arith.constant 0 : index
    %46 = vector.load %arg3[%c4, %c0_45, %c0_46] : memref<9x32x32xf32, #tpu.memory_space<vmem>>, vector<1x32x32xf32>
    %47 = vector.shape_cast %46 : vector<1x32x32xf32> to vector<32x32xf32>
    %cst_47 = arith.constant dense<0.000000e+00> : vector<160x32xf32>
    %48 = tpu.matmul %45, %47, %cst_47 {dimension_numbers = #tpu.dot_dimension_numbers<[1], [0], [0], [1], [0, 0, 1, 1], [], []>} : vector<160x32xf32>, vector<32x32xf32>, vector<160x32xf32> -> vector<160x32xf32>
    %49 = arith.addf %43, %48 : vector<160x32xf32>
    %c1_48 = arith.constant 1 : index
    %c9_49 = arith.constant 9 : index
    %c0_50 = arith.constant 0 : index
    %50 = vector.load %arg7[%c1_48, %c9_49, %c0_50] : memref<12x32x32xf32, #tpu.memory_space<vmem>>, vector<10x16x32xf32>
    %51 = vector.shape_cast %50 : vector<10x16x32xf32> to vector<160x32xf32>
    %c5 = arith.constant 5 : index
    %c0_51 = arith.constant 0 : index
    %c0_52 = arith.constant 0 : index
    %52 = vector.load %arg3[%c5, %c0_51, %c0_52] : memref<9x32x32xf32, #tpu.memory_space<vmem>>, vector<1x32x32xf32>
    %53 = vector.shape_cast %52 : vector<1x32x32xf32> to vector<32x32xf32>
    %cst_53 = arith.constant dense<0.000000e+00> : vector<160x32xf32>
    %54 = tpu.matmul %51, %53, %cst_53 {dimension_numbers = #tpu.dot_dimension_numbers<[1], [0], [0], [1], [0, 0, 1, 1], [], []>} : vector<160x32xf32>, vector<32x32xf32>, vector<160x32xf32> -> vector<160x32xf32>
    %55 = arith.addf %49, %54 : vector<160x32xf32>
    %c2_54 = arith.constant 2 : index
    %c7_55 = arith.constant 7 : index
    %c0_56 = arith.constant 0 : index
    %56 = vector.load %arg7[%c2_54, %c7_55, %c0_56] : memref<12x32x32xf32, #tpu.memory_space<vmem>>, vector<10x16x32xf32>
    %57 = vector.shape_cast %56 : vector<10x16x32xf32> to vector<160x32xf32>
    %c6 = arith.constant 6 : index
    %c0_57 = arith.constant 0 : index
    %c0_58 = arith.constant 0 : index
    %58 = vector.load %arg3[%c6, %c0_57, %c0_58] : memref<9x32x32xf32, #tpu.memory_space<vmem>>, vector<1x32x32xf32>
    %59 = vector.shape_cast %58 : vector<1x32x32xf32> to vector<32x32xf32>
    %cst_59 = arith.constant dense<0.000000e+00> : vector<160x32xf32>
    %60 = tpu.matmul %57, %59, %cst_59 {dimension_numbers = #tpu.dot_dimension_numbers<[1], [0], [0], [1], [0, 0, 1, 1], [], []>} : vector<160x32xf32>, vector<32x32xf32>, vector<160x32xf32> -> vector<160x32xf32>
    %61 = arith.addf %55, %60 : vector<160x32xf32>
    %c2_60 = arith.constant 2 : index
    %c8_61 = arith.constant 8 : index
    %c0_62 = arith.constant 0 : index
    %62 = vector.load %arg7[%c2_60, %c8_61, %c0_62] : memref<12x32x32xf32, #tpu.memory_space<vmem>>, vector<10x16x32xf32>
    %63 = vector.shape_cast %62 : vector<10x16x32xf32> to vector<160x32xf32>
    %c7_63 = arith.constant 7 : index
    %c0_64 = arith.constant 0 : index
    %c0_65 = arith.constant 0 : index
    %64 = vector.load %arg3[%c7_63, %c0_64, %c0_65] : memref<9x32x32xf32, #tpu.memory_space<vmem>>, vector<1x32x32xf32>
    %65 = vector.shape_cast %64 : vector<1x32x32xf32> to vector<32x32xf32>
    %cst_66 = arith.constant dense<0.000000e+00> : vector<160x32xf32>
    %66 = tpu.matmul %63, %65, %cst_66 {dimension_numbers = #tpu.dot_dimension_numbers<[1], [0], [0], [1], [0, 0, 1, 1], [], []>} : vector<160x32xf32>, vector<32x32xf32>, vector<160x32xf32> -> vector<160x32xf32>
    %67 = arith.addf %61, %66 : vector<160x32xf32>
    %c2_67 = arith.constant 2 : index
    %c9_68 = arith.constant 9 : index
    %c0_69 = arith.constant 0 : index
    %68 = vector.load %arg7[%c2_67, %c9_68, %c0_69] : memref<12x32x32xf32, #tpu.memory_space<vmem>>, vector<10x16x32xf32>
    %69 = vector.shape_cast %68 : vector<10x16x32xf32> to vector<160x32xf32>
    %c8_70 = arith.constant 8 : index
    %c0_71 = arith.constant 0 : index
    %c0_72 = arith.constant 0 : index
    %70 = vector.load %arg3[%c8_70, %c0_71, %c0_72] : memref<9x32x32xf32, #tpu.memory_space<vmem>>, vector<1x32x32xf32>
    %71 = vector.shape_cast %70 : vector<1x32x32xf32> to vector<32x32xf32>
    %cst_73 = arith.constant dense<0.000000e+00> : vector<160x32xf32>
    %72 = tpu.matmul %69, %71, %cst_73 {dimension_numbers = #tpu.dot_dimension_numbers<[1], [0], [0], [1], [0, 0, 1, 1], [], []>} : vector<160x32xf32>, vector<32x32xf32>, vector<160x32xf32> -> vector<160x32xf32>
    %73 = arith.addf %67, %72 : vector<160x32xf32>
    %c0_74 = arith.constant 0 : index
    %c0_75 = arith.constant 0 : index
    %c0_76 = arith.constant 0 : index
    %74 = vector.load %arg5[%c0_74, %c0_75, %c0_76] : memref<4x1x32xf32, #tpu.memory_space<vmem>>, vector<1x1x32xf32>
    %75 = vector.shape_cast %74 : vector<1x1x32xf32> to vector<1x32xf32>
    %76 = vector.broadcast %75 : vector<1x32xf32> to vector<160x32xf32>
    %77 = arith.mulf %73, %76 : vector<160x32xf32>
    %c1_77 = arith.constant 1 : index
    %c0_78 = arith.constant 0 : index
    %c0_79 = arith.constant 0 : index
    %78 = vector.load %arg5[%c1_77, %c0_78, %c0_79] : memref<4x1x32xf32, #tpu.memory_space<vmem>>, vector<1x1x32xf32>
    %79 = vector.shape_cast %78 : vector<1x1x32xf32> to vector<1x32xf32>
    %80 = vector.broadcast %79 : vector<1x32xf32> to vector<160x32xf32>
    %81 = arith.addf %77, %80 : vector<160x32xf32>
    %cst_80 = arith.constant 0.000000e+00 : f32
    %82 = vector.broadcast %cst_80 : f32 to vector<160x32xf32>
    %83 = arith.maximumf %81, %82 : vector<160x32xf32>
    %cst_81 = arith.constant 0.000000e+00 : f32
    %84 = vector.broadcast %cst_81 : f32 to vector<10x8x32xf32>
    %c0_82 = arith.constant 0 : index
    %c0_83 = arith.constant 0 : index
    %c0_84 = arith.constant 0 : index
    %85 = vector.load %arg8[%c0_82, %c0_83, %c0_84] : memref<10x32x32xf32, #tpu.memory_space<vmem>>, vector<10x8x32xf32>
    tpu.vector_store %arg8[%c0_82, %c0_83, %c0_84], %84 {strides = array<i32>} : memref<10x32x32xf32, #tpu.memory_space<vmem>>, vector<10x8x32xf32>,
    %cst_85 = arith.constant 0.000000e+00 : f32
    %86 = vector.broadcast %cst_85 : f32 to vector<10x8x32xf32>
    %c0_86 = arith.constant 0 : index
    %c24_87 = arith.constant 24 : index
    %c0_88 = arith.constant 0 : index
    %87 = vector.load %arg8[%c0_86, %c24_87, %c0_88] : memref<10x32x32xf32, #tpu.memory_space<vmem>>, vector<10x8x32xf32>
    tpu.vector_store %arg8[%c0_86, %c24_87, %c0_88], %86 {strides = array<i32>} : memref<10x32x32xf32, #tpu.memory_space<vmem>>, vector<10x8x32xf32>,
    %88 = vector.shape_cast %83 : vector<160x32xf32> to vector<10x16x32xf32>
    %c0_89 = arith.constant 0 : index
    %c8_90 = arith.constant 8 : index
    %c0_91 = arith.constant 0 : index
    %89 = vector.load %arg8[%c0_89, %c8_90, %c0_91] : memref<10x32x32xf32, #tpu.memory_space<vmem>>, vector<10x16x32xf32>
    tpu.vector_store %arg8[%c0_89, %c8_90, %c0_91], %88 {strides = array<i32>} : memref<10x32x32xf32, #tpu.memory_space<vmem>>, vector<10x16x32xf32>,
    %c0_i32_92 = arith.constant 0 : i32
    %90 = arith.cmpi eq, %arg1, %c0_i32_92 : i32
    %91 = arith.extui %90 : i1 to i32
    %c0_i32_93 = arith.constant 0 : i32
    %92 = arith.cmpi ne, %91, %c0_i32_93 : i32
    scf.if %92 {
      %cst_170 = arith.constant 0.000000e+00 : f32
      %167 = vector.broadcast %cst_170 : f32 to vector<1x16x32xf32>
      %c0_171 = arith.constant 0 : index
      %c8_172 = arith.constant 8 : index
      %c0_173 = arith.constant 0 : index
      %168 = vector.load %arg8[%c0_171, %c8_172, %c0_173] : memref<10x32x32xf32, #tpu.memory_space<vmem>>, vector<1x16x32xf32>
      tpu.vector_store %arg8[%c0_171, %c8_172, %c0_173], %167 {strides = array<i32>} : memref<10x32x32xf32, #tpu.memory_space<vmem>>, vector<1x16x32xf32>,
    } else {
    }
    %c1_i32_94 = arith.constant 1 : i32
    %93 = arith.cmpi eq, %arg1, %c1_i32_94 : i32
    %94 = arith.extui %93 : i1 to i32
    %c0_i32_95 = arith.constant 0 : i32
    %95 = arith.cmpi ne, %94, %c0_i32_95 : i32
    scf.if %95 {
      %cst_170 = arith.constant 0.000000e+00 : f32
      %167 = vector.broadcast %cst_170 : f32 to vector<1x16x32xf32>
      %c9_171 = arith.constant 9 : index
      %c8_172 = arith.constant 8 : index
      %c0_173 = arith.constant 0 : index
      %168 = vector.load %arg8[%c9_171, %c8_172, %c0_173] : memref<10x32x32xf32, #tpu.memory_space<vmem>>, vector<1x16x32xf32>
      tpu.vector_store %arg8[%c9_171, %c8_172, %c0_173], %167 {strides = array<i32>} : memref<10x32x32xf32, #tpu.memory_space<vmem>>, vector<1x16x32xf32>,
    } else {
    }
    %cst_96 = arith.constant 0.000000e+00 : f32
    %96 = vector.broadcast %cst_96 : f32 to vector<128x32xf32>
    %c0_97 = arith.constant 0 : index
    %c7_98 = arith.constant 7 : index
    %c0_99 = arith.constant 0 : index
    %97 = vector.load %arg8[%c0_97, %c7_98, %c0_99] : memref<10x32x32xf32, #tpu.memory_space<vmem>>, vector<8x16x32xf32>
    %98 = vector.shape_cast %97 : vector<8x16x32xf32> to vector<128x32xf32>
    %c0_100 = arith.constant 0 : index
    %c0_101 = arith.constant 0 : index
    %c0_102 = arith.constant 0 : index
    %99 = vector.load %arg4[%c0_100, %c0_101, %c0_102] : memref<9x32x32xf32, #tpu.memory_space<vmem>>, vector<1x32x32xf32>
    %100 = vector.shape_cast %99 : vector<1x32x32xf32> to vector<32x32xf32>
    %cst_103 = arith.constant dense<0.000000e+00> : vector<128x32xf32>
    %101 = tpu.matmul %98, %100, %cst_103 {dimension_numbers = #tpu.dot_dimension_numbers<[1], [0], [0], [1], [0, 0, 1, 1], [], []>} : vector<128x32xf32>, vector<32x32xf32>, vector<128x32xf32> -> vector<128x32xf32>
    %102 = arith.addf %96, %101 : vector<128x32xf32>
    %c0_104 = arith.constant 0 : index
    %c8_105 = arith.constant 8 : index
    %c0_106 = arith.constant 0 : index
    %103 = vector.load %arg8[%c0_104, %c8_105, %c0_106] : memref<10x32x32xf32, #tpu.memory_space<vmem>>, vector<8x16x32xf32>
    %104 = vector.shape_cast %103 : vector<8x16x32xf32> to vector<128x32xf32>
    %c1_107 = arith.constant 1 : index
    %c0_108 = arith.constant 0 : index
    %c0_109 = arith.constant 0 : index
    %105 = vector.load %arg4[%c1_107, %c0_108, %c0_109] : memref<9x32x32xf32, #tpu.memory_space<vmem>>, vector<1x32x32xf32>
    %106 = vector.shape_cast %105 : vector<1x32x32xf32> to vector<32x32xf32>
    %cst_110 = arith.constant dense<0.000000e+00> : vector<128x32xf32>
    %107 = tpu.matmul %104, %106, %cst_110 {dimension_numbers = #tpu.dot_dimension_numbers<[1], [0], [0], [1], [0, 0, 1, 1], [], []>} : vector<128x32xf32>, vector<32x32xf32>, vector<128x32xf32> -> vector<128x32xf32>
    %108 = arith.addf %102, %107 : vector<128x32xf32>
    %c0_111 = arith.constant 0 : index
    %c9_112 = arith.constant 9 : index
    %c0_113 = arith.constant 0 : index
    %109 = vector.load %arg8[%c0_111, %c9_112, %c0_113] : memref<10x32x32xf32, #tpu.memory_space<vmem>>, vector<8x16x32xf32>
    %110 = vector.shape_cast %109 : vector<8x16x32xf32> to vector<128x32xf32>
    %c2_114 = arith.constant 2 : index
    %c0_115 = arith.constant 0 : index
    %c0_116 = arith.constant 0 : index
    %111 = vector.load %arg4[%c2_114, %c0_115, %c0_116] : memref<9x32x32xf32, #tpu.memory_space<vmem>>, vector<1x32x32xf32>
    %112 = vector.shape_cast %111 : vector<1x32x32xf32> to vector<32x32xf32>
    %cst_117 = arith.constant dense<0.000000e+00> : vector<128x32xf32>
    %113 = tpu.matmul %110, %112, %cst_117 {dimension_numbers = #tpu.dot_dimension_numbers<[1], [0], [0], [1], [0, 0, 1, 1], [], []>} : vector<128x32xf32>, vector<32x32xf32>, vector<128x32xf32> -> vector<128x32xf32>
    %114 = arith.addf %108, %113 : vector<128x32xf32>
    %c1_118 = arith.constant 1 : index
    %c7_119 = arith.constant 7 : index
    %c0_120 = arith.constant 0 : index
    %115 = vector.load %arg8[%c1_118, %c7_119, %c0_120] : memref<10x32x32xf32, #tpu.memory_space<vmem>>, vector<8x16x32xf32>
    %116 = vector.shape_cast %115 : vector<8x16x32xf32> to vector<128x32xf32>
    %c3_121 = arith.constant 3 : index
    %c0_122 = arith.constant 0 : index
    %c0_123 = arith.constant 0 : index
    %117 = vector.load %arg4[%c3_121, %c0_122, %c0_123] : memref<9x32x32xf32, #tpu.memory_space<vmem>>, vector<1x32x32xf32>
    %118 = vector.shape_cast %117 : vector<1x32x32xf32> to vector<32x32xf32>
    %cst_124 = arith.constant dense<0.000000e+00> : vector<128x32xf32>
    %119 = tpu.matmul %116, %118, %cst_124 {dimension_numbers = #tpu.dot_dimension_numbers<[1], [0], [0], [1], [0, 0, 1, 1], [], []>} : vector<128x32xf32>, vector<32x32xf32>, vector<128x32xf32> -> vector<128x32xf32>
    %120 = arith.addf %114, %119 : vector<128x32xf32>
    %c1_125 = arith.constant 1 : index
    %c8_126 = arith.constant 8 : index
    %c0_127 = arith.constant 0 : index
    %121 = vector.load %arg8[%c1_125, %c8_126, %c0_127] : memref<10x32x32xf32, #tpu.memory_space<vmem>>, vector<8x16x32xf32>
    %122 = vector.shape_cast %121 : vector<8x16x32xf32> to vector<128x32xf32>
    %c4_128 = arith.constant 4 : index
    %c0_129 = arith.constant 0 : index
    %c0_130 = arith.constant 0 : index
    %123 = vector.load %arg4[%c4_128, %c0_129, %c0_130] : memref<9x32x32xf32, #tpu.memory_space<vmem>>, vector<1x32x32xf32>
    %124 = vector.shape_cast %123 : vector<1x32x32xf32> to vector<32x32xf32>
    %cst_131 = arith.constant dense<0.000000e+00> : vector<128x32xf32>
    %125 = tpu.matmul %122, %124, %cst_131 {dimension_numbers = #tpu.dot_dimension_numbers<[1], [0], [0], [1], [0, 0, 1, 1], [], []>} : vector<128x32xf32>, vector<32x32xf32>, vector<128x32xf32> -> vector<128x32xf32>
    %126 = arith.addf %120, %125 : vector<128x32xf32>
    %c1_132 = arith.constant 1 : index
    %c9_133 = arith.constant 9 : index
    %c0_134 = arith.constant 0 : index
    %127 = vector.load %arg8[%c1_132, %c9_133, %c0_134] : memref<10x32x32xf32, #tpu.memory_space<vmem>>, vector<8x16x32xf32>
    %128 = vector.shape_cast %127 : vector<8x16x32xf32> to vector<128x32xf32>
    %c5_135 = arith.constant 5 : index
    %c0_136 = arith.constant 0 : index
    %c0_137 = arith.constant 0 : index
    %129 = vector.load %arg4[%c5_135, %c0_136, %c0_137] : memref<9x32x32xf32, #tpu.memory_space<vmem>>, vector<1x32x32xf32>
    %130 = vector.shape_cast %129 : vector<1x32x32xf32> to vector<32x32xf32>
    %cst_138 = arith.constant dense<0.000000e+00> : vector<128x32xf32>
    %131 = tpu.matmul %128, %130, %cst_138 {dimension_numbers = #tpu.dot_dimension_numbers<[1], [0], [0], [1], [0, 0, 1, 1], [], []>} : vector<128x32xf32>, vector<32x32xf32>, vector<128x32xf32> -> vector<128x32xf32>
    %132 = arith.addf %126, %131 : vector<128x32xf32>
    %c2_139 = arith.constant 2 : index
    %c7_140 = arith.constant 7 : index
    %c0_141 = arith.constant 0 : index
    %133 = vector.load %arg8[%c2_139, %c7_140, %c0_141] : memref<10x32x32xf32, #tpu.memory_space<vmem>>, vector<8x16x32xf32>
    %134 = vector.shape_cast %133 : vector<8x16x32xf32> to vector<128x32xf32>
    %c6_142 = arith.constant 6 : index
    %c0_143 = arith.constant 0 : index
    %c0_144 = arith.constant 0 : index
    %135 = vector.load %arg4[%c6_142, %c0_143, %c0_144] : memref<9x32x32xf32, #tpu.memory_space<vmem>>, vector<1x32x32xf32>
    %136 = vector.shape_cast %135 : vector<1x32x32xf32> to vector<32x32xf32>
    %cst_145 = arith.constant dense<0.000000e+00> : vector<128x32xf32>
    %137 = tpu.matmul %134, %136, %cst_145 {dimension_numbers = #tpu.dot_dimension_numbers<[1], [0], [0], [1], [0, 0, 1, 1], [], []>} : vector<128x32xf32>, vector<32x32xf32>, vector<128x32xf32> -> vector<128x32xf32>
    %138 = arith.addf %132, %137 : vector<128x32xf32>
    %c2_146 = arith.constant 2 : index
    %c8_147 = arith.constant 8 : index
    %c0_148 = arith.constant 0 : index
    %139 = vector.load %arg8[%c2_146, %c8_147, %c0_148] : memref<10x32x32xf32, #tpu.memory_space<vmem>>, vector<8x16x32xf32>
    %140 = vector.shape_cast %139 : vector<8x16x32xf32> to vector<128x32xf32>
    %c7_149 = arith.constant 7 : index
    %c0_150 = arith.constant 0 : index
    %c0_151 = arith.constant 0 : index
    %141 = vector.load %arg4[%c7_149, %c0_150, %c0_151] : memref<9x32x32xf32, #tpu.memory_space<vmem>>, vector<1x32x32xf32>
    %142 = vector.shape_cast %141 : vector<1x32x32xf32> to vector<32x32xf32>
    %cst_152 = arith.constant dense<0.000000e+00> : vector<128x32xf32>
    %143 = tpu.matmul %140, %142, %cst_152 {dimension_numbers = #tpu.dot_dimension_numbers<[1], [0], [0], [1], [0, 0, 1, 1], [], []>} : vector<128x32xf32>, vector<32x32xf32>, vector<128x32xf32> -> vector<128x32xf32>
    %144 = arith.addf %138, %143 : vector<128x32xf32>
    %c2_153 = arith.constant 2 : index
    %c9_154 = arith.constant 9 : index
    %c0_155 = arith.constant 0 : index
    %145 = vector.load %arg8[%c2_153, %c9_154, %c0_155] : memref<10x32x32xf32, #tpu.memory_space<vmem>>, vector<8x16x32xf32>
    %146 = vector.shape_cast %145 : vector<8x16x32xf32> to vector<128x32xf32>
    %c8_156 = arith.constant 8 : index
    %c0_157 = arith.constant 0 : index
    %c0_158 = arith.constant 0 : index
    %147 = vector.load %arg4[%c8_156, %c0_157, %c0_158] : memref<9x32x32xf32, #tpu.memory_space<vmem>>, vector<1x32x32xf32>
    %148 = vector.shape_cast %147 : vector<1x32x32xf32> to vector<32x32xf32>
    %cst_159 = arith.constant dense<0.000000e+00> : vector<128x32xf32>
    %149 = tpu.matmul %146, %148, %cst_159 {dimension_numbers = #tpu.dot_dimension_numbers<[1], [0], [0], [1], [0, 0, 1, 1], [], []>} : vector<128x32xf32>, vector<32x32xf32>, vector<128x32xf32> -> vector<128x32xf32>
    %150 = arith.addf %144, %149 : vector<128x32xf32>
    %151 = vector.shape_cast %150 : vector<128x32xf32> to vector<8x16x32xf32>
    %c2_160 = arith.constant 2 : index
    %c0_161 = arith.constant 0 : index
    %c0_162 = arith.constant 0 : index
    %152 = vector.load %arg5[%c2_160, %c0_161, %c0_162] : memref<4x1x32xf32, #tpu.memory_space<vmem>>, vector<1x1x32xf32>
    %153 = vector.shape_cast %152 : vector<1x1x32xf32> to vector<1x32xf32>
    %154 = vector.shape_cast %153 : vector<1x32xf32> to vector<1x1x32xf32>
    %155 = vector.broadcast %154 : vector<1x1x32xf32> to vector<8x16x32xf32>
    %156 = arith.mulf %151, %155 : vector<8x16x32xf32>
    %c3_163 = arith.constant 3 : index
    %c0_164 = arith.constant 0 : index
    %c0_165 = arith.constant 0 : index
    %157 = vector.load %arg5[%c3_163, %c0_164, %c0_165] : memref<4x1x32xf32, #tpu.memory_space<vmem>>, vector<1x1x32xf32>
    %158 = vector.shape_cast %157 : vector<1x1x32xf32> to vector<1x32xf32>
    %159 = vector.shape_cast %158 : vector<1x32xf32> to vector<1x1x32xf32>
    %160 = vector.broadcast %159 : vector<1x1x32xf32> to vector<8x16x32xf32>
    %161 = arith.addf %156, %160 : vector<8x16x32xf32>
    %162 = arith.addf %161, %11 : vector<8x16x32xf32>
    %cst_166 = arith.constant 0.000000e+00 : f32
    %163 = vector.broadcast %cst_166 : f32 to vector<8x16x32xf32>
    %164 = arith.maximumf %162, %163 : vector<8x16x32xf32>
    %165 = vector.shape_cast %164 : vector<8x16x32xf32> to vector<1x8x512xf32>
    %c0_167 = arith.constant 0 : index
    %c0_168 = arith.constant 0 : index
    %c0_169 = arith.constant 0 : index
    %166 = vector.load %arg6[%c0_167, %c0_168, %c0_169] : memref<1x8x512xf32, #tpu.memory_space<vmem>>, vector<1x8x512xf32>
    tpu.vector_store %arg6[%c0_167, %c0_168, %c0_169], %165 {strides = array<i32>} : memref<1x8x512xf32, #tpu.memory_space<vmem>>, vector<1x8x512xf32>,
    return
  }
  func.func @transform_0(%arg0: i32, %arg1: i32) -> (i32, i32, i32, i32) {
    %c0_i32 = arith.constant 0 : i32
    %c0_i32_0 = arith.constant 0 : i32
    %c0_i32_1 = arith.constant 0 : i32
    %c0_i32_2 = arith.constant 0 : i32
    return %arg0, %c0_i32, %c0_i32_0, %c0_i32_1 : i32, i32, i32, i32
  }
  func.func @transform_1(%arg0: i32, %arg1: i32) -> (i32, i32, i32) {
    %c0_i32 = arith.constant 0 : i32
    %c0_i32_0 = arith.constant 0 : i32
    %c0_i32_1 = arith.constant 0 : i32
    %c0_i32_2 = arith.constant 0 : i32
    return %c0_i32, %c0_i32_0, %c0_i32_1 : i32, i32, i32
  }
  func.func @transform_2(%arg0: i32, %arg1: i32) -> (i32, i32, i32) {
    %c0_i32 = arith.constant 0 : i32
    %c0_i32_0 = arith.constant 0 : i32
    %c0_i32_1 = arith.constant 0 : i32
    %c0_i32_2 = arith.constant 0 : i32
    return %c0_i32, %c0_i32_0, %c0_i32_1 : i32, i32, i32
  }
  func.func @transform_3(%arg0: i32, %arg1: i32) -> (i32, i32, i32) {
    %c0_i32 = arith.constant 0 : i32
    %c0_i32_0 = arith.constant 0 : i32
    %c0_i32_1 = arith.constant 0 : i32
    %c0_i32_2 = arith.constant 0 : i32
    return %c0_i32, %c0_i32_0, %c0_i32_1 : i32, i32, i32
  }
  func.func @transform_4(%arg0: i32, %arg1: i32) -> (i32, i32, i32) {
    %c0_i32 = arith.constant 0 : i32
    %c0_i32_0 = arith.constant 0 : i32
    return %arg0, %arg1, %c0_i32 : i32, i32, i32
  }
}

</mosaic_0001>

<bundles_post_ra>
// kernel: tpu_custom_call.1
= control target key start
LH: loop header
LB: loop body
LE: loop exit
PB: predicated region body
PF: predicated region fallthrough
CT: control target
= control target key end

     0   :  { %s6665_s0 = inlined_call_operand.hbm [shape: f32[2,16,16,32], index: 0, kind: input, shape index: {}]   ;;  %s6666_s1 = inlined_call_operand.hbm [shape: f32[9,32,32], index: 1, kind: input, shape index: {}]   ;;  %s6667_s2 = inlined_call_operand.hbm [shape: f32[9,32,32], index: 2, kind: input, shape index: {}]   ;;  %s6668_s3 = inlined_call_operand.hbm [shape: f32[4,1,32], index: 3, kind: input, shape index: {}]   ;;  %s6669_s4 = inlined_call_operand.hbm [shape: f32[2,16,512], index: 4, kind: output, shape index: {}]  }
   0x1   :  { %6695 = sst [smem:[#allocation73_spill]] %s6666_s1 }
   0x2   :  { %6696 = sst [smem:[#allocation74_spill]] %s6667_s2 }
   0x3   :  { %6697 = sst [smem:[#allocation75_spill]] %s6668_s3 }
   0x4   :  { %9 = vsyncpa [#allocation5], 0 }
   0x5   :  { %11 = vsyncpa [#allocation5 + $0x1], 0 }
   0x6   :  { %12 = vsyncpa [#allocation8], 0 }
   0x7   :  { %13 = vsyncpa [#allocation11], 0 }
   0x8   :  { %14 = vsyncpa [#allocation6], 0 }
   0x9   :  { %16 = vsyncpa [#allocation6 + $0x1], 0  ;;  %s4742_s15 = smov 0   ;;  %s4744_s16 = smov 0  }
   0xa   :  { %s4746_s17 = smov 0   ;;  %s4748_s18 = smov 0  }
   0xb   :  { %s4750_s19 = smov 0   ;;  %s4752_s20 = smov 0  }
   0xc   :  { %s4754_s21 = smov 0   ;;  %s4756_s22 = smov 0  }
   0xd   :  { %s4758_s23 = smov 0   ;;  %s4760_s24 = smov 0  }
   0xe   :  { %s4762_s25 = smov 0  }
   0xf LB: > { %6698 = sst [smem:[#allocation17_spill]] %s4660_s15  ;;  %s3926_s26 = sadd.s32 4294967295, %s4700_s25   ;;  %s4700_s25 = sphi %s4762_s25, %s22_s25   ;;  %s4696_s24 = sphi %s4760_s24, %s6831_s24   ;;  %s4692_s23 = sphi %s4758_s23, %s6822_s23   ;;  %s4688_s22 = sphi %s4756_s22, %s6830_s22   ;;  %s4684_s21 = sphi %s4754_s21, %s6821_s21   ;;  %s4680_s20 = sphi %s4752_s20, %s6829_s20   ;;  %s4676_s19 = sphi %s4750_s19, %s6828_s19   ;;  %s4672_s18 = sphi %s4748_s18, %s6827_s18   ;;  %s4668_s17 = sphi %s4746_s17, %s6826_s17   ;;  %s4664_s16 = sphi %s4744_s16, %s6825_s16   ;;  %s4660_s15 = sphi %s4742_s15, %s6824_s15  }
  0x10   : > { %6699 = sst [smem:[#allocation18_spill]] %s4692_s23  ;;  %s3927_s27 = sadd.s32 4294967294, %s4700_s25  }
  0x11   : > { %p54_p0 = scmp.ne.s32.totalorder %s4676_s19, %s4672_s18  ;;  %p4798_p1 = scmp.eq.s32.totalorder %s3926_s26, 0 }
  0x12   : > { %p142_p2 = scmp.ne.s32.totalorder %s4668_s17, %s4664_s16  ;;  %p143_p3 = scmp.eq.s32.totalorder %s3926_s26, 3 }
  0x13   : > { %p4806_p4 = por %p4798_p1, %p54_p0  ;;  %p148_p5 = scmp.ne.s32.totalorder %s4664_s16, %s4660_s15 }
  0x14   : > { %p4812_p6 = por %p143_p3, %p142_p2  ;;  %p149_p7 = scmp.eq.s32.totalorder %s3927_s27, 3 }
  0x15   : > { %p3928_p8 = scmp.ge.s32.totalorder %s4700_s25, 1  ;;  %p156_p9 = scmp.lt.s32.totalorder %s4700_s25, 5 }
  0x16   : > { %s6702_s30 = scalar_select %p4812_p6, 1, 0 }
  0x17   : > { %p4818_p10 = por %p149_p7, %p148_p5  ;;  %p4822_p11 = pnand %p3928_p8, %p156_p9 }
  0x18   : > { %6703 = sst [smem:[#allocation19_spill]] %s6702_s30  ;;  %s4702_s10 = smov [#allocation7]  }
  0x19   : > { %s6704_s5 = scalar_select %p4818_p10, 1, 0 }
  0x1a   : > { %s6707_s1 = sld [smem:[#allocation73_spill]]  ;;  %p4317_p12 = pneg %p4822_p11 }
  0x1b   : > { %6705 = sst [smem:[#allocation20_spill]] %s6704_s5  ;;  %s169_s11 = sshll.u32 %s4702_s10, 4  ;;  %s170_s11 = int_to_ptr.vmem [resolvable:$true] %s169_s11 }
  0x1c   : > { %p4833_p13 = pnand %p4317_p12, %p4798_p1  ;;  %s6709_s2 = sld [smem:[#allocation74_spill]] }
  0x1d   : > { %s6670_s26 = smov 128   ;;  %s6671_s27 = smov 8  }
  0x1e   : > { %s6710_s3 = sld [smem:[#allocation75_spill]]  ;;  %s4705_s13 = smov [#allocation9]  }
  0x1f   : > { %s183_s14 = sshll.u32 %s4705_s13, 4  ;;  %s4707_s7 = smov 16   ;;  %s184_s14 = int_to_ptr.vmem [resolvable:$true] %s183_s14 }
  0x20   : > { %s167_s9 = sshll.u32 %s6707_s1, 4  ;;  %s4708_s8 = smov 1   ;;  %s168_s9 = int_to_ptr.hbm [resolvable:$true] %s167_s9 }
  0x21   : > { %4320 = dma.hbm_to_vmem [thread:$0]  (!%p4833_p13), %s168_s9, 4608, %s170_s11, [#allocation8], %s6670_s26, %s6670_s26, %s6671_s27  }
  0x22   : > { %s181_s18 = sshll.u32 %s6709_s2, 4  ;;  %s4706_s9 = smov [#allocation10]   ;;  %s182_s18 = int_to_ptr.hbm [resolvable:$true] %s181_s18 }
  0x23   : > { %4323 = dma.hbm_to_vmem [thread:$0]  (!%p4833_p13), %s182_s18, 4608, %s184_s14, [#allocation8], %s6670_s26, %s6670_s26, %s6671_s27  }
  0x24   : > { %s195_s10 = sshll.u32 %s6710_s3, 4  ;;  %s197_s11 = sshll.u32 %s4706_s9, 4  ;;  %s196_s10 = int_to_ptr.hbm [resolvable:$true] %s195_s10  ;;  %s198_s11 = int_to_ptr.vmem [resolvable:$true] %s197_s11 }
  0x25   : > { %4326 = dma.hbm_to_vmem [thread:$0]  (!%p4833_p13), %s196_s10, 64, %s198_s11, [#allocation11], %s4707_s7, %s4707_s7, %s4708_s8  }
  0x26   : > { %s31_s13 = sadd.s32 1, %s4692_s23  ;;  %s34_s1 = sadd.s32 1, %s4696_s24 }
  0x27   : > { %p32_p0 = scmp.ge.s32.totalorder %s31_s13, 2  ;;  %s41_s2 = sadd.s32 1, %s4680_s20 }
  0x28   : > { %p48_p2 = scmp.ne.s32.totalorder %s4680_s20, %s4676_s19  ;;  %p49_p3 = scmp.eq.s32.totalorder %s4700_s25, 0 }
  0x29   : > { %s6833_s13 = smov (%p32_p0, %s31_s13), 0  ;;  %s6835_s1 = smov (!%p32_p0, %s34_s1), %s4696_s24 }
  0x2a   : > { %6711 = sst [smem:[#allocation21_spill]] %s6833_s13  ;;  %p4864_p5 = por %p49_p3, %p48_p2 }
  0x2b   : > { %s128_s12 = ssub.s32 %s4692_s23, %s6833_s13  ;;  %p36_p7 = scmp.ge.s32.totalorder %s6835_s1, 2 }
  0x2c   : > { %s132_s10 = sadd.s32 1, %s4668_s17  ;;  %p4338_p8 = scmp.lt.s32.totalorder %s4700_s25, 4 }
  0x2d   : > { %s211_s14 = sand.u32 1, %s4680_s20   ;;  %s6837_s1 = smov (%p36_p7, %s6835_s1), 0 }
  0x2e   : > { %6713 = sst [smem:[#allocation22_spill]] %s6837_s1  ;;  %s3933_s9 = sshll.u32 %s211_s14, 8 }
  0x2f   : > { %s38_s11 = ssub.s32 %s4696_s24, %s6837_s1  ;;  %s4286_s8 = sshll.u32 %s4696_s24, 8 }
  0x30   : > { %p39_p9 = scmp.eq.s32.totalorder %s38_s11, 0  ;;  %s129_s7 = sor.u32 %s128_s12, %s38_s11 }
  0x31   : > { %p130_p12 = scmp.eq.s32.totalorder %s129_s7, 0  ;;  %s220_s23 = scalar_lea.hbm %s6665_s0, %s4286_s8 }
  0x32   : > { %s4879_s26 = scalar_select %p39_p9, %s4680_s20, %s41_s2  }
  0x33   : > { %s4882_s27 = scalar_select %p130_p12, %s4668_s17, %s132_s10  }
  0x34   : > { %s215_s5 = scalar_lea.vmem [#allocation4], %s3933_s9  ;;  %s221_s30 = sshll.u32 %s220_s23, 4  ;;  %s222_s30 = int_to_ptr.hbm [resolvable:$true] %s221_s30 }
  0x35   : > { %s223_s15 = sshll.u32 %s215_s5, 4  ;;  %p4328_p13 = pnand %p4338_p8, %p4864_p5  ;;  %s224_s15 = int_to_ptr.vmem [resolvable:$true] %s223_s15 }
  0x36   : > { %s212_s1 = scalar_lea.sflag [#allocation5], %s211_s14  ;;  %s6714_s12 = smov 8  }
  0x37   : > { %s6715_s11 = smov 128   ;;  %235 = sbr.rel (%p4822_p11) target bundleno = 1497 (0x5d9), region = 36 }
  0x38   : > { %4330 = dma.hbm_to_vmem [thread:$0]  (!%p4328_p13), %s222_s30, 4096, %s224_s15, %s212_s1, %s6715_s11, %s6715_s11, %s6714_s12  }
  0x3c   : > { %s237_s2 = sand.u32 1, %s4676_s19  }
  0x3d   : > { %s4897_s3 = sshll.u32 %s237_s2, 8  ;;  %s238_s23 = scalar_lea.sflag [#allocation5], %s237_s2 }
  0x3e   : > { %s241_s5 = scalar_lea.vmem [#allocation4], %s4897_s3 }
  0x3f   : > { %4643 = dma.done.wait (%p4806_p4), %s238_s23, 4096  }
  0x40   : > { %4645 = vsyncadd (%p4806_p4), %s238_s23, 4294963200 }
  0x41   : > { %4647 = dma.done.wait (%p4798_p1), [#allocation8], 9216  }
  0x42   : > { %4649 = vsyncadd (%p4798_p1), [#allocation8], 4294958080 }
  0x43   : > { %4651 = dma.done.wait (%p4798_p1), [#allocation11], 64  }
  0x44   : > { %4653 = vsyncadd (%p4798_p1), [#allocation11], 4294967232  ;;  %s279_s1 = sand.u32 1, %s4664_s16   ;;  %s3942_s15 = sshll.u32 %s4684_s21, 3  ;;  %vm283_vm0 = vcmask 261120   ;;  %v4709_v0 = vmov 0.0  }
  0x45   : > { %s4916_s29 = sshll.u32 %s279_s1, 5  ;;  %284 = vst.msk [vmem:[#allocation2] sm:$0xff] %vm283_vm0, %v4709_v0  ;;  %s4287_s28 = sshll.u32 %s4684_s21, 7 }
  0x46   : > { %285 = vst.msk [vmem:[#allocation2 + $0x20] sm:$0xff] %vm283_vm0, %v4709_v0  ;;  %s4975_s30 = scalar_lea.vmem %s241_s5, %s4287_s28 [#allocation4]  ;;  %s5068_s6 = scalar_lea.vmem [#allocation12], %s4916_s29 }
  0x47   : > { %286 = vst.msk [vmem:[#allocation2 + $0x40] sm:$0xff] %vm283_vm0, %v4709_v0  ;;  %v4984_v1 = vld [vmem:[%s4975_s30] sm:$0xff]  ;;  %v4989_v2 = vld [vmem:[%s4975_s30 + $0x8] sm:$0xff]  ;;  %v4994_v3 = vld [vmem:[%s4975_s30 + $0x10] sm:$0xff]  ;;  %p3944_p1 = scmp.le.s32.totalorder %s4684_s21, 0 }
  0x48   : > { %287 = vst.msk [vmem:[#allocation2 + $0x60] sm:$0xff] %vm283_vm0, %v4709_v0  ;;  %v4999_v4 = vld [vmem:[%s4975_s30 + $0x18] sm:$0xff]  ;;  %v5004_v5 = vld [vmem:[%s4975_s30 + $0x20] sm:$0xff]  ;;  %v5009_v6 = vld [vmem:[%s4975_s30 + $0x28] sm:$0xff]  ;;  %s3945_s13 = sadd.s32 (!%p3944_p1), 4294967294, %s3942_s15 }
  0x49   : > { %288 = vst.msk [vmem:[#allocation2 + $0x80] sm:$0xff] %vm283_vm0, %v4709_v0  ;;  %v5014_v7 = vld [vmem:[%s4975_s30 + $0x30] sm:$0xff]  ;;  %v5019_v8 = vld [vmem:[%s4975_s30 + $0x38] sm:$0xff]  ;;  %v5024_v9 = vld [vmem:[%s4975_s30 + $0x40] sm:$0xff]  ;;  %s3946_s18 = sshll.u32 (!%p3944_p1), %s3945_s13, 4 }
  0x4a   : > { %289 = vst.msk [vmem:[#allocation2 + $0xa0] sm:$0xff] %vm283_vm0, %v4709_v0  ;;  %v5029_v10 = vld [vmem:[%s4975_s30 + $0x48] sm:$0xff]  ;;  %v5034_v11 = vld [vmem:[%s4975_s30 + $0x50] sm:$0xff]  ;;  %v5039_v12 = vld [vmem:[%s4975_s30 + $0x58] sm:$0xff]  ;;  %s358_s10 = scalar_lea.vmem (!%p3944_p1), %s241_s5, %s3946_s18 [#allocation4] }
  0x4b   : > { %290 = vst.msk [vmem:[#allocation2 + $0xc0] sm:$0xff] %vm283_vm0, %v4709_v0  ;;  %v5044_v13 = vld [vmem:[%s4975_s30 + $0x60] sm:$0xff]  ;;  %v5049_v14 = vld [vmem:[%s4975_s30 + $0x68] sm:$0xff]  ;;  %v5054_v15 = vld [vmem:[%s4975_s30 + $0x70] sm:$0xff] }
  0x4c   : > { %291 = vst.msk [vmem:[#allocation2 + $0xe0] sm:$0xff] %vm283_vm0, %v4709_v0  ;;  %v5059_v16 = vld [vmem:[%s4975_s30 + $0x78] sm:$0xff] }
  0x4d   : > { %292 = vst.msk [vmem:[#allocation2 + $0x100] sm:$0xff] %vm283_vm0, %v4709_v0 }
  0x4e   : > { %293 = vst.msk [vmem:[#allocation2 + $0x120] sm:$0xff] %vm283_vm0, %v4709_v0 }
  0x4f   : > { %294 = vst.msk [vmem:[#allocation2 + $0x140] sm:$0xff] %vm283_vm0, %v4709_v0 }
  0x50   : > { %295 = vst.msk [vmem:[#allocation2 + $0x160] sm:$0xff] %vm283_vm0, %v4709_v0 }
  0x51   : > { %296 = vst.msk [vmem:[#allocation2 + $0x18] sm:$0xff] %vm283_vm0, %v4709_v0 }
  0x52   : > { %297 = vst.msk [vmem:[#allocation2 + $0x38] sm:$0xff] %vm283_vm0, %v4709_v0 }
  0x53   : > { %298 = vst.msk [vmem:[#allocation2 + $0x58] sm:$0xff] %vm283_vm0, %v4709_v0 }
  0x54   : > { %299 = vst.msk [vmem:[#allocation2 + $0x78] sm:$0xff] %vm283_vm0, %v4709_v0 }
  0x55   : > { %300 = vst.msk [vmem:[#allocation2 + $0x98] sm:$0xff] %vm283_vm0, %v4709_v0 }
  0x56   : > { %301 = vst.msk [vmem:[#allocation2 + $0xb8] sm:$0xff] %vm283_vm0, %v4709_v0 }
  0x57   : > { %302 = vst.msk [vmem:[#allocation2 + $0xd8] sm:$0xff] %vm283_vm0, %v4709_v0 }
  0x58   : > { %303 = vst.msk [vmem:[#allocation2 + $0xf8] sm:$0xff] %vm283_vm0, %v4709_v0 }
  0x59   : > { %304 = vst.msk [vmem:[#allocation2 + $0x118] sm:$0xff] %vm283_vm0, %v4709_v0 }
  0x5a   : > { %305 = vst.msk [vmem:[#allocation2 + $0x138] sm:$0xff] %vm283_vm0, %v4709_v0 }
  0x5b   : > { %306 = vst.msk [vmem:[#allocation2 + $0x158] sm:$0xff] %vm283_vm0, %v4709_v0 }
  0x5c   : > { %307 = vst.msk [vmem:[#allocation2 + $0x178] sm:$0xff] %vm283_vm0, %v4709_v0 }
  0x5d   : > { %308 = vst.msk [vmem:[#allocation2 + $0x8] sm:$0xff] %vm283_vm0, %v4709_v0 }
  0x5e   : > { %309 = vst.msk [vmem:[#allocation2 + $0x10] sm:$0xff] %vm283_vm0, %v4709_v0 }
  0x5f   : > { %310 = vst.msk [vmem:[#allocation2 + $0x28] sm:$0xff] %vm283_vm0, %v4709_v0 }
  0x60   : > { %311 = vst.msk [vmem:[#allocation2 + $0x30] sm:$0xff] %vm283_vm0, %v4709_v0 }
  0x61   : > { %313 = vst.msk [vmem:[#allocation2 + $0x148] sm:$0xff] %vm283_vm0, %v4709_v0 }
  0x62   : > { %314 = vst.msk [vmem:[#allocation2 + $0x150] sm:$0xff] %vm283_vm0, %v4709_v0 }
  0x63   : > { %6716 = vst [vmem:[#allocation23_spill] sm:$0xff] %v4984_v1 }
  0x64   : > { %315 = vst.msk [vmem:[#allocation2 + $0x168] sm:$0xff] %vm283_vm0, %v4709_v0 }
  0x65   : > { %6717 = vst [vmem:[#allocation24_spill] sm:$0xff] %v4989_v2 }
  0x66   : > { %316 = vst.msk [vmem:[#allocation2 + $0x170] sm:$0xff] %vm283_vm0, %v4709_v0 }
  0x67   : > { %6718 = vst [vmem:[#allocation25_spill] sm:$0xff] %v4994_v3 }
  0x68   : > { %336 = vst.msk [vmem:[#allocation2 + $0x48] sm:$0xff] %vm283_vm0, %v4984_v1 }
  0x69   : > { %6719 = vst [vmem:[#allocation26_spill] sm:$0xff] %v4999_v4 }
  0x6a   : > { %337 = vst.msk [vmem:[#allocation2 + $0x50] sm:$0xff] %vm283_vm0, %v4989_v2 }
  0x6b   : > { %6720 = vst [vmem:[#allocation27_spill] sm:$0xff] %v5004_v5 }
  0x6c   : > { %338 = vst.msk [vmem:[#allocation2 + $0x68] sm:$0xff] %vm283_vm0, %v4994_v3 }
  0x6d   : > { %6721 = vst [vmem:[#allocation28_spill] sm:$0xff] %v5009_v6 }
  0x6e   : > { %339 = vst.msk [vmem:[#allocation2 + $0x70] sm:$0xff] %vm283_vm0, %v4999_v4 }
  0x6f   : > { %6722 = vst [vmem:[#allocation29_spill] sm:$0xff] %v5014_v7 }
  0x70   : > { %340 = vst.msk [vmem:[#allocation2 + $0x88] sm:$0xff] %vm283_vm0, %v5004_v5 }
  0x71   : > { %6723 = vst [vmem:[#allocation30_spill] sm:$0xff] %v5019_v8 }
  0x72   : > { %341 = vst.msk [vmem:[#allocation2 + $0x90] sm:$0xff] %vm283_vm0, %v5009_v6 }
  0x73   : > { %6724 = vst [vmem:[#allocation31_spill] sm:$0xff] %v5024_v9 }
  0x74   : > { %342 = vst.msk [vmem:[#allocation2 + $0xa8] sm:$0xff] %vm283_vm0, %v5014_v7 }
  0x75   : > { %6725 = vst [vmem:[#allocation32_spill] sm:$0xff] %v5029_v10 }
  0x76   : > { %343 = vst.msk [vmem:[#allocation2 + $0xb0] sm:$0xff] %vm283_vm0, %v5019_v8 }
  0x77   : > { %6726 = vst [vmem:[#allocation33_spill] sm:$0xff] %v5034_v11 }
  0x78   : > { %344 = vst.msk [vmem:[#allocation2 + $0xc8] sm:$0xff] %vm283_vm0, %v5024_v9 }
  0x79   : > { %6727 = vst [vmem:[#allocation34_spill] sm:$0xff] %v5039_v12 }
  0x7a   : > { %345 = vst.msk [vmem:[#allocation2 + $0xd0] sm:$0xff] %vm283_vm0, %v5029_v10 }
  0x7b   : > { %6728 = vst [vmem:[#allocation35_spill] sm:$0xff] %v5044_v13 }
  0x7c   : > { %346 = vst.msk [vmem:[#allocation2 + $0xe8] sm:$0xff] %vm283_vm0, %v5034_v11 }
  0x7d   : > { %6729 = vst [vmem:[#allocation36_spill] sm:$0xff] %v5049_v14 }
  0x7e   : > { %347 = vst.msk [vmem:[#allocation2 + $0xf0] sm:$0xff] %vm283_vm0, %v5039_v12 }
  0x7f   : > { %6730 = vst [vmem:[#allocation37_spill] sm:$0xff] %v5054_v15 }
  0x80   : > { %348 = vst.msk [vmem:[#allocation2 + $0x108] sm:$0xff] %vm283_vm0, %v5044_v13  ;;  %355 = sbr.rel (%p3944_p1) target bundleno = 138 (0x8a), region = 56 }
  0x81   : > { %6731 = vst [vmem:[#allocation38_spill] sm:$0xff] %v5059_v16 }
  0x82   : > { %349 = vst.msk [vmem:[#allocation2 + $0x110] sm:$0xff] %vm283_vm0, %v5049_v14 }
  0x83   : > { %350 = vst.msk [vmem:[#allocation2 + $0x128] sm:$0xff] %vm283_vm0, %v5054_v15 }
  0x84   : > { %351 = vst.msk [vmem:[#allocation2 + $0x130] sm:$0xff] %vm283_vm0, %v5059_v16 }
  0x85   : > { %v359_v17 = vld [vmem:[%s358_s10] sm:$0xff]  ;;  %v360_v18 = vld [vmem:[%s358_s10 + $0x8] sm:$0xff]  ;;  %v361_v19 = vld [vmem:[%s358_s10 + $0x10] sm:$0xff] }
  0x86   : > { %363 = vst.msk [vmem:[#allocation2 + $0x8] sm:$0xff] %vm283_vm0, %v359_v17  ;;  %v362_v20 = vld [vmem:[%s358_s10 + $0x18] sm:$0xff] }
  0x87   : > { %364 = vst.msk [vmem:[#allocation2 + $0x10] sm:$0xff] %vm283_vm0, %v360_v18 }
  0x88   : > { %365 = vst.msk [vmem:[#allocation2 + $0x28] sm:$0xff] %vm283_vm0, %v361_v19 }
  0x89   : > { %366 = vst.msk [vmem:[#allocation2 + $0x30] sm:$0xff] %vm283_vm0, %v362_v20 }
  0x8a PF: > { %p3947_p4 = scmp.ge.s32.totalorder %s4684_s21, 1 }
  0x8c   : > { %370 = sbr.rel (%p3947_p4) target bundleno = 150 (0x96), region = 60 }
  0x91   : > { %v3950_v21 = vld [vmem:[%s4975_s30 + $0x80] sm:$0xff]  ;;  %v3951_v22 = vld [vmem:[%s4975_s30 + $0x88] sm:$0xff]  ;;  %v3952_v23 = vld [vmem:[%s4975_s30 + $0x90] sm:$0xff] }
  0x92   : > { %378 = vst.msk [vmem:[#allocation2 + $0x148] sm:$0xff] %vm283_vm0, %v3950_v21  ;;  %v3953_v24 = vld [vmem:[%s4975_s30 + $0x98] sm:$0xff] }
  0x93   : > { %379 = vst.msk [vmem:[#allocation2 + $0x150] sm:$0xff] %vm283_vm0, %v3951_v22 }
  0x94   : > { %380 = vst.msk [vmem:[#allocation2 + $0x168] sm:$0xff] %vm283_vm0, %v3952_v23 }
  0x95   : > { %381 = vst.msk [vmem:[#allocation2 + $0x170] sm:$0xff] %vm283_vm0, %v3953_v24 }
  0x96 PF: > { %v430_v25 = vld [vmem:[#allocation7 + $0x38] sm:$0xff]  ;;  %v429_v27 = vld [vmem:[#allocation7 + $0x30] sm:$0xff]  ;;  %2049 = vst.msk [vmem:[#allocation3] sm:$0xff] %vm283_vm0, %v4709_v0  ;;  %v428_v29 = vld [vmem:[#allocation7 + $0x28] sm:$0xff]  ;;  %p4134_p11 = scmp.ne.s32.totalorder %s4684_s21, 0 }
  0x97   : > { %v405_v26 = vld [vmem:[#allocation7 + $0x18] sm:$0xff]  ;;  %503 = vmatpush.msra.mxu0 %v430_v25  ;;  %4289 = vmatpush.msra.mxu3 %v430_v25  ;;  %v404_v28 = vld [vmem:[#allocation7 + $0x10] sm:$0xff]  ;;  %2050 = vst.msk [vmem:[#allocation3 + $0x20] sm:$0xff] %vm283_vm0, %v4709_v0  ;;  %v403_v30 = vld [vmem:[#allocation7 + $0x8] sm:$0xff] }
  0x98   : > { %640 = vmatpush.msra.mxu1 %v405_v26  ;;  %2051 = vst.msk [vmem:[#allocation3 + $0x40] sm:$0xff] %vm283_vm0, %v4709_v0  ;;  %v729_v31 = vld [vmem:[#allocation7 + $0x58] sm:$0xff]  ;;  %v427_v32 = vld [vmem:[#allocation7 + $0x20] sm:$0xff]  ;;  %v406_v34 = vld [vmem:[#allocation2 + $0x8] sm:$0xff] }
  0x99   : > { %504 = vmatpush.msra.mxu0 %v429_v27  ;;  %4290 = vmatpush.msra.mxu3 %v429_v27  ;;  %2052 = vst.msk [vmem:[#allocation3 + $0x60] sm:$0xff] %vm283_vm0, %v4709_v0  ;;  %v402_v33 = vld [vmem:[#allocation7] sm:$0xff]  ;;  %v5100_v35 = vld [vmem:[#allocation2 + $0x128] sm:$0xff]  ;;  %v728_v37 = vld [vmem:[#allocation7 + $0x50] sm:$0xff] }
  0x9a   : > { %641 = vmatpush.msra.mxu1 %v404_v28  ;;  %4297 = vmatpush.msra.mxu2 %v729_v31  ;;  %2053 = vst.msk [vmem:[#allocation3 + $0x80] sm:$0xff] %vm283_vm0, %v4709_v0  ;;  %v382_v36 = vld [vmem:[#allocation2 + $0x7] sm:$0xff]  ;;  %v407_v40 = vld [vmem:[#allocation2 + $0x10] sm:$0xff]  ;;  %v912_v56 = vld [vmem:[#allocation7 + $0x78] sm:$0xff] }
  0x9b   : > { %505 = vmatpush.msra.mxu0 %v428_v29  ;;  %4291 = vmatpush.msra.mxu3 %v428_v29  ;;  %2054 = vst.msk [vmem:[#allocation3 + $0xa0] sm:$0xff] %vm283_vm0, %v4709_v0  ;;  %v727_v38 = vld [vmem:[#allocation7 + $0x48] sm:$0xff]  ;;  %v726_v39 = vld [vmem:[#allocation7 + $0x40] sm:$0xff]  ;;  %v5122_v41 = vld [vmem:[#allocation2 + $0x130] sm:$0xff] }
  0x9c   : > { %642 = vmatpush.msra.mxu1 %v403_v30  ;;  %2055 = vst.msk [vmem:[#allocation3 + $0xc0] sm:$0xff] %vm283_vm0, %v4709_v0  ;;  %4298 = vmatpush.msra.mxu2 %v728_v37  ;;  %v383_v42 = vld [vmem:[#allocation2 + $0xf] sm:$0xff]  ;;  %v5146_v45 = vld [vmem:[#allocation2 + $0x27] sm:$0xff]  ;;  %v1458_v5 = vld [vmem:[#allocation7 + $0xd8] sm:$0xff] }
  0x9d   : > { %506 = vmatpush.msra.mxu0 %v427_v32  ;;  %4292 = vmatpush.msra.mxu3 %v427_v32  ;;  %2056 = vst.msk [vmem:[#allocation3 + $0xe0] sm:$0xff] %vm283_vm0, %v4709_v0  ;;  %v5126_v43 = vld [vmem:[#allocation2 + $0x71] sm:$0xff]  ;;  %v5144_v44 = vld [vmem:[#allocation2 + $0x28] sm:$0xff]  ;;  %v909_v60 = vld [vmem:[#allocation7 + $0x60] sm:$0xff] }
  0x9e   : > { %643 = vmatpush.msra.mxu1 %v402_v33  ;;  %3954 = vmatmul.msk.f32.vlgmr.msra.gmra.mxu0 %vm283_vm0, %v406_v34  ;;  %2057 = vst.msk [vmem:[#allocation3 + $0x100] sm:$0xff] %vm283_vm0, %v4709_v0  ;;  %v5148_v46 = vld [vmem:[#allocation2 + $0xcf] sm:$0xff]  ;;  %v5164_v50 = vld [vmem:[#allocation2 + $0xe7] sm:$0xff] }
  0x9f   : > { %3972 = vmatmul.msk.f32.vlgmr.msra.gmra.mxu3 %vm283_vm0, %v5100_v35  ;;  %3974 = vmatmul.msk.f32.vlgmr.msra.gmra.mxu1 %vm283_vm0, %v382_v36  ;;  %2058 = vst.msk [vmem:[#allocation3 + $0x120] sm:$0xff] %vm283_vm0, %v4709_v0  ;;  %v5150_v47 = vld [vmem:[#allocation2 + $0x89] sm:$0xff]  ;;  %v5166_v51 = vld [vmem:[#allocation2 + $0x91] sm:$0xff]  ;;  %v1091_v3 = vld [vmem:[#allocation7 + $0x80] sm:$0xff] }
  0xa0   : > { %802 = vmatpush.msrb.mxu0 %v729_v31  ;;  %4293 = vmatpush.msrb.mxu3 %v405_v26  ;;  %2059 = vst.msk [vmem:[#allocation3 + $0x18] sm:$0xff] %vm283_vm0, %v4709_v0  ;;  %v5160_v48 = vld [vmem:[#allocation2 + $0x30] sm:$0xff]  ;;  %v5176_v52 = vld [vmem:[#allocation2 + $0x48] sm:$0xff] }
  0xa1   : > { %2060 = vst.msk [vmem:[#allocation3 + $0x38] sm:$0xff] %vm283_vm0, %v4709_v0  ;;  %4299 = vmatpush.msra.mxu2 %v727_v38  ;;  %v5162_v49 = vld [vmem:[#allocation2 + $0x2f] sm:$0xff]  ;;  %v5178_v53 = vld [vmem:[#allocation2 + $0x47] sm:$0xff] }
  0xa2   : > { %4294 = vmatpush.msrb.mxu3 %v404_v28  ;;  %803 = vmatpush.msrb.mxu0 %v728_v37  ;;  %2061 = vst.msk [vmem:[#allocation3 + $0x58] sm:$0xff] %vm283_vm0, %v4709_v0  ;;  %v5180_v54 = vld [vmem:[#allocation2 + $0xef] sm:$0xff]  ;;  %v5196_v62 = vld [vmem:[#allocation2 + $0x107] sm:$0xff] }
  0xa3   : > { %2062 = vst.msk [vmem:[#allocation3 + $0x78] sm:$0xff] %vm283_vm0, %v4709_v0  ;;  %4300 = vmatpush.msra.mxu2 %v726_v39  ;;  %v5182_v55 = vld [vmem:[#allocation2 + $0xa9] sm:$0xff]  ;;  %v5198_v63 = vld [vmem:[#allocation2 + $0xb1] sm:$0xff] }
  0xa4   : > { %4295 = vmatpush.msrb.mxu3 %v403_v30  ;;  %804 = vmatpush.msrb.mxu0 %v727_v38  ;;  %2063 = vst.msk [vmem:[#allocation3 + $0x98] sm:$0xff] %vm283_vm0, %v4709_v0  ;;  %v911_v57 = vld [vmem:[#allocation7 + $0x70] sm:$0xff]  ;;  %v910_v58 = vld [vmem:[#allocation7 + $0x68] sm:$0xff] }
  0xa5   : > { %2064 = vst.msk [vmem:[#allocation3 + $0xb8] sm:$0xff] %vm283_vm0, %v4709_v0  ;;  %4001 = vmatmul.msk.f32.vlgmr.msra.gmra.mxu2 %vm283_vm0, %v5126_v43  ;;  %v5192_v59 = vld [vmem:[#allocation2 + $0x50] sm:$0xff]  ;;  %v5210_v17 = vld [vmem:[#allocation2 + $0x67] sm:$0xff] }
  0xa6   : > { %3955 = vmatmul.msk.f32.gmra.mxu0 %vm283_vm0, %v407_v40  ;;  %4296 = vmatpush.msrb.mxu3 %v402_v33  ;;  %2065 = vst.msk [vmem:[#allocation3 + $0xd8] sm:$0xff] %vm283_vm0, %v4709_v0  ;;  %v5194_v61 = vld [vmem:[#allocation2 + $0x4f] sm:$0xff]  ;;  %v5228_v22 = vld [vmem:[#allocation2 + $0x127] sm:$0xff] }
  0xa7   : > { %3973 = vmatmul.msk.f32.gmra.mxu3 %vm283_vm0, %v5122_v41  ;;  %3975 = vmatmul.msk.f32.gmra.mxu1 %vm283_vm0, %v383_v42  ;;  %2066 = vst.msk [vmem:[#allocation3 + $0xf8] sm:$0xff] %vm283_vm0, %v4709_v0  ;;  %v5212_v18 = vld [vmem:[#allocation2 + $0x10f] sm:$0xff]  ;;  %v5242_v25 = vld [vmem:[#allocation2 + $0x87] sm:$0xff] }
  0xa8   : > { %805 = vmatpush.msrb.mxu0 %v726_v39  ;;  %2067 = vst.msk [vmem:[#allocation3 + $0x118] sm:$0xff] %vm283_vm0, %v4709_v0  ;;  %985 = vmatpush.msra.mxu3 %v912_v56  ;;  %v5214_v19 = vld [vmem:[#allocation2 + $0xc9] sm:$0xff]  ;;  %v5230_v23 = vld [vmem:[#allocation2 + $0xd1] sm:$0xff] }
  0xa9   : > { %2068 = vst.msk [vmem:[#allocation3 + $0x138] sm:$0xff] %vm283_vm0, %v4709_v0  ;;  %v5208_v0 = vld [vmem:[#allocation2 + $0x68] sm:$0xff]  ;;  %v5224_v20 = vld [vmem:[#allocation2 + $0x70] sm:$0xff]  ;;  %v1094_v56 = vld [vmem:[#allocation7 + $0x98] sm:$0xff]  ;;  %1531 = vmatpush.msrb.mxu2 %v1458_v5 }
  0xaa   : > { %986 = vmatpush.msra.mxu3 %v911_v57  ;;  %v5226_v21 = vld [vmem:[#allocation2 + $0x6f] sm:$0xff]  ;;  %v5272_v32 = vld [vmem:[#allocation2 + $0xa7] sm:$0xff]  ;;  %1167 = vmatpush.msra.mxu0 %v1094_v56 }
  0xab   : > { %v5240_v24 = vld [vmem:[#allocation2 + $0x88] sm:$0xff]  ;;  %v5256_v28 = vld [vmem:[#allocation2 + $0x90] sm:$0xff]  ;;  %v1455_v5 = vld [vmem:[#allocation7 + $0xc0] sm:$0xff] }
  0xac   : > { %987 = vmatpush.msra.mxu3 %v910_v58  ;;  %v5244_v26 = vld [vmem:[#allocation2 + $0x12f] sm:$0xff]  ;;  %v5300_v39 = vld [vmem:[#allocation2 + $0xc7] sm:$0xff] }
  0xad   : > { %4002 = vmatmul.msk.f32.gmra.mxu2 %vm283_vm0, %v5150_v47  ;;  %v5246_v27 = vld [vmem:[#allocation2 + $0xe9] sm:$0xff]  ;;  %v5260_v30 = vld [vmem:[#allocation2 + $0xf1] sm:$0xff] }
  0xae   : > { %3956 = vmatmul.msk.f32.gmra.mxu0 %vm283_vm0, %v5144_v44  ;;  %988 = vmatpush.msra.mxu3 %v909_v60  ;;  %v5258_v29 = vld [vmem:[#allocation2 + $0x8f] sm:$0xff] }
  0xaf   : > { %3976 = vmatmul.msk.f32.gmra.mxu1 %vm283_vm0, %v5146_v45  ;;  %3987 = vmatmul.msk.f32.vlgmr.msrb.gmra.mxu3 %vm283_vm0, %v5148_v46  ;;  %v5270_v31 = vld [vmem:[#allocation2 + $0xa8] sm:$0xff]  ;;  %v5284_v34 = vld [vmem:[#allocation2 + $0xb0] sm:$0xff] }
  0xb0   : > { %v5274_v33 = vld [vmem:[#allocation2 + $0x109] sm:$0xff]  ;;  %v5288_v37 = vld [vmem:[#allocation2 + $0x111] sm:$0xff] }
  0xb1   : > { %v5286_v36 = vld [vmem:[#allocation2 + $0xaf] sm:$0xff] }
  0xb2   : > { %v5298_v38 = vld [vmem:[#allocation2 + $0xc8] sm:$0xff]  ;;  %v5312_v42 = vld [vmem:[#allocation2 + $0xd0] sm:$0xff] }
  0xb3   : > { %v5302_v40 = vld [vmem:[#allocation2 + $0x129] sm:$0xff]  ;;  %v706_v4 = vld [vmem:[#allocation2 + $0x11] sm:$0xff] }
  0xb4   : > { %v5328_v57 = vld [vmem:[#allocation2 + $0xf0] sm:$0xff]  ;;  %v5336_v60 = vld [vmem:[#allocation2 + $0x108] sm:$0xff] }
  0xb5   : > { %4003 = vmatmul.msk.f32.gmra.mxu2 %vm283_vm0, %v5166_v51  ;;  %v1093_v16 = vld [vmem:[#allocation7 + $0x90] sm:$0xff]  ;;  %v1092_v14 = vld [vmem:[#allocation7 + $0x88] sm:$0xff] }
  0xb6   : > { %3957 = vmatmul.msk.f32.gmra.mxu0 %vm283_vm0, %v5160_v48  ;;  %v5346_v12 = vld [vmem:[#allocation2 + $0x110] sm:$0xff] }
  0xb7   : > { %3977 = vmatmul.msk.f32.gmra.mxu1 %vm283_vm0, %v5162_v49  ;;  %3988 = vmatmul.msk.f32.gmra.mxu3 %vm283_vm0, %v5164_v50  ;;  %v705_v13 = vld [vmem:[#allocation2 + $0x9] sm:$0xff] }
  0xb8   : > { %1168 = vmatpush.msra.mxu0 %v1093_v16  ;;  %v707_v6 = vld [vmem:[#allocation2 + $0x29] sm:$0xff] }
  0xb9   : > { %v1457_v1 = vld [vmem:[#allocation7 + $0xd0] sm:$0xff] }
  0xba   : > { %1169 = vmatpush.msra.mxu0 %v1092_v14  ;;  %1532 = vmatpush.msrb.mxu2 %v1457_v1  ;;  %v1822_v1 = vld [vmem:[#allocation7 + $0x118] sm:$0xff] }
  0xbc   : > { %1170 = vmatpush.msra.mxu0 %v1091_v3  ;;  %v1456_v3 = vld [vmem:[#allocation7 + $0xc8] sm:$0xff] }
  0xbd   : > { %4004 = vmatmul.msk.f32.gmra.mxu2 %vm283_vm0, %v5182_v55 }
  0xbe   : > { %3958 = vmatmul.msk.f32.gmra.mxu0 %vm283_vm0, %v5176_v52  ;;  %1533 = vmatpush.msrb.mxu2 %v1456_v3 }
  0xbf   : > { %3978 = vmatmul.msk.f32.gmra.mxu1 %vm283_vm0, %v5178_v53  ;;  %3989 = vmatmul.msk.f32.gmra.mxu3 %vm283_vm0, %v5180_v54 }
  0xc0   : > { %1534 = vmatpush.msrb.mxu2 %v1455_v5  ;;  %v5395_v5 = vld [vmem:[#allocation2 + $0x49] sm:$0xff] }
  0xc5   : > { %4005 = vmatmul.msk.f32.gmra.mxu2 %vm283_vm0, %v5198_v63 }
  0xc6   : > { %3959 = vmatmul.msk.f32.gmra.mxu0 %vm283_vm0, %v5192_v59 }
  0xc7   : > { %3979 = vmatmul.msk.f32.gmra.mxu1 %vm283_vm0, %v5194_v61  ;;  %3990 = vmatmul.msk.f32.gmra.mxu3 %vm283_vm0, %v5196_v62 }
  0xcd   : > { %4006 = vmatmul.msk.f32.gmra.mxu2 %vm283_vm0, %v5214_v19 }
  0xce   : > { %3960 = vmatmul.msk.f32.gmra.mxu0 %vm283_vm0, %v5208_v0 }
  0xcf   : > { %3980 = vmatmul.msk.f32.gmra.mxu1 %vm283_vm0, %v5210_v17  ;;  %3991 = vmatmul.msk.f32.gmra.mxu3 %vm283_vm0, %v5212_v18 }
  0xd5   : > { %4007 = vmatmul.msk.f32.gmra.mxu2 %vm283_vm0, %v5230_v23 }
  0xd6   : > { %3961 = vmatmul.msk.f32.gmra.mxu0 %vm283_vm0, %v5224_v20 }
  0xd7   : > { %3981 = vmatmul.msk.f32.gmra.mxu1 %vm283_vm0, %v5226_v21  ;;  %3992 = vmatmul.msk.f32.gmra.mxu3 %vm283_vm0, %v5228_v22 }
  0xdd   : > { %4008 = vmatmul.msk.f32.gmra.mxu2 %vm283_vm0, %v5246_v27 }
  0xde   : > { %3962 = vmatmul.msk.f32.gmra.mxu0 %vm283_vm0, %v5240_v24 }
  0xdf   : > { %3982 = vmatmul.msk.f32.gmra.mxu1 %vm283_vm0, %v5242_v25  ;;  %3993 = vmatmul.msk.f32.gmra.mxu3 %vm283_vm0, %v5244_v26 }
  0xe5   : > { %4009 = vmatmul.msk.f32.gmra.mxu2 %vm283_vm0, %v5260_v30 }
  0xe6   : > { %3963 = vmatmul.msk.f32.gmra.mxu0 %vm283_vm0, %v5256_v28 }
  0xe7   : > { %3983 = vmatmul.msk.f32.gmra.mxu1 %vm283_vm0, %v5258_v29  ;;  %4014 = vmatmul.msk.f32.vlgmr.msra.gmra.mxu3 %vm283_vm0, %v5146_v45  ;;  %v5314_v45 = vld [vmem:[#allocation2 + $0x131] sm:$0xff] }
  0xed   : > { %4010 = vmatmul.msk.f32.gmra.mxu2 %vm283_vm0, %v5274_v33 }
  0xee   : > { %3964 = vmatmul.msk.f32.gmra.mxu0 %vm283_vm0, %v5270_v31 }
  0xef   : > { %3984 = vmatmul.msk.f32.gmra.mxu1 %vm283_vm0, %v5272_v32  ;;  %4015 = vmatmul.msk.f32.gmra.mxu3 %vm283_vm0, %v5162_v49  ;;  %v5322_v49 = vld [vmem:[#allocation2 + $0xe8] sm:$0xff] }
  0xf5   : > { %4011 = vmatmul.msk.f32.gmra.mxu2 %vm283_vm0, %v5288_v37 }
  0xf6   : > { %3965 = vmatmul.msk.f32.gmra.mxu0 %vm283_vm0, %v5284_v34 }
  0xf7   : > { %3985 = vmatmul.msk.f32.gmra.mxu1 %vm283_vm0, %v5286_v36  ;;  %4016 = vmatmul.msk.f32.gmra.mxu3 %vm283_vm0, %v5178_v53 }
  0xfd   : > { %4012 = vmatmul.msk.f32.gmra.mxu2 %vm283_vm0, %v5302_v40 }
  0xfe   : > { %3966 = vmatmul.msk.f32.gmra.mxu0 %vm283_vm0, %v5298_v38 }
  0xff   : > { %3986 = vmatmul.msk.f32.gmra.mxu1 %vm283_vm0, %v5300_v39  ;;  %4017 = vmatmul.msk.f32.gmra.mxu3 %vm283_vm0, %v5194_v61 }
 0x105   : > { %4013 = vmatmul.msk.f32.gmra.mxu2 %vm283_vm0, %v5314_v45 }
 0x106   : > { %3967 = vmatmul.msk.f32.gmra.mxu0 %vm283_vm0, %v5312_v42 }
 0x107   : > { %4018 = vmatmul.msk.f32.gmra.mxu3 %vm283_vm0, %v5210_v17 }
 0x10d   : > { %4074 = vmatmul.msk.f32.vlgmr.msrb.gmra.mxu2 %vm283_vm0, %v5178_v53 }
 0x10e   : > { %3968 = vmatmul.msk.f32.gmra.mxu0 %vm283_vm0, %v5322_v49 }
 0x10f   : > { %4019 = vmatmul.msk.f32.gmra.mxu3 %vm283_vm0, %v5226_v21 }
 0x115   : > { %4075 = vmatmul.msk.f32.gmra.mxu2 %vm283_vm0, %v5194_v61 }
 0x116   : > { %3969 = vmatmul.msk.f32.gmra.mxu0 %vm283_vm0, %v5328_v57 }
 0x117   : > { %4020 = vmatmul.msk.f32.gmra.mxu3 %vm283_vm0, %v5242_v25 }
 0x11b   : > { %v5334_v58 = vpop.f32.mrf.mxu0 }
 0x11d   : > { %4076 = vmatmul.msk.f32.gmra.mxu2 %vm283_vm0, %v5210_v17 }
 0x11e   : > { %3970 = vmatmul.msk.f32.gmra.mxu0 %vm283_vm0, %v5336_v60 }
 0x11f   : > { %4021 = vmatmul.msk.f32.gmra.mxu3 %vm283_vm0, %v5258_v29 }
 0x122   : > { %v5342_v56 = vpop.f32.mrf.mxu3 }
 0x123   : > { %v5344_v15 = vpop.f32.mrf.mxu0 }
 0x125   : > { %4077 = vmatmul.msk.f32.gmra.mxu2 %vm283_vm0, %v5226_v21  ;;  %v1638_v21 = vld [vmem:[#allocation7 + $0xe8] sm:$0xff] }
 0x126   : > { %3971 = vmatmul.msk.f32.gmra.mxu0 %vm283_vm0, %v5346_v12 }
 0x127   : > { %4022 = vmatmul.msk.f32.gmra.mxu3 %vm283_vm0, %v5272_v32 }
 0x128   : > { %v5356_v9 = vpop.f32.mrf.mxu2 }
 0x129   : > { %6733 = vst [vmem:[#allocation40_spill] sm:$0xff] %v5356_v9  ;;  %v708_v9 = vld [vmem:[#allocation2 + $0x31] sm:$0xff] }
 0x12a   : > { %v5352_v11 = vpop.f32.mrf.mxu3 }
 0x12b   : > { %v5354_v10 = vpop.f32.mrf.mxu0 }
 0x12c   : > { %6732 = vst [vmem:[#allocation39_spill] sm:$0xff] %v5354_v10 }
 0x12d   : > { %4078 = vmatmul.msk.f32.gmra.mxu2 %vm283_vm0, %v5242_v25 }
 0x12e   : > { %3994 = vmatmul.msk.f32.vlgmr.msrb.gmra.mxu0 %vm283_vm0, %v705_v13 }
 0x12f   : > { %4023 = vmatmul.msk.f32.gmra.mxu3 %vm283_vm0, %v5286_v36  ;;  %1895 = vmatpush.msrb.mxu0 %v1822_v1  ;;  %v5412_v1 = vld [vmem:[#allocation2 + $0x51] sm:$0xff] }
 0x130   : > { %v5365_v7 = vpop.f32.mrf.mxu2 }
 0x131   : > { %6736 = vst [vmem:[#allocation43_spill] sm:$0xff] %v5365_v7 }
 0x132   : > { %v5361_v16 = vpop.f32.mrf.mxu3 }
 0x133   : > { %6734 = vst [vmem:[#allocation41_spill] sm:$0xff] %v5361_v16  ;;  %v5363_v8 = vpop.f32.mrf.mxu0  ;;  %v1276_v16 = vld [vmem:[#allocation7 + $0xb8] sm:$0xff] }
 0x134   : > { %6735 = vst [vmem:[#allocation42_spill] sm:$0xff] %v5363_v8  ;;  %1349 = vmatpush.msrb.mxu1 %v1276_v16  ;;  %v1275_v8 = vld [vmem:[#allocation7 + $0xb0] sm:$0xff]  ;;  %v1273_v16 = vld [vmem:[#allocation7 + $0xa0] sm:$0xff] }
 0x135   : > { %4079 = vmatmul.msk.f32.gmra.mxu2 %vm283_vm0, %v5258_v29  ;;  %v5480_v29 = vld [vmem:[#allocation2 + $0x147] sm:$0xff] }
 0x136   : > { %3995 = vmatmul.msk.f32.gmra.mxu0 %vm283_vm0, %v706_v4  ;;  %v1640_v4 = vld [vmem:[#allocation7 + $0xf8] sm:$0xff]  ;;  %1350 = vmatpush.msrb.mxu1 %v1275_v8 }
 0x137   : > { %4024 = vmatmul.msk.f32.gmra.mxu3 %vm283_vm0, %v5300_v39 }
 0x138   : > { %v5374_v2 = vpop.f32.mrf.mxu2  ;;  %1713 = vmatpush.msrb.mxu3 %v1640_v4  ;;  %v1274_v4 = vld [vmem:[#allocation7 + $0xa8] sm:$0xff] }
 0x139   : > { %1351 = vmatpush.msrb.mxu1 %v1274_v4 }
 0x13a   : > { %v5370_v14 = vpop.f32.mrf.mxu3 }
 0x13b   : > { %6737 = vst [vmem:[#allocation44_spill] sm:$0xff] %v5370_v14  ;;  %v5372_v13 = vpop.f32.mrf.mxu0  ;;  %1352 = vmatpush.msrb.mxu1 %v1273_v16 }
 0x13c   : > { %6738 = vst [vmem:[#allocation45_spill] sm:$0xff] %v5372_v13  ;;  %4054 = vmatmul.msk.f32.vlgmr.msrb.gmra.mxu1 %vm283_vm0, %v707_v6 }
 0x13d   : > { %4080 = vmatmul.msk.f32.gmra.mxu2 %vm283_vm0, %v5272_v32 }
 0x13e   : > { %3996 = vmatmul.msk.f32.gmra.mxu0 %vm283_vm0, %v707_v6 }
 0x13f   : > { %4025 = vmatmul.msk.f32.gmra.mxu3 %vm283_vm0, %v5148_v46 }
 0x140   : > { %v5383_v13 = vpop.f32.mrf.mxu2 }
 0x142   : > { %v5379_v7 = vpop.f32.mrf.mxu3 }
 0x143   : > { %6739 = vst [vmem:[#allocation46_spill] sm:$0xff] %v5379_v7  ;;  %v5381_v14 = vpop.f32.mrf.mxu0  ;;  %v5399_v7 = vpop.f32.mrf.mxu1 }
 0x144   : > { %6740 = vst [vmem:[#allocation47_spill] sm:$0xff] %v5381_v14  ;;  %4055 = vmatmul.msk.f32.gmra.mxu1 %vm283_vm0, %v708_v9 }
 0x145   : > { %4081 = vmatmul.msk.f32.gmra.mxu2 %vm283_vm0, %v5286_v36 }
 0x146   : > { %3997 = vmatmul.msk.f32.gmra.mxu0 %vm283_vm0, %v708_v9 }
 0x147   : > { %4026 = vmatmul.msk.f32.gmra.mxu3 %vm283_vm0, %v5164_v50 }
 0x148   : > { %v5397_v53 = vpop.f32.mrf.mxu2 }
 0x14a   : > { %v5391_v3 = vpop.f32.mrf.mxu3 }
 0x14b   : > { %v5393_v8 = vpop.f32.mrf.mxu0  ;;  %v5418_v61 = vpop.f32.mrf.mxu1 }
 0x14c   : > { %6741 = vst [vmem:[#allocation48_spill] sm:$0xff] %v5393_v8  ;;  %4056 = vmatmul.msk.f32.gmra.mxu1 %vm283_vm0, %v5395_v5 }
 0x14d   : > { %6744 = vst [vmem:[#allocation51_spill] sm:$0xff] %v5418_v61  ;;  %v1637_v61 = vld [vmem:[#allocation7 + $0xe0] sm:$0xff]  ;;  %4082 = vmatmul.msk.f32.gmra.mxu2 %vm283_vm0, %v5300_v39 }
 0x14e   : > { %3998 = vmatmul.msk.f32.gmra.mxu0 %vm283_vm0, %v5395_v5 }
 0x14f   : > { %4027 = vmatmul.msk.f32.gmra.mxu3 %vm283_vm0, %v5180_v54 }
 0x150   : > { %v5414_v16 = vpop.f32.mrf.mxu2 }
 0x151   : > { %6743 = vst [vmem:[#allocation50_spill] sm:$0xff] %v5414_v16  ;;  %v5429_v16 = vld [vmem:[#allocation2 + $0x69] sm:$0xff] }
 0x152   : > { %v5408_v6 = vpop.f32.mrf.mxu3 }
 0x153   : > { %v5410_v4 = vpop.f32.mrf.mxu0  ;;  %v5439_v17 = vpop.f32.mrf.mxu1 }
 0x154   : > { %6742 = vst [vmem:[#allocation49_spill] sm:$0xff] %v5410_v4  ;;  %4057 = vmatmul.msk.f32.gmra.mxu1 %vm283_vm0, %v5412_v1 }
 0x155   : > { %4083 = vmatmul.msk.f32.gmra.mxu2 %vm283_vm0, %v5148_v46  ;;  %v1820_v46 = vld [vmem:[#allocation7 + $0x108] sm:$0xff] }
 0x156   : > { %3999 = vmatmul.msk.f32.gmra.mxu0 %vm283_vm0, %v5412_v1 }
 0x157   : > { %4028 = vmatmul.msk.f32.gmra.mxu3 %vm283_vm0, %v5196_v62 }
 0x158   : > { %v5431_v14 = vpop.f32.mrf.mxu2 }
 0x159   : > { %6746 = vst [vmem:[#allocation53_spill] sm:$0xff] %v5431_v14 }
 0x15a   : > { %v699_v9 = vpop.f32.mrf.mxu3 }
 0x15b   : > { %v700_v4 = vadd.f32 %v699_v9, %v5342_v56  ;;  %v5427_v8 = vpop.f32.mrf.mxu0  ;;  %v1639_v56 = vld [vmem:[#allocation7 + $0xf0] sm:$0xff] }
 0x15c   : > { %6745 = vst [vmem:[#allocation52_spill] sm:$0xff] %v5427_v8  ;;  %1714 = vmatpush.msrb.mxu3 %v1639_v56  ;;  %4058 = vmatmul.msk.f32.gmra.mxu1 %vm283_vm0, %v5429_v16 }
 0x15d   : > { %4084 = vmatmul.msk.f32.gmra.mxu2 %vm283_vm0, %v5164_v50 }
 0x15e   : > { %4000 = vmatmul.msk.f32.gmra.mxu0 %vm283_vm0, %v5429_v16  ;;  %1715 = vmatpush.msrb.mxu3 %v1638_v21 }
 0x15f   : > { %4029 = vmatmul.msk.f32.gmra.mxu3 %vm283_vm0, %v5212_v18 }
 0x160   : > { %v5446_v10 = vpop.f32.mrf.mxu2  ;;  %1716 = vmatpush.msrb.mxu3 %v1637_v61 }
 0x161   : > { %6747 = vst [vmem:[#allocation54_spill] sm:$0xff] %v5446_v10 }
 0x162   : > { %v702_v9 = vpop.f32.mrf.mxu3 }
 0x163   : > { %v703_v8 = vadd.f32 %v702_v9, %v5352_v11  ;;  %v5444_v14 = vpop.f32.mrf.mxu0  ;;  %v5456_v11 = vpop.f32.mrf.mxu1 }
 0x164   : > { %6748 = vst [vmem:[#allocation55_spill] sm:$0xff] %v5456_v11  ;;  %4059 = vmatmul.msk.f32.gmra.mxu1 %vm283_vm0, %v5126_v43 }
 0x165   : > { %4085 = vmatmul.msk.f32.gmra.mxu2 %vm283_vm0, %v5180_v54 }
 0x166   : > { %4034 = vmatmul.msk.f32.vlgmr.msra.gmra.mxu0 %vm283_vm0, %v5144_v44  ;;  %v1821_v44 = vld [vmem:[#allocation7 + $0x110] sm:$0xff] }
 0x167   : > { %4030 = vmatmul.msk.f32.gmra.mxu3 %vm283_vm0, %v5228_v22  ;;  %1896 = vmatpush.msrb.mxu0 %v1821_v44 }
 0x168   : > { %v5462_v21 = vpop.f32.mrf.mxu2 }
 0x169   : > { %6749 = vst [vmem:[#allocation56_spill] sm:$0xff] %v5462_v21  ;;  %1897 = vmatpush.msrb.mxu0 %v1820_v46 }
 0x16a   : > { %v5458_v56 = vpop.f32.mrf.mxu3 }
 0x16b   : > { %v5460_v9 = vpop.f32.mrf.mxu0  ;;  %v5478_v21 = vpop.f32.mrf.mxu1 }
 0x16c   : > { %6750 = vst [vmem:[#allocation57_spill] sm:$0xff] %v5478_v21  ;;  %4060 = vmatmul.msk.f32.gmra.mxu1 %vm283_vm0, %v5150_v47  ;;  %v5496_v21 = vld [vmem:[#allocation2 + $0x14f] sm:$0xff] }
 0x16d   : > { %4086 = vmatmul.msk.f32.gmra.mxu2 %vm283_vm0, %v5196_v62 }
 0x16e   : > { %4035 = vmatmul.msk.f32.gmra.mxu0 %vm283_vm0, %v5160_v48 }
 0x16f   : > { %4031 = vmatmul.msk.f32.gmra.mxu3 %vm283_vm0, %v5244_v26 }
 0x170   : > { %v5476_v10 = vpop.f32.mrf.mxu2 }
 0x172   : > { %v5472_v25 = vpop.f32.mrf.mxu3 }
 0x173   : > { %v5474_v61 = vpop.f32.mrf.mxu0  ;;  %v5500_v32 = vpop.f32.mrf.mxu1 }
 0x174   : > { %4061 = vmatmul.msk.f32.gmra.mxu1 %vm283_vm0, %v5166_v51 }
 0x175   : > { %4087 = vmatmul.msk.f32.gmra.mxu2 %vm283_vm0, %v5212_v18 }
 0x176   : > { %4036 = vmatmul.msk.f32.gmra.mxu0 %vm283_vm0, %v5176_v52 }
 0x177   : > { %4032 = vmatmul.msk.f32.gmra.mxu3 %vm283_vm0, %v5480_v29 }
 0x178   : > { %v5494_v44 = vpop.f32.mrf.mxu2 }
 0x17a   : > { %v5490_v43 = vpop.f32.mrf.mxu3 }
 0x17b   : > { %6751 = vst [vmem:[#allocation58_spill] sm:$0xff] %v5490_v43  ;;  %v5492_v48 = vpop.f32.mrf.mxu0  ;;  %v5520_v36 = vpop.f32.mrf.mxu1 }
 0x17c   : > { %6752 = vst [vmem:[#allocation59_spill] sm:$0xff] %v5492_v48  ;;  %4062 = vmatmul.msk.f32.gmra.mxu1 %vm283_vm0, %v5182_v55 }
 0x17d   : > { %4088 = vmatmul.msk.f32.gmra.mxu2 %vm283_vm0, %v5228_v22  ;;  %v1819_v22 = vld [vmem:[#allocation7 + $0x100] sm:$0xff] }
 0x17e   : > { %4037 = vmatmul.msk.f32.gmra.mxu0 %vm283_vm0, %v5192_v59 }
 0x17f   : > { %4033 = vmatmul.msk.f32.gmra.mxu3 %vm283_vm0, %v5496_v21  ;;  %1898 = vmatpush.msrb.mxu0 %v1819_v22 }
 0x180   : > { %v861_v11 = vpop.f32.mrf.mxu2 }
 0x181   : > { %v5512_v43 = vadd.f32 %v861_v11, %v700_v4 }
 0x182   : > { %v5508_v47 = vpop.f32.mrf.mxu3 }
 0x183   : > { %v5510_v48 = vpop.f32.mrf.mxu0 }
 0x184   : > { %6753 = vst [vmem:[#allocation60_spill] sm:$0xff] %v5510_v48  ;;  %4063 = vmatmul.msk.f32.gmra.mxu1 %vm283_vm0, %v5198_v63 }
 0x185   : > { %4089 = vmatmul.msk.f32.gmra.mxu2 %vm283_vm0, %v5244_v26 }
 0x186   : > { %4038 = vmatmul.msk.f32.gmra.mxu0 %vm283_vm0, %v5208_v0 }
 0x187   : > { %4094 = vmatmul.msk.f32.vlgmr.msrb.gmra.mxu3 %vm283_vm0, %v5176_v52  ;;  %v5538_v52 = vpop.f32.mrf.mxu1 }
 0x188   : > { %v864_v4 = vpop.f32.mrf.mxu2 }
 0x189   : > { %v5528_v11 = vadd.f32 %v864_v4, %v703_v8 }
 0x18a   : > { %v5524_v51 = vpop.f32.mrf.mxu3 }
 0x18b   : > { %v5526_v48 = vpop.f32.mrf.mxu0 }
 0x18c   : > { %6754 = vst [vmem:[#allocation61_spill] sm:$0xff] %v5526_v48  ;;  %4064 = vmatmul.msk.f32.gmra.mxu1 %vm283_vm0, %v5214_v19 }
 0x18d   : > { %4090 = vmatmul.msk.f32.gmra.mxu2 %vm283_vm0, %v5480_v29  ;;  %v5666_v29 = vld [vmem:[#allocation2 + $0x151] sm:$0xff] }
 0x18e   : > { %4039 = vmatmul.msk.f32.gmra.mxu0 %vm283_vm0, %v5224_v20 }
 0x18f   : > { %4095 = vmatmul.msk.f32.gmra.mxu3 %vm283_vm0, %v5192_v59  ;;  %v5556_v8 = vpop.f32.mrf.mxu1 }
 0x192   : > { %v5540_v55 = vpop.f32.mrf.mxu3 }
 0x193   : > { %v5542_v39 = vpop.f32.mrf.mxu0 }
 0x194   : > { %6755 = vst [vmem:[#allocation62_spill] sm:$0xff] %v5542_v39  ;;  %4065 = vmatmul.msk.f32.gmra.mxu1 %vm283_vm0, %v5230_v23  ;;  %v1810_v39 = vld [vmem:[#allocation2 + $0x109] sm:$0xff] }
 0x195   : > { %4091 = vmatmul.msk.f32.gmra.mxu2 %vm283_vm0, %v5496_v21  ;;  %v1453_v21 = vld [vmem:[#allocation2 + $0x16f] sm:$0xff] }
 0x196   : > { %4040 = vmatmul.msk.f32.gmra.mxu0 %vm283_vm0, %v5240_v24 }
 0x197   : > { %4096 = vmatmul.msk.f32.gmra.mxu3 %vm283_vm0, %v5208_v0  ;;  %v672_v19 = vpop.f32.mrf.mxu1 }
 0x198   : > { %v673_v23 = vadd.f32 %v672_v19, %v5444_v14 }
 0x19a   : > { %v5552_v59 = vpop.f32.mrf.mxu3 }
 0x19b   : > { %v5554_v63 = vpop.f32.mrf.mxu0 }
 0x19c   : > { %4066 = vmatmul.msk.f32.gmra.mxu1 %vm283_vm0, %v5246_v27 }
 0x19e   : > { %4041 = vmatmul.msk.f32.gmra.mxu0 %vm283_vm0, %v5256_v28 }
 0x19f   : > { %4097 = vmatmul.msk.f32.gmra.mxu3 %vm283_vm0, %v5224_v20  ;;  %v675_v62 = vpop.f32.mrf.mxu1 }
 0x1a0   : > { %v676_v14 = vadd.f32 %v675_v62, %v5460_v9  ;;  %v694_v62 = vadd.f32 %v5391_v3, %v5554_v63 }
 0x1a2   : > { %v5566_v50 = vpop.f32.mrf.mxu3 }
 0x1a3   : > { %v5568_v0 = vpop.f32.mrf.mxu0 }
 0x1a4   : > { %4067 = vmatmul.msk.f32.gmra.mxu1 %vm283_vm0, %v5260_v30 }
 0x1a6   : > { %4042 = vmatmul.msk.f32.gmra.mxu0 %vm283_vm0, %v5270_v31 }
 0x1a7   : > { %4098 = vmatmul.msk.f32.gmra.mxu3 %vm283_vm0, %v5240_v24  ;;  %v876_v24 = vadd.f32 %v5374_v2, %v673_v23  ;;  %v877_v2 = vadd.f32 %v5383_v13, %v676_v14  ;;  %v678_v18 = vpop.f32.mrf.mxu1 }
 0x1a8   : > { %v679_v9 = vadd.f32 %v678_v18, %v5474_v61  ;;  %v1088_v18 = vld [vmem:[#allocation2 + $0x148] sm:$0xff] }
 0x1aa   : > { %v5578_v54 = vpop.f32.mrf.mxu3 }
 0x1ab   : > { %v5580_v20 = vpop.f32.mrf.mxu0 }
 0x1ac   : > { %4068 = vmatmul.msk.f32.gmra.mxu1 %vm283_vm0, %v5274_v33 }
 0x1ae   : > { %4043 = vmatmul.msk.f32.gmra.mxu0 %vm283_vm0, %v5284_v34 }
 0x1af   : > { %4099 = vmatmul.msk.f32.gmra.mxu3 %vm283_vm0, %v5256_v28 }
 0x1b2   : > { %v1017_v27 = vpop.f32.mrf.mxu3 }
 0x1b3   : > { %v5592_v4 = vadd.f32 %v1017_v27, %v876_v24  ;;  %v5594_v46 = vpop.f32.mrf.mxu0 }
 0x1b4   : > { %4069 = vmatmul.msk.f32.gmra.mxu1 %vm283_vm0, %v5288_v37 }
 0x1b6   : > { %4044 = vmatmul.msk.f32.gmra.mxu0 %vm283_vm0, %v5298_v38 }
 0x1b7   : > { %4100 = vmatmul.msk.f32.gmra.mxu3 %vm283_vm0, %v5270_v31  ;;  %v878_v31 = vadd.f32 %v5397_v53, %v679_v9  ;;  %v5653_v53 = vld [vmem:[#allocation2 + $0x149] sm:$0xff] }
 0x1ba   : > { %v1020_v28 = vpop.f32.mrf.mxu3 }
 0x1bb   : > { %v5606_v30 = vadd.f32 %v1020_v28, %v877_v2  ;;  %v5608_v19 = vpop.f32.mrf.mxu0  ;;  %v697_v2 = vadd.f32 %v5408_v6, %v5568_v0  ;;  %v1631_v28 = vld [vmem:[#allocation2 + $0x130] sm:$0xff] }
 0x1bc   : > { %4070 = vmatmul.msk.f32.gmra.mxu1 %vm283_vm0, %v5302_v40  ;;  %v1452_v40 = vld [vmem:[#allocation2 + $0x167] sm:$0xff] }
 0x1bd   : > { %4092 = vmatmul.msk.f32.gmra.mxu2 %vm283_vm0, %v1452_v40  ;;  %v884_v3 = vadd.f32 %v5494_v44, %v697_v2  ;;  %v1805_v2 = vld [vmem:[#allocation2 + $0xb1] sm:$0xff] }
 0x1be   : > { %4045 = vmatmul.msk.f32.gmra.mxu0 %vm283_vm0, %v5312_v42 }
 0x1bf   : > { %4101 = vmatmul.msk.f32.gmra.mxu3 %vm283_vm0, %v5284_v34 }
 0x1c2   : > { %v1023_v33 = vpop.f32.mrf.mxu3 }
 0x1c3   : > { %v5620_v13 = vadd.f32 %v1023_v33, %v878_v31  ;;  %v5622_v61 = vpop.f32.mrf.mxu0  ;;  %v1634_v31 = vld [vmem:[#allocation2 + $0x168] sm:$0xff]  ;;  %v1635_v33 = vld [vmem:[#allocation2 + $0x170] sm:$0xff] }
 0x1c4   : > { %4071 = vmatmul.msk.f32.gmra.mxu1 %vm283_vm0, %v5314_v45 }
 0x1c5   : > { %4093 = vmatmul.msk.f32.gmra.mxu2 %vm283_vm0, %v1453_v21 }
 0x1c6   : > { %4046 = vmatmul.msk.f32.gmra.mxu0 %vm283_vm0, %v5322_v49 }
 0x1c7   : > { %4102 = vmatmul.msk.f32.gmra.mxu3 %vm283_vm0, %v5298_v38 }
 0x1ca   : > { %v5632_v26 = vpop.f32.mrf.mxu3 }
 0x1cb   : > { %6756 = vst [vmem:[#allocation63_spill] sm:$0xff] %v5632_v26  ;;  %v5634_v34 = vpop.f32.mrf.mxu0 }
 0x1cc   : > { %4072 = vmatmul.msk.f32.gmra.mxu1 %vm283_vm0, %v5653_v53 }
 0x1ce   : > { %4047 = vmatmul.msk.f32.gmra.mxu0 %vm283_vm0, %v5328_v57 }
 0x1cf   : > { %4103 = vmatmul.msk.f32.gmra.mxu3 %vm283_vm0, %v5312_v42 }
 0x1d2   : > { %v5644_v37 = vpop.f32.mrf.mxu3 }
 0x1d3   : > { %6757 = vst [vmem:[#allocation64_spill] sm:$0xff] %v5644_v37  ;;  %v5646_v38 = vpop.f32.mrf.mxu0 }
 0x1d4   : > { %4073 = vmatmul.msk.f32.gmra.mxu1 %vm283_vm0, %v5666_v29 }
 0x1d6   : > { %4048 = vmatmul.msk.f32.gmra.mxu0 %vm283_vm0, %v5336_v60 }
 0x1d7   : > { %4104 = vmatmul.msk.f32.gmra.mxu3 %vm283_vm0, %v5322_v49 }
 0x1da   : > { %v5657_v42 = vpop.f32.mrf.mxu3 }
 0x1db   : > { %6758 = vst [vmem:[#allocation65_spill] sm:$0xff] %v5657_v42  ;;  %v5659_v45 = vpop.f32.mrf.mxu0 }
 0x1de   : > { %4049 = vmatmul.msk.f32.gmra.mxu0 %vm283_vm0, %v5346_v12 }
 0x1df   : > { %4105 = vmatmul.msk.f32.gmra.mxu3 %vm283_vm0, %v5328_v57  ;;  %v883_v57 = vadd.f32 %v5476_v10, %v694_v62  ;;  %v1803_v62 = vld [vmem:[#allocation2 + $0x91] sm:$0xff] }
 0x1e2   : > { %v5670_v49 = vpop.f32.mrf.mxu3 }
 0x1e3   : > { %6759 = vst [vmem:[#allocation66_spill] sm:$0xff] %v5670_v49  ;;  %v5672_v23 = vpop.f32.mrf.mxu0 }
 0x1e6   : > { %4050 = vmatmul.msk.f32.gmra.mxu0 %vm283_vm0, %v5100_v35 }
 0x1e7   : > { %4106 = vmatmul.msk.f32.gmra.mxu3 %vm283_vm0, %v5336_v60 }
 0x1ea   : > { %v1038_v24 = vpop.f32.mrf.mxu3 }
 0x1eb   : > { %v5681_v27 = vadd.f32 %v1038_v24, %v883_v57  ;;  %v5683_v14 = vpop.f32.mrf.mxu0  ;;  %v1804_v57 = vld [vmem:[#allocation2 + $0xa9] sm:$0xff] }
 0x1ee   : > { %4051 = vmatmul.msk.f32.gmra.mxu0 %vm283_vm0, %v5122_v41 }
 0x1ef   : > { %4107 = vmatmul.msk.f32.gmra.mxu3 %vm283_vm0, %v5346_v12  ;;  %v1089_v12 = vld [vmem:[#allocation2 + $0x150] sm:$0xff] }
 0x1f2   : > { %v1041_v63 = vpop.f32.mrf.mxu3 }
 0x1f3   : > { %v5692_v60 = vadd.f32 %v1041_v63, %v884_v3  ;;  %v5694_v10 = vpop.f32.mrf.mxu0  ;;  %v1806_v63 = vld [vmem:[#allocation2 + $0xc9] sm:$0xff] }
 0x1f6   : > { %4052 = vmatmul.msk.f32.gmra.mxu0 %vm283_vm0, %v1088_v18 }
 0x1f7   : > { %4108 = vmatmul.msk.f32.gmra.mxu3 %vm283_vm0, %v5100_v35 }
 0x1fa   : > { %v1044_v6 = vpop.f32.mrf.mxu3 }
 0x1fb   : > { %v5700_v0 = vadd.f32 %v1044_v6, %v5512_v43  ;;  %v5702_v41 = vpop.f32.mrf.mxu0 }
 0x1fe   : > { %4053 = vmatmul.msk.f32.gmra.mxu0 %vm283_vm0, %v1089_v12 }
 0x1ff   : > { %4109 = vmatmul.msk.f32.gmra.mxu3 %vm283_vm0, %v1631_v28 }
 0x202   : > { %v1047_v44 = vpop.f32.mrf.mxu3 }
 0x203   : > { %v5707_v9 = vadd.f32 %v1047_v44, %v5528_v11  ;;  %v5709_v22 = vpop.f32.mrf.mxu0 }
 0x206   : > { %4114 = vmatmul.msk.f32.vlgmr.msrb.gmra.mxu0 %vm283_vm0, %v5395_v5  ;;  %v1801_v5 = vld [vmem:[#allocation2 + $0x71] sm:$0xff] }
 0x207   : > { %4110 = vmatmul.msk.f32.gmra.mxu3 %vm283_vm0, %v1088_v18  ;;  %v5743_v18 = vpop.f32.mrf.mxu1 }
 0x20b   : > { %v5714_v35 = vpop.f32.mrf.mxu0 }
 0x20e   : > { %4115 = vmatmul.msk.f32.gmra.mxu0 %vm283_vm0, %v5412_v1  ;;  %v1802_v1 = vld [vmem:[#allocation2 + $0x89] sm:$0xff] }
 0x20f   : > { %4111 = vmatmul.msk.f32.gmra.mxu3 %vm283_vm0, %v1089_v12  ;;  %v1807_v12 = vld [vmem:[#allocation2 + $0xd1] sm:$0xff]  ;;  %v1354_v28 = vpop.f32.mrf.mxu1 }
 0x213   : > { %v5719_v43 = vpop.f32.mrf.mxu0 }
 0x216   : > { %4116 = vmatmul.msk.f32.gmra.mxu0 %vm283_vm0, %v5429_v16 }
 0x217   : > { %4112 = vmatmul.msk.f32.gmra.mxu3 %vm283_vm0, %v1634_v31  ;;  %v1808_v31 = vld [vmem:[#allocation2 + $0xe9] sm:$0xff] }
 0x21b   : > { %v5724_v11 = vpop.f32.mrf.mxu0 }
 0x21e   : > { %4117 = vmatmul.msk.f32.gmra.mxu0 %vm283_vm0, %v1801_v5  ;;  %v1536_v5 = vpop.f32.mrf.mxu2 }
 0x21f   : > { %4113 = vmatmul.msk.f32.gmra.mxu3 %vm283_vm0, %v1635_v33  ;;  %v1718_v33 = vpop.f32.mrf.mxu3 }
 0x223   : > { %v5728_v40 = vpop.f32.mrf.mxu0 }
 0x226   : > { %4118 = vmatmul.msk.f32.gmra.mxu0 %vm283_vm0, %v1802_v1 }
 0x22b   : > { %v5731_v21 = vpop.f32.mrf.mxu0 }
 0x22e   : > { %4119 = vmatmul.msk.f32.gmra.mxu0 %vm283_vm0, %v1803_v62  ;;  %v1809_v62 = vld [vmem:[#allocation2 + $0xf1] sm:$0xff] }
 0x233   : > { %v5734_v16 = vpop.f32.mrf.mxu0 }
 0x236   : > { %4120 = vmatmul.msk.f32.gmra.mxu0 %vm283_vm0, %v1804_v57  ;;  %v1357_v57 = vpop.f32.mrf.mxu1 }
 0x23b   : > { %v5737_v24 = vpop.f32.mrf.mxu0 }
 0x23e   : > { %4121 = vmatmul.msk.f32.gmra.mxu0 %vm283_vm0, %v1805_v2  ;;  %v1539_v2 = vpop.f32.mrf.mxu2 }
 0x243   : > { %v5740_v3 = vpop.f32.mrf.mxu0 }
 0x244   : > { %6760 = vst [vmem:[#allocation67_spill] sm:$0xff] %v5740_v3 }
 0x246   : > { %4122 = vmatmul.msk.f32.gmra.mxu0 %vm283_vm0, %v1806_v63  ;;  %v1721_v63 = vpop.f32.mrf.mxu3  ;;  %v1542_v42 = vpop.f32.mrf.mxu2 }
 0x24b   : > { %v5745_v6 = vpop.f32.mrf.mxu0 }
 0x24c   : > { %6761 = vst [vmem:[#allocation68_spill] sm:$0xff] %v5745_v6  ;;  %v1811_v6 = vld [vmem:[#allocation2 + $0x111] sm:$0xff] }
 0x24e   : > { %4123 = vmatmul.msk.f32.gmra.mxu0 %vm283_vm0, %v1807_v12 }
 0x253   : > { %v5748_v44 = vpop.f32.mrf.mxu0 }
 0x254   : > { %6762 = vst [vmem:[#allocation69_spill] sm:$0xff] %v5748_v44  ;;  %v1360_v44 = vpop.f32.mrf.mxu1 }
 0x256   : > { %4124 = vmatmul.msk.f32.gmra.mxu0 %vm283_vm0, %v1808_v31 }
 0x25b   : > { %v5751_v1 = vpop.f32.mrf.mxu0 }
 0x25c   : > { %6763 = vst [vmem:[#allocation70_spill] sm:$0xff] %v5751_v1  ;;  %v1724_v1 = vpop.f32.mrf.mxu3  ;;  %v1363_v37 = vpop.f32.mrf.mxu1 }
 0x25e   : > { %4125 = vmatmul.msk.f32.gmra.mxu0 %vm283_vm0, %v1809_v62  ;;  %v646_v62 = vadd.f32 %v5399_v7, %v5334_v58 }
 0x260   : > { %v867_v3 = vadd.f32 %v5580_v20, %v646_v62 }
 0x262   : > { %v1050_v26 = vadd.f32 %v5458_v56, %v867_v3 }
 0x263   : > { %v1220_v49 = vpop.f32.mrf.mxu0 }
 0x264   : > { %v5755_v12 = vadd.f32 %v1220_v49, %v5681_v27  ;;  %v1812_v27 = vld [vmem:[#allocation2 + $0x129] sm:$0xff]  ;;  %v1232_v7 = vadd.f32 %v5672_v23, %v1050_v26  ;;  %v5778_v20 = vpop.f32.mrf.mxu1 }
 0x266   : > { %6764 = vst [vmem:[#allocation71_spill] sm:$0xff] %v5755_v12  ;;  %4126 = vmatmul.msk.f32.gmra.mxu0 %vm283_vm0, %v1810_v39  ;;  %v5768_v12 = vpop.f32.mrf.mxu2 }
 0x26b   : > { %v1223_v31 = vpop.f32.mrf.mxu0 }
 0x26c   : > { %v5759_v48 = vadd.f32 %v1223_v31, %v5692_v60  ;;  %v5772_v60 = vpop.f32.mrf.mxu3 }
 0x26e   : > { %4127 = vmatmul.msk.f32.gmra.mxu0 %vm283_vm0, %v1811_v6  ;;  %v6766_v6 = vld [vmem:[#allocation51_spill] sm:$0xff]  ;;  %v5785_v3 = vpop.f32.mrf.mxu2 }
 0x26f   : > { %v649_v31 = vadd.f32 %v6766_v6, %v5344_v15 }
 0x271   : > { %v868_v58 = vadd.f32 %v5594_v46, %v649_v31  ;;  %v5793_v31 = vld [vmem:[#allocation10] ss:$0 sm:$0xff] }
 0x273   : > { %v1226_v49 = vpop.f32.mrf.mxu0  ;;  %v1051_v56 = vadd.f32 %v5472_v25, %v868_v58  ;;  %v5795_v58 = vld [vmem:[#allocation10 + $0x1] ss:$0 sm:$0xff] }
 0x274   : > { %v5766_v39 = vadd.f32 %v1226_v49, %v5700_v0  ;;  %v1813_v0 = vld [vmem:[#allocation2 + $0x131] sm:$0xff]  ;;  %v1414_v49 = vadd.f32 %v1354_v28, %v1232_v7  ;;  %v5790_v23 = vpop.f32.mrf.mxu3 }
 0x275   : > { %v1233_v46 = vadd.f32 %v5683_v14, %v1051_v56  ;;  %v6770_v14 = vld [vmem:[#allocation42_spill] sm:$0xff] }
 0x276   : > { %6765 = vst [vmem:[#allocation72_spill] sm:$0xff] %v5766_v39  ;;  %4128 = vmatmul.msk.f32.gmra.mxu0 %vm283_vm0, %v1812_v27  ;;  %v6768_v27 = vld [vmem:[#allocation39_spill] sm:$0xff]  ;;  %v1596_v26 = vadd.f32 %v1536_v5, %v1414_v49  ;;  %v5807_v56 = vpop.f32.mrf.mxu2 }
 0x277   : > { %v652_v15 = vadd.f32 %v5439_v17, %v6768_v27  ;;  %v1415_v7 = vadd.f32 %v1357_v57, %v1233_v46  ;;  %v6771_v5 = vld [vmem:[#allocation55_spill] sm:$0xff] }
 0x278   : > { %v1778_v28 = vadd.f32 %v1718_v33, %v1596_v26 }
 0x279   : > { %v869_v6 = vadd.f32 %v5608_v19, %v652_v15  ;;  %v655_v19 = vadd.f32 %v6771_v5, %v6770_v14  ;;  %v1597_v33 = vadd.f32 %v1539_v2, %v1415_v7  ;;  %v6773_v7 = vld [vmem:[#allocation57_spill] sm:$0xff] }
 0x27b   : > { %v1229_v62 = vpop.f32.mrf.mxu0  ;;  %v870_v27 = vadd.f32 %v5622_v61, %v655_v19  ;;  %v1779_v15 = vadd.f32 %v1721_v63, %v1597_v33  ;;  %v1816_v19 = vld [vmem:[#allocation2 + $0x169] sm:$0xff] }
 0x27c   : > { %v5781_v39 = vadd.f32 %v1229_v62, %v5707_v9  ;;  %v5797_v62 = vpop.f32.mrf.mxu1  ;;  %v5810_v46 = vpop.f32.mrf.mxu3 }
 0x27e   : > { %6767 = vst [vmem:[#allocation51_spill] sm:$0xff] %v5781_v39  ;;  %4129 = vmatmul.msk.f32.gmra.mxu0 %vm283_vm0, %v1813_v0  ;;  %v6769_v0 = vld [vmem:[#allocation58_spill] sm:$0xff]  ;;  %v1554_v5 = vpop.f32.mrf.mxu2 }
 0x27f   : > { %v1052_v39 = vadd.f32 %v6769_v0, %v869_v6 }
 0x281   : > { %v1234_v49 = vadd.f32 %v5694_v10, %v1052_v39  ;;  %v6772_v39 = vld [vmem:[#allocation45_spill] sm:$0xff] }
 0x282   : > { %v658_v61 = vadd.f32 %v6773_v7, %v6772_v39  ;;  %v6775_v7 = vld [vmem:[#allocation48_spill] sm:$0xff] }
 0x283   : > { %v1900_v9 = vpop.f32.mrf.mxu0 }
 0x284   : > { %v1960_v25 = vadd.f32 %v1900_v9, %v1778_v28  ;;  %v1416_v28 = vadd.f32 %v1360_v44, %v1234_v49  ;;  %v1053_v9 = vadd.f32 %v5508_v47, %v870_v27  ;;  %v1372_v10 = vpop.f32.mrf.mxu1  ;;  %v871_v44 = vadd.f32 %v5634_v34, %v658_v61  ;;  %v1736_v49 = vpop.f32.mrf.mxu3 }
 0x286   : > { %v1984_v17 = vmul.f32 %v5793_v31, %v1960_v25  ;;  %4130 = vmatmul.msk.f32.gmra.mxu0 %vm283_vm0, %v5653_v53  ;;  %v1598_v63 = vadd.f32 %v1542_v42, %v1416_v28  ;;  %v1235_v25 = vadd.f32 %v5702_v41, %v1053_v9  ;;  %v6774_v41 = vld [vmem:[#allocation47_spill] sm:$0xff] }
 0x287   : > { %v661_v27 = vadd.f32 %v5500_v32, %v6774_v41  ;;  %v1557_v32 = vpop.f32.mrf.mxu2  ;;  %v6777_v41 = vld [vmem:[#allocation40_spill] sm:$0xff] }
 0x288   : > { %v2009_v57 = vadd.f32 %v5795_v58, %v1984_v17  ;;  %v1780_v17 = vadd.f32 %v1724_v1, %v1598_v63  ;;  %v1417_v33 = vadd.f32 %v1363_v37, %v1235_v25 }
 0x28a   : > { %v2029_v26 = vmax.f32 %v2009_v57, 0.0  ;;  %v1054_v57 = vadd.f32 %v5524_v51, %v871_v44  ;;  %v1599_v34 = vadd.f32 %v5768_v12, %v1417_v33 }
 0x28b   : > { %v1903_v6 = vpop.f32.mrf.mxu0 }
 0x28c   : > { %2069 = vst.msk [vmem:[#allocation3 + $0x8] sm:$0xff] %vm283_vm0, %v2029_v26  ;;  %v1961_v53 = vadd.f32 %v1903_v6, %v1779_v15  ;;  %v1236_v1 = vadd.f32 %v5709_v22, %v1054_v57  ;;  %v1375_v37 = vpop.f32.mrf.mxu1  ;;  %v872_v26 = vadd.f32 %v5646_v38, %v661_v27  ;;  %v1781_v6 = vadd.f32 %v5772_v60, %v1599_v34  ;;  %v1739_v39 = vpop.f32.mrf.mxu3 }
 0x28d   : > { %v664_v38 = vadd.f32 %v5520_v36, %v6775_v7 }
 0x28e   : > { %v1985_v2 = vmul.f32 %v5793_v31, %v1961_v53  ;;  %4131 = vmatmul.msk.f32.gmra.mxu0 %vm283_vm0, %v5666_v29  ;;  %v1817_v53 = vld [vmem:[#allocation2 + $0x171] sm:$0xff]  ;;  %v1418_v9 = vadd.f32 %v5778_v20, %v1236_v1  ;;  %v1055_v12 = vadd.f32 %v5540_v55, %v872_v26 }
 0x28f   : > { %v873_v63 = vadd.f32 %v5659_v45, %v664_v38 }
 0x290   : > { %v2010_v0 = vadd.f32 %v5795_v58, %v1985_v2  ;;  %v1600_v60 = vadd.f32 %v5785_v3, %v1418_v9  ;;  %v1237_v61 = vadd.f32 %v5714_v35, %v1055_v12  ;;  %v6776_v35 = vld [vmem:[#allocation49_spill] sm:$0xff] }
 0x291   : > { %v1056_v36 = vadd.f32 %v5552_v59, %v873_v63 }
 0x292   : > { %v2030_v14 = vmax.f32 %v2010_v0, 0.0  ;;  %v1782_v25 = vadd.f32 %v5790_v23, %v1600_v60 }
 0x293   : > { %v1906_v47 = vpop.f32.mrf.mxu0  ;;  %v1238_v23 = vadd.f32 %v5719_v43, %v1056_v36 }
 0x294   : > { %2070 = vst.msk [vmem:[#allocation3 + $0x10] sm:$0xff] %vm283_vm0, %v2030_v14  ;;  %v1962_v29 = vadd.f32 %v1906_v47, %v1780_v17  ;;  %v1378_v55 = vpop.f32.mrf.mxu1  ;;  %v1419_v17 = vadd.f32 %v5797_v62, %v1237_v61  ;;  %v1560_v47 = vpop.f32.mrf.mxu2 }
 0x295   : > { %v1420_v59 = vadd.f32 %v1372_v10, %v1238_v23 }
 0x296   : > { %v1986_v42 = vmul.f32 %v5793_v31, %v1962_v29  ;;  %4132 = vmatmul.msk.f32.gmra.mxu0 %vm283_vm0, %v1816_v19  ;;  %v667_v19 = vadd.f32 %v5538_v52, %v6776_v35  ;;  %v1601_v45 = vadd.f32 %v5807_v56, %v1419_v17  ;;  %v1742_v29 = vpop.f32.mrf.mxu3  ;;  %v1241_v17 = vadd.f32 %v5731_v21, %v5592_v4 }
 0x297   : > { %v1602_v26 = vadd.f32 %v1554_v5, %v1420_v59  ;;  %v6780_v59 = vld [vmem:[#allocation59_spill] sm:$0xff] }
 0x298   : > { %v2011_v15 = vadd.f32 %v5795_v58, %v1986_v42  ;;  %v1783_v62 = vadd.f32 %v5810_v46, %v1601_v45  ;;  %v874_v27 = vadd.f32 %v6777_v41, %v667_v19 }
 0x29a   : > { %v2031_v28 = vmax.f32 %v2011_v15, 0.0  ;;  %v1057_v52 = vadd.f32 %v5566_v50, %v874_v27  ;;  %v6778_v15 = vld [vmem:[#allocation52_spill] sm:$0xff] }
 0x29b   : > { %v1909_v51 = vpop.f32.mrf.mxu0  ;;  %v670_v43 = vadd.f32 %v5556_v8, %v6778_v15 }
 0x29c   : > { %2071 = vst.msk [vmem:[#allocation3 + $0x28] sm:$0xff] %vm283_vm0, %v2031_v28  ;;  %v1963_v2 = vadd.f32 %v1909_v51, %v1781_v6  ;;  %v1381_v1 = vpop.f32.mrf.mxu1  ;;  %v1239_v6 = vadd.f32 %v5724_v11, %v1057_v52  ;;  %v1563_v28 = vpop.f32.mrf.mxu2  ;;  %v1784_v51 = vadd.f32 %v1736_v49, %v1602_v26  ;;  %v6781_v26 = vld [vmem:[#allocation50_spill] sm:$0xff] }
 0x29e   : > { %v1987_v22 = vmul.f32 %v5793_v31, %v1963_v2  ;;  %4133 = vmatmul.msk.f32.gmra.mxu0 %vm283_vm0, %v1817_v53  ;;  %v1745_v10 = vpop.f32.mrf.mxu3  ;;  %v6779_v2 = vld [vmem:[#allocation43_spill] sm:$0xff] }
 0x29f   : > { %v875_v12 = vadd.f32 %v6779_v2, %v670_v43  ;;  %v6784_v2 = vld [vmem:[#allocation41_spill] sm:$0xff] }
 0x2a0   : > { %v2012_v20 = vadd.f32 %v5795_v58, %v1987_v22  ;;  %v1421_v22 = vadd.f32 %v1375_v37, %v1239_v6 }
 0x2a1   : > { %v1058_v7 = vadd.f32 %v5578_v54, %v875_v12  ;;  %v6785_v12 = vld [vmem:[#allocation67_spill] sm:$0xff] }
 0x2a2   : > { %v2032_v0 = vmax.f32 %v2012_v20, 0.0  ;;  %v1603_v38 = vadd.f32 %v1557_v32, %v1421_v22 }
 0x2a3   : > { %v1912_v44 = vpop.f32.mrf.mxu0  ;;  %v1240_v11 = vadd.f32 %v5728_v40, %v1058_v7 }
 0x2a4   : > { %2072 = vst.msk [vmem:[#allocation3 + $0x30] sm:$0xff] %vm283_vm0, %v2032_v0  ;;  %v1964_v14 = vadd.f32 %v1912_v44, %v1782_v25  ;;  %v1384_v5 = vpop.f32.mrf.mxu1  ;;  %v1785_v49 = vadd.f32 %v1739_v39, %v1603_v38  ;;  %v1566_v20 = vpop.f32.mrf.mxu2 }
 0x2a5   : > { %v1422_v25 = vadd.f32 %v1378_v55, %v1240_v11 }
 0x2a6   : > { %v1988_v3 = vmul.f32 %v5793_v31, %v1964_v14  ;;  %v1748_v0 = vpop.f32.mrf.mxu3 }
 0x2a7   : > { %v1604_v54 = vadd.f32 %v1560_v47, %v1422_v25  ;;  %v1242_v47 = vadd.f32 %v5734_v16, %v5606_v30  ;;  %v1243_v30 = vadd.f32 %v5737_v24, %v5620_v13 }
 0x2a8   : > { %v2013_v33 = vadd.f32 %v5795_v58, %v1988_v3  ;;  %v1423_v3 = vadd.f32 %v1381_v1, %v1241_v17 }
 0x2a9   : > { %v1786_v14 = vadd.f32 %v1742_v29, %v1604_v54  ;;  %v6789_v54 = vld [vmem:[#allocation44_spill] sm:$0xff] }
 0x2aa   : > { %v2033_v57 = vmax.f32 %v2013_v33, 0.0  ;;  %v1605_v23 = vadd.f32 %v1563_v28, %v1423_v3 }
 0x2ab   : > { %v1915_v42 = vpop.f32.mrf.mxu0 }
 0x2ac   : > { %2073 = vst.msk [vmem:[#allocation3 + $0x48] sm:$0xff] %vm283_vm0, %v2033_v57  ;;  %v1965_v34 = vadd.f32 %v1915_v42, %v1783_v62  ;;  %v1387_v40 = vpop.f32.mrf.mxu1  ;;  %v1569_v35 = vpop.f32.mrf.mxu2  ;;  %v1787_v21 = vadd.f32 %v1745_v10, %v1605_v23  ;;  %v1424_v57 = vadd.f32 %v1384_v5, %v1242_v47 }
 0x2ae   : > { %v1989_v56 = vmul.f32 %v5793_v31, %v1965_v34  ;;  %v1751_v45 = vpop.f32.mrf.mxu3  ;;  %v682_v34 = vadd.f32 %v5743_v18, %v6780_v59  ;;  %v1606_v1 = vadd.f32 %v1566_v20, %v1424_v57  ;;  %v6794_v57 = vld [vmem:[#allocation46_spill] sm:$0xff] }
 0x2b0   : > { %v2014_v46 = vadd.f32 %v5795_v58, %v1989_v56  ;;  %v1788_v56 = vadd.f32 %v1748_v0, %v1606_v1  ;;  %v879_v6 = vadd.f32 %v6781_v26, %v682_v34 }
 0x2b2   : > { %v2034_v53 = vmax.f32 %v2014_v46, 0.0  ;;  %v1425_v46 = vadd.f32 %v1387_v40, %v1243_v30  ;;  %v6790_v40 = vld [vmem:[#allocation68_spill] sm:$0xff] }
 0x2b3   : > { %v1918_v9 = vpop.f32.mrf.mxu0 }
 0x2b4   : > { %2074 = vst.msk [vmem:[#allocation3 + $0x50] sm:$0xff] %vm283_vm0, %v2034_v53  ;;  %v1966_v50 = vadd.f32 %v1918_v9, %v1784_v51  ;;  %v1390_v62 = vpop.f32.mrf.mxu1  ;;  %v1572_v27 = vpop.f32.mrf.mxu2  ;;  %v6782_v53 = vld [vmem:[#allocation63_spill] sm:$0xff]  ;;  %v6783_v9 = vld [vmem:[#allocation60_spill] sm:$0xff]  ;;  %v1607_v24 = vadd.f32 %v1569_v35, %v1425_v46  ;;  %v6797_v46 = vld [vmem:[#allocation66_spill] sm:$0xff] }
 0x2b5   : > { %v1062_v10 = vadd.f32 %v6782_v53, %v879_v6  ;;  %v685_v13 = vadd.f32 %v6784_v2, %v6783_v9 }
 0x2b6   : > { %v1990_v8 = vmul.f32 %v5793_v31, %v1966_v50  ;;  %v1754_v52 = vpop.f32.mrf.mxu3 }
 0x2b7   : > { %v1244_v22 = vadd.f32 %v6785_v12, %v1062_v10 }
 0x2b8   : > { %v2015_v60 = vadd.f32 %v5795_v58, %v1990_v8  ;;  %v1789_v8 = vadd.f32 %v1751_v45, %v1607_v24 }
 0x2ba   : > { %v2035_v61 = vmax.f32 %v2015_v60, 0.0  ;;  %v6786_v60 = vld [vmem:[#allocation53_spill] sm:$0xff] }
 0x2bb   : > { %v1921_v63 = vpop.f32.mrf.mxu0 }
 0x2bc   : > { %2075 = vst.msk [vmem:[#allocation3 + $0x68] sm:$0xff] %vm283_vm0, %v2035_v61  ;;  %v1967_v37 = vadd.f32 %v1921_v63, %v1785_v49  ;;  %v1393_v51 = vpop.f32.mrf.mxu1  ;;  %v1575_v7 = vpop.f32.mrf.mxu2  ;;  %v880_v49 = vadd.f32 %v6786_v60, %v685_v13  ;;  %v1426_v61 = vadd.f32 %v1390_v62, %v1244_v22  ;;  %v6787_v63 = vld [vmem:[#allocation64_spill] sm:$0xff] }
 0x2be   : > { %v1991_v44 = vmul.f32 %v5793_v31, %v1967_v37  ;;  %v1757_v38 = vpop.f32.mrf.mxu3  ;;  %v1063_v25 = vadd.f32 %v6787_v63, %v880_v49  ;;  %v6799_v63 = vld [vmem:[#allocation71_spill] sm:$0xff] }
 0x2c0   : > { %v2016_v32 = vadd.f32 %v5795_v58, %v1991_v44  ;;  %v6788_v44 = vld [vmem:[#allocation61_spill] sm:$0xff] }
 0x2c1   : > { %v688_v17 = vadd.f32 %v6789_v54, %v6788_v44 }
 0x2c2   : > { %v2036_v36 = vmax.f32 %v2016_v32, 0.0  ;;  %v1608_v32 = vadd.f32 %v1572_v27, %v1426_v61  ;;  %v6795_v27 = vld [vmem:[#allocation69_spill] sm:$0xff] }
 0x2c3   : > { %v1924_v39 = vpop.f32.mrf.mxu0 }
 0x2c4   : > { %2076 = vst.msk [vmem:[#allocation3 + $0x70] sm:$0xff] %vm283_vm0, %v2036_v36  ;;  %v1968_v55 = vadd.f32 %v1924_v39, %v1786_v14  ;;  %v1396_v0 = vpop.f32.mrf.mxu1  ;;  %v1245_v14 = vadd.f32 %v6790_v40, %v1063_v25  ;;  %v1790_v39 = vadd.f32 %v1754_v52, %v1608_v32 }
 0x2c6   : > { %v1992_v19 = vmul.f32 %v5793_v31, %v1968_v55  ;;  %v1578_v55 = vpop.f32.mrf.mxu2  ;;  %v1427_v23 = vadd.f32 %v1393_v51, %v1245_v14 }
 0x2c8   : > { %v2017_v4 = vadd.f32 %v5795_v58, %v1992_v19  ;;  %v6791_v19 = vld [vmem:[#allocation54_spill] sm:$0xff] }
 0x2c9   : > { %v881_v45 = vadd.f32 %v6791_v19, %v688_v17 }
 0x2ca   : > { %v2037_v33 = vmax.f32 %v2017_v4, 0.0  ;;  %v1760_v4 = vpop.f32.mrf.mxu3 }
 0x2cb   : > { %v1927_v29 = vpop.f32.mrf.mxu0 }
 0x2cc   : > { %2077 = vst.msk [vmem:[#allocation3 + $0x88] sm:$0xff] %vm283_vm0, %v2037_v33  ;;  %v1969_v42 = vadd.f32 %v1927_v29, %v1787_v21  ;;  %v6792_v21 = vld [vmem:[#allocation65_spill] sm:$0xff]  ;;  %v6793_v29 = vld [vmem:[#allocation62_spill] sm:$0xff]  ;;  %v1399_v1 = vpop.f32.mrf.mxu1 }
 0x2cd   : > { %v1064_v33 = vadd.f32 %v6792_v21, %v881_v45 }
 0x2ce   : > { %v1993_v41 = vmul.f32 %v5793_v31, %v1969_v42  ;;  %v691_v42 = vadd.f32 %v6794_v57, %v6793_v29  ;;  %v1581_v6 = vpop.f32.mrf.mxu2 }
 0x2cf   : > { %v1246_v59 = vadd.f32 %v6795_v27, %v1064_v33 }
 0x2d0   : > { %v2018_v16 = vadd.f32 %v5795_v58, %v1993_v41  ;;  %v1609_v41 = vadd.f32 %v1575_v7, %v1427_v23 }
 0x2d2   : > { %v2038_v15 = vmax.f32 %v2018_v16, 0.0  ;;  %v1791_v30 = vadd.f32 %v1757_v38, %v1609_v41  ;;  %v1763_v53 = vpop.f32.mrf.mxu3 }
 0x2d3   : > { %v1930_v43 = vpop.f32.mrf.mxu0 }
 0x2d4   : > { %2078 = vst.msk [vmem:[#allocation3 + $0x90] sm:$0xff] %vm283_vm0, %v2038_v15  ;;  %v1970_v28 = vadd.f32 %v1930_v43, %v1788_v56  ;;  %v6796_v56 = vld [vmem:[#allocation56_spill] sm:$0xff]  ;;  %v1428_v43 = vadd.f32 %v1396_v0, %v1246_v59  ;;  %v1402_v12 = vpop.f32.mrf.mxu1 }
 0x2d5   : > { %v882_v15 = vadd.f32 %v6796_v56, %v691_v42  ;;  %v1430_v25 = vadd.f32 %v1402_v12, %v6799_v63 }
 0x2d6   : > { %v1994_v18 = vmul.f32 %v5793_v31, %v1970_v28  ;;  %v1610_v10 = vadd.f32 %v1578_v55, %v1428_v43 }
 0x2d7   : > { %v1065_v28 = vadd.f32 %v6797_v46, %v882_v15 }
 0x2d8   : > { %v2019_v50 = vadd.f32 %v5795_v58, %v1994_v18  ;;  %v6798_v18 = vld [vmem:[#allocation70_spill] sm:$0xff]  ;;  %v1792_v13 = vadd.f32 %v1760_v4, %v1610_v10 }
 0x2d9   : > { %v1247_v9 = vadd.f32 %v6798_v18, %v1065_v28 }
 0x2da   : > { %v2039_v5 = vmax.f32 %v2019_v50, 0.0  ;;  %v1766_v60 = vpop.f32.mrf.mxu3 }
 0x2db   : > { %v1933_v11 = vpop.f32.mrf.mxu0  ;;  %v1429_v50 = vadd.f32 %v1399_v1, %v1247_v9 }
 0x2dc   : > { %2079 = vst.msk [vmem:[#allocation3 + $0xa8] sm:$0xff] %vm283_vm0, %v2039_v5  ;;  %v1971_v20 = vadd.f32 %v1933_v11, %v1789_v8  ;;  %v1584_v5 = vpop.f32.mrf.mxu2  ;;  %v1405_v0 = vpop.f32.mrf.mxu1 }
 0x2dd   : > { %v1611_v38 = vadd.f32 %v1581_v6, %v1429_v50  ;;  %v1612_v54 = vadd.f32 %v1584_v5, %v1430_v25 }
 0x2de   : > { %v1995_v37 = vmul.f32 %v5793_v31, %v1971_v20 }
 0x2df   : > { %v1793_v49 = vadd.f32 %v1763_v53, %v1611_v38  ;;  %v1794_v40 = vadd.f32 %v1766_v60, %v1612_v54 }
 0x2e0   : > { %v2020_v36 = vadd.f32 %v5795_v58, %v1995_v37 }
 0x2e2   : > { %v2040_v3 = vmax.f32 %v2020_v36, 0.0  ;;  %v1769_v36 = vpop.f32.mrf.mxu3 }
 0x2e3   : > { %v1936_v35 = vpop.f32.mrf.mxu0 }
 0x2e4   : > { %2080 = vst.msk [vmem:[#allocation3 + $0xb0] sm:$0xff] %vm283_vm0, %v2040_v3  ;;  %v1972_v47 = vadd.f32 %v1936_v35, %v1790_v39  ;;  %v1587_v32 = vpop.f32.mrf.mxu2  ;;  %v1431_v3 = vadd.f32 %v1405_v0, %v5759_v48  ;;  %v1408_v19 = vpop.f32.mrf.mxu1 }
 0x2e6   : > { %v1996_v62 = vmul.f32 %v5793_v31, %v1972_v47  ;;  %v1613_v45 = vadd.f32 %v1587_v32, %v1431_v3 }
 0x2e8   : > { %v2021_v34 = vadd.f32 %v5795_v58, %v1996_v62  ;;  %v1795_v47 = vadd.f32 %v1769_v36, %v1613_v45  ;;  %v6800_v62 = vld [vmem:[#allocation72_spill] sm:$0xff] }
 0x2e9   : > { %v1432_v29 = vadd.f32 %v1408_v19, %v6800_v62 }
 0x2ea   : > { %v2041_v16 = vmax.f32 %v2021_v34, 0.0  ;;  %v1772_v42 = vpop.f32.mrf.mxu3 }
 0x2eb   : > { %v1939_v52 = vpop.f32.mrf.mxu0 }
 0x2ec   : > { %2081 = vst.msk [vmem:[#allocation3 + $0xc8] sm:$0xff] %vm283_vm0, %v2041_v16  ;;  %v1973_v26 = vadd.f32 %v1939_v52, %v1791_v30  ;;  %v1590_v21 = vpop.f32.mrf.mxu2  ;;  %v1411_v59 = vpop.f32.mrf.mxu1  ;;  %v6801_v16 = vld [vmem:[#allocation51_spill] sm:$0xff] }
 0x2ed   : > { %v1614_v41 = vadd.f32 %v1590_v21, %v1432_v29  ;;  %v1433_v52 = vadd.f32 %v1411_v59, %v6801_v16 }
 0x2ee   : > { %v1997_v51 = vmul.f32 %v5793_v31, %v1973_v26 }
 0x2ef   : > { %v1796_v34 = vadd.f32 %v1772_v42, %v1614_v41 }
 0x2f0   : > { %v2022_v2 = vadd.f32 %v5795_v58, %v1997_v51 }
 0x2f2   : > { %v2042_v24 = vmax.f32 %v2022_v2, 0.0  ;;  %v1775_v26 = vpop.f32.mrf.mxu3 }
 0x2f3   : > { %v1942_v22 = vpop.f32.mrf.mxu0 }
 0x2f4   : > { %2082 = vst.msk [vmem:[#allocation3 + $0xd0] sm:$0xff] %vm283_vm0, %v2042_v24  ;;  %v1974_v7 = vadd.f32 %v1942_v22, %v1792_v13  ;;  %v1593_v15 = vpop.f32.mrf.mxu2 }
 0x2f5   : > { %v1615_v6 = vadd.f32 %v1593_v15, %v1433_v52 }
 0x2f6   : > { %v1998_v8 = vmul.f32 %v5793_v31, %v1974_v7 }
 0x2f7   : > { %v1797_v28 = vadd.f32 %v1775_v26, %v1615_v6 }
 0x2f8   : > { %v2023_v11 = vadd.f32 %v5795_v58, %v1998_v8 }
 0x2fa   : > { %v2043_v61 = vmax.f32 %v2023_v11, 0.0 }
 0x2fb   : > { %v1945_v20 = vpop.f32.mrf.mxu0 }
 0x2fc   : > { %2083 = vst.msk [vmem:[#allocation3 + $0xe8] sm:$0xff] %vm283_vm0, %v2043_v61  ;;  %v1975_v37 = vadd.f32 %v1945_v20, %v1793_v49 }
 0x2fe   : > { %v1999_v44 = vmul.f32 %v5793_v31, %v1975_v37 }
 0x300   : > { %v2024_v17 = vadd.f32 %v5795_v58, %v1999_v44 }
 0x302   : > { %v2044_v14 = vmax.f32 %v2024_v17, 0.0 }
 0x303   : > { %v1948_v39 = vpop.f32.mrf.mxu0 }
 0x304   : > { %2084 = vst.msk [vmem:[#allocation3 + $0xf0] sm:$0xff] %vm283_vm0, %v2044_v14  ;;  %v1976_v55 = vadd.f32 %v1948_v39, %v1794_v40 }
 0x306   : > { %v2000_v35 = vmul.f32 %v5793_v31, %v1976_v55 }
 0x308   : > { %v2025_v23 = vadd.f32 %v5795_v58, %v2000_v35 }
 0x30a   : > { %v2045_v4 = vmax.f32 %v2025_v23, 0.0 }
 0x30b   : > { %v1951_v33 = vpop.f32.mrf.mxu0 }
 0x30c   : > { %2085 = vst.msk [vmem:[#allocation3 + $0x108] sm:$0xff] %vm283_vm0, %v2045_v4  ;;  %v1977_v57 = vadd.f32 %v1951_v33, %v1795_v47 }
 0x30e   : > { %v2001_v48 = vmul.f32 %v5793_v31, %v1977_v57 }
 0x310   : > { %v2026_v27 = vadd.f32 %v5795_v58, %v2001_v48 }
 0x312   : > { %v2046_v1 = vmax.f32 %v2026_v27, 0.0 }
 0x313   : > { %v1954_v30 = vpop.f32.mrf.mxu0 }
 0x314   : > { %2086 = vst.msk [vmem:[#allocation3 + $0x110] sm:$0xff] %vm283_vm0, %v2046_v1  ;;  %v1978_v56 = vadd.f32 %v1954_v30, %v1796_v34 }
 0x316   : > { %v2002_v43 = vmul.f32 %v5793_v31, %v1978_v56 }
 0x318   : > { %v2027_v46 = vadd.f32 %v5795_v58, %v2002_v43 }
 0x31a   : > { %v2047_v51 = vmax.f32 %v2027_v46, 0.0 }
 0x31b   : > { %v1957_v53 = vpop.f32.mrf.mxu0 }
 0x31c   : > { %2087 = vst.msk [vmem:[#allocation3 + $0x128] sm:$0xff] %vm283_vm0, %v2047_v51  ;;  %v1979_v10 = vadd.f32 %v1957_v53, %v1797_v28 }
 0x31e   : > { %v2003_v18 = vmul.f32 %v5793_v31, %v1979_v10 }
 0x320   : > { %v2028_v9 = vadd.f32 %v5795_v58, %v2003_v18  ;;  %2092 = sbr.rel (%p4134_p11) target bundleno = 808 (0x328), region = 64 }
 0x322   : > { %v2048_v2 = vmax.f32 %v2028_v9, 0.0 }
 0x324   : > { %2088 = vst.msk [vmem:[#allocation3 + $0x130] sm:$0xff] %vm283_vm0, %v2048_v2 }
 0x325   : > { %v4710_v13 = vmov 0.0  }
 0x326   : > { %2093 = vst.msk [vmem:[#allocation3 + $0x8] sm:$0xff] %vm283_vm0, %v4710_v13 }
 0x327   : > { %2094 = vst.msk [vmem:[#allocation3 + $0x10] sm:$0xff] %vm283_vm0, %v4710_v13 }
 0x328 PF: > { %p4135_p0 = scmp.ne.s32.totalorder %s4684_s21, 1 }
 0x32a   : > { %2098 = sbr.rel (%p4135_p0) target bundleno = 818 (0x332), region = 68 }
 0x32f   : > { %v4711_v24 = vmov 0.0  }
 0x330   : > { %2100 = vst.msk [vmem:[#allocation3 + $0x128] sm:$0xff] %vm283_vm0, %v4711_v24 }
 0x331   : > { %2101 = vst.msk [vmem:[#allocation3 + $0x130] sm:$0xff] %vm283_vm0, %v4711_v24 }
 0x332 PF: > { %v2142_v31 = vld [vmem:[#allocation9 + $0x38] sm:$0xff]  ;;  %v2141_v12 = vld [vmem:[#allocation9 + $0x30] sm:$0xff]  ;;  %v2140_v7 = vld [vmem:[#allocation9 + $0x28] sm:$0xff]  ;;  %vm3496_vm1 = vcmask 1047556   ;;  %s4714_s14 = smov 64   ;;  %s4715_s9 = smov 32  }
 0x333   : > { %v2121_v58 = vld [vmem:[#allocation9 + $0x18] sm:$0xff]  ;;  %2203 = vmatpush.msra.mxu1 %v2142_v31  ;;  %v2120_v22 = vld [vmem:[#allocation9 + $0x10] sm:$0xff]  ;;  %v2119_v8 = vld [vmem:[#allocation9 + $0x8] sm:$0xff]  ;;  %s4716_s7 = smov 96   ;;  %vm3771_vm2 = vcmask 785408   ;;  %vm3769_vm3 = vcmask 523264  }
 0x334   : > { %2316 = vmatpush.msra.mxu2 %v2121_v58  ;;  %v2389_v50 = vld [vmem:[#allocation9 + $0x58] sm:$0xff]  ;;  %v2388_v5 = vld [vmem:[#allocation9 + $0x50] sm:$0xff]  ;;  %v2387_v38 = vld [vmem:[#allocation9 + $0x48] sm:$0xff]  ;;  %s4281_s8 = sshll.u32 %s4684_s21, 2  ;;  %s4282_s12 = sshll.u32 %s4688_s22, 3 }
 0x335   : > { %2450 = vmatpush.msra.mxu3 %v2389_v50  ;;  %2204 = vmatpush.msra.mxu1 %v2141_v12  ;;  %v2139_v11 = vld [vmem:[#allocation9 + $0x20] sm:$0xff]  ;;  %v2122_v49 = vld [vmem:[#allocation3 + $0x8] sm:$0xff]  ;;  %v2690_v20 = vld [vmem:[#allocation9 + $0x98] sm:$0xff]  ;;  %s3798_s11 = sadd.s32 %s4282_s12, %s4281_s8  ;;  %s3802_s5 = sshll.u32 %s5068_s6, 4  ;;  %s3803_s5 = int_to_ptr.vmem [resolvable:$true] %s3802_s5 }
 0x336   : > { %2317 = vmatpush.msra.mxu2 %v2120_v22  ;;  %v2118_v60 = vld [vmem:[#allocation9] sm:$0xff]  ;;  %v2369_v25 = vld [vmem:[#allocation3 + $0x9] sm:$0xff]  ;;  %v2540_v37 = vld [vmem:[#allocation9 + $0x78] sm:$0xff]  ;;  %s4283_s2 = sshll.u32 %s3798_s11, 3  ;;  %s3787_s29 = scalar_lea.sflag [#allocation6], %s279_s1 }
 0x337   : > { %2451 = vmatpush.msra.mxu3 %v2388_v5  ;;  %2205 = vmatpush.msra.mxu1 %v2140_v7  ;;  %v2102_v61 = vld [vmem:[#allocation3 + $0x7] sm:$0xff]  ;;  %v2689_v0 = vld [vmem:[#allocation9 + $0x90] sm:$0xff]  ;;  %v2840_v51 = vld [vmem:[#allocation9 + $0xb8] sm:$0xff]  ;;  %s3800_s3 = scalar_lea.hbm %s6669_s4, %s4283_s2  ;;  %s4590_s10 = scalar_lea.hbm %s6669_s4, 128 }
 0x338   : > { %2318 = vmatpush.msra.mxu2 %v2119_v8  ;;  %v2386_v63 = vld [vmem:[#allocation9 + $0x40] sm:$0xff]  ;;  %v2539_v44 = vld [vmem:[#allocation9 + $0x70] sm:$0xff]  ;;  %v5951_v40 = vld [vmem:[#allocation3 + $0x28] sm:$0xff]  ;;  %s3804_s15 = sshll.u32 %s3800_s3, 4  ;;  %s3805_s15 = int_to_ptr.hbm [resolvable:$true] %s3804_s15 }
 0x339   : > { %2452 = vmatpush.msra.mxu3 %v2387_v38  ;;  %2206 = vmatpush.msra.mxu1 %v2139_v11  ;;  %v2123_v54 = vld [vmem:[#allocation3 + $0x10] sm:$0xff]  ;;  %v5953_v14 = vld [vmem:[#allocation3 + $0x27] sm:$0xff]  ;;  %v3291_v13 = vld [vmem:[#allocation9 + $0x118] sm:$0xff]  ;;  %s4584_s28 = sshra.s32 %s3805_s15, 4  ;;  %s4585_s28 = int_to_ptr.hbm [resolvable:$true] %s4584_s28 }
 0x33a   : > { %2319 = vmatpush.msra.mxu2 %v2118_v60  ;;  %4136 = vmatmul.msk.f32.vlgmr.msra.gmra.mxu1 %vm283_vm0, %v2122_v49  ;;  %v2103_v17 = vld [vmem:[#allocation3 + $0xf] sm:$0xff]  ;;  %v5977_v19 = vld [vmem:[#allocation3 + $0x47] sm:$0xff]  ;;  %v2991_v31 = vld [vmem:[#allocation9 + $0xd8] sm:$0xff]  ;;  %s4586_s30 = scalar_lea.hbm %s4585_s28, 32  ;;  %p4591_p7 = scmp.lt.s32.totalorder %s4585_s28, %s6669_s4 }
 0x33b   : > { %4152 = vmatmul.msk.f32.vlgmr.msra.gmra.mxu2 %vm283_vm0, %v2102_v61  ;;  %2453 = vmatpush.msra.mxu3 %v2386_v63  ;;  %v2370_v32 = vld [vmem:[#allocation3 + $0x11] sm:$0xff]  ;;  %v5955_v36 = vld [vmem:[#allocation3 + $0x29] sm:$0xff]  ;;  %v2687_v1 = vld [vmem:[#allocation9 + $0x80] sm:$0xff]  ;;  %p4587_p2 = scmp.ne.s32.totalorder %s4585_s28, %s4586_s30  ;;  %p4592_p8 = scmp.lt.s32.totalorder %s4590_s10, %s4586_s30 }
 0x33c   : > { %2751 = vmatpush.msrb.mxu2 %v2690_v20  ;;  %4168 = vmatmul.msk.f32.vlgmr.msra.gmra.mxu3 %vm283_vm0, %v2369_v25  ;;  %v5963_v39 = vld [vmem:[#allocation3 + $0x30] sm:$0xff]  ;;  %v5975_v35 = vld [vmem:[#allocation3 + $0x48] sm:$0xff]  ;;  %v2537_v30 = vld [vmem:[#allocation9 + $0x60] sm:$0xff] }
 0x33d   : > { %2601 = vmatpush.msrb.mxu1 %v2540_v37  ;;  %v5965_v3 = vld [vmem:[#allocation3 + $0x2f] sm:$0xff]  ;;  %v6001_v29 = vld [vmem:[#allocation3 + $0x67] sm:$0xff]  ;;  %2901 = vmatpush.msrb.mxu3 %v2840_v51  ;;  %v3141_v58 = vld [vmem:[#allocation9 + $0xf8] sm:$0xff]  ;;  %p4588_p3 = pnand %p4587_p2, %p4812_p6  ;;  %p4593_p9 = por %p4592_p8, %p4591_p7 }
 0x33e   : > { %2752 = vmatpush.msrb.mxu2 %v2689_v0  ;;  %v5967_v55 = vld [vmem:[#allocation3 + $0x31] sm:$0xff]  ;;  %v5979_v45 = vld [vmem:[#allocation3 + $0x49] sm:$0xff]  ;;  %v2837_v24 = vld [vmem:[#allocation9 + $0xa0] sm:$0xff]  ;;  %3052 = vmatpush.msra.mxu0 %v2991_v31 }
 0x33f   : > { %2602 = vmatpush.msrb.mxu1 %v2539_v44  ;;  %v2688_v23 = vld [vmem:[#allocation9 + $0x88] sm:$0xff]  ;;  %v5987_v4 = vld [vmem:[#allocation3 + $0x50] sm:$0xff]  ;;  %v2988_v5 = vld [vmem:[#allocation9 + $0xc0] sm:$0xff]  ;;  %p4589_p5 = pneg %p4588_p3 }
 0x340   : > { %2753 = vmatpush.msrb.mxu2 %v2688_v23  ;;  %v2538_v47 = vld [vmem:[#allocation9 + $0x68] sm:$0xff]  ;;  %v5991_v33 = vld [vmem:[#allocation3 + $0x51] sm:$0xff] }
 0x341   : > { %2603 = vmatpush.msrb.mxu1 %v2538_v47  ;;  %v5989_v21 = vld [vmem:[#allocation3 + $0x4f] sm:$0xff]  ;;  %v6025_v59 = vld [vmem:[#allocation3 + $0x87] sm:$0xff]  ;;  %p4594_p12 = pnand %p4593_p9, %p4589_p5 }
 0x342   : > { %4137 = vmatmul.msk.f32.gmra.mxu1 %vm283_vm0, %v2123_v54  ;;  %v5999_v62 = vld [vmem:[#allocation3 + $0x68] sm:$0xff]  ;;  %v6011_v42 = vld [vmem:[#allocation3 + $0x70] sm:$0xff]  ;;  %2754 = vmatpush.msrb.mxu2 %v2687_v1 }
 0x343   : > { %4153 = vmatmul.msk.f32.gmra.mxu2 %vm283_vm0, %v2103_v17  ;;  %v6003_v57 = vld [vmem:[#allocation3 + $0x69] sm:$0xff]  ;;  %v6015_v41 = vld [vmem:[#allocation3 + $0x71] sm:$0xff]  ;;  %2604 = vmatpush.msrb.mxu1 %v2537_v30 }
 0x344   : > { %4169 = vmatmul.msk.f32.gmra.mxu3 %vm283_vm0, %v2370_v32  ;;  %v6013_v48 = vld [vmem:[#allocation3 + $0x6f] sm:$0xff]  ;;  %v6049_v43 = vld [vmem:[#allocation3 + $0xa7] sm:$0xff]  ;;  %3352 = vmatpush.msra.mxu2 %v3291_v13 }
 0x345   : > { %v6023_v27 = vld [vmem:[#allocation3 + $0x88] sm:$0xff]  ;;  %v6035_v16 = vld [vmem:[#allocation3 + $0x90] sm:$0xff]  ;;  %3202 = vmatpush.msra.mxu1 %v3141_v58 }
 0x346   : > { %v6027_v34 = vld [vmem:[#allocation3 + $0x89] sm:$0xff]  ;;  %v6039_v56 = vld [vmem:[#allocation3 + $0x91] sm:$0xff] }
 0x347   : > { %v6037_v52 = vld [vmem:[#allocation3 + $0x8f] sm:$0xff]  ;;  %v6073_v18 = vld [vmem:[#allocation3 + $0xc7] sm:$0xff] }
 0x348   : > { %v6047_v15 = vld [vmem:[#allocation3 + $0xa8] sm:$0xff]  ;;  %v6059_v6 = vld [vmem:[#allocation3 + $0xb0] sm:$0xff] }
 0x349   : > { %v6051_v26 = vld [vmem:[#allocation3 + $0xa9] sm:$0xff]  ;;  %v6063_v28 = vld [vmem:[#allocation3 + $0xb1] sm:$0xff] }
 0x34a   : > { %4138 = vmatmul.msk.f32.gmra.mxu1 %vm283_vm0, %v5951_v40  ;;  %v6061_v46 = vld [vmem:[#allocation3 + $0xaf] sm:$0xff]  ;;  %v6099_v11 = vld [vmem:[#allocation3 + $0xe7] sm:$0xff] }
 0x34b   : > { %4154 = vmatmul.msk.f32.gmra.mxu2 %vm283_vm0, %v5953_v14  ;;  %v2839_v53 = vld [vmem:[#allocation9 + $0xb0] sm:$0xff]  ;;  %v6071_v10 = vld [vmem:[#allocation3 + $0xc8] sm:$0xff] }
 0x34c   : > { %4170 = vmatmul.msk.f32.gmra.mxu3 %vm283_vm0, %v5955_v36  ;;  %v2838_v9 = vld [vmem:[#allocation9 + $0xa8] sm:$0xff]  ;;  %v2990_v12 = vld [vmem:[#allocation9 + $0xd0] sm:$0xff] }
 0x34d   : > { %2902 = vmatpush.msrb.mxu3 %v2839_v53  ;;  %v6075_v2 = vld [vmem:[#allocation3 + $0xc9] sm:$0xff]  ;;  %3053 = vmatpush.msra.mxu0 %v2990_v12  ;;  %v6087_v8 = vld [vmem:[#allocation3 + $0xd1] sm:$0xff] }
 0x34e   : > { %v6083_v22 = vld [vmem:[#allocation3 + $0xd0] sm:$0xff]  ;;  %v2989_v7 = vld [vmem:[#allocation9 + $0xc8] sm:$0xff] }
 0x34f   : > { %2903 = vmatpush.msrb.mxu3 %v2838_v9  ;;  %v6085_v50 = vld [vmem:[#allocation3 + $0xcf] sm:$0xff]  ;;  %3054 = vmatpush.msra.mxu0 %v2989_v7 }
 0x350   : > { %v6097_v38 = vld [vmem:[#allocation3 + $0xe8] sm:$0xff]  ;;  %v6111_v49 = vld [vmem:[#allocation3 + $0xf0] sm:$0xff] }
 0x351   : > { %2904 = vmatpush.msrb.mxu3 %v2837_v24  ;;  %3055 = vmatpush.msra.mxu0 %v2988_v5  ;;  %v6101_v60 = vld [vmem:[#allocation3 + $0xe9] sm:$0xff]  ;;  %v6115_v20 = vld [vmem:[#allocation3 + $0xf1] sm:$0xff] }
 0x352   : > { %4139 = vmatmul.msk.f32.gmra.mxu1 %vm283_vm0, %v5963_v39  ;;  %4232 = vmatmul.msk.f32.vlgmr.msra.gmra.mxu0 %vm283_vm0, %v5977_v19  ;;  %v6113_v61 = vld [vmem:[#allocation3 + $0xef] sm:$0xff] }
 0x353   : > { %4155 = vmatmul.msk.f32.gmra.mxu2 %vm283_vm0, %v5965_v3  ;;  %v3290_v25 = vld [vmem:[#allocation9 + $0x110] sm:$0xff]  ;;  %v3139_v58 = vld [vmem:[#allocation9 + $0xe8] sm:$0xff] }
 0x354   : > { %4171 = vmatmul.msk.f32.gmra.mxu3 %vm283_vm0, %v5967_v55  ;;  %3353 = vmatpush.msra.mxu2 %v3290_v25  ;;  %v3140_v44 = vld [vmem:[#allocation9 + $0xf0] sm:$0xff] }
 0x355   : > { %3203 = vmatpush.msra.mxu1 %v3140_v44 }
 0x357   : > { %3204 = vmatpush.msra.mxu1 %v3139_v58 }
 0x35a   : > { %4140 = vmatmul.msk.f32.gmra.mxu1 %vm283_vm0, %v5975_v35  ;;  %4233 = vmatmul.msk.f32.gmra.mxu0 %vm283_vm0, %v5989_v21 }
 0x35b   : > { %4156 = vmatmul.msk.f32.gmra.mxu2 %vm283_vm0, %v5977_v19 }
 0x35c   : > { %4172 = vmatmul.msk.f32.gmra.mxu3 %vm283_vm0, %v5979_v45 }
 0x362   : > { %4141 = vmatmul.msk.f32.gmra.mxu1 %vm283_vm0, %v5987_v4  ;;  %4234 = vmatmul.msk.f32.gmra.mxu0 %vm283_vm0, %v6001_v29 }
 0x363   : > { %4157 = vmatmul.msk.f32.gmra.mxu2 %vm283_vm0, %v5989_v21 }
 0x364   : > { %4173 = vmatmul.msk.f32.gmra.mxu3 %vm283_vm0, %v5991_v33 }
 0x36a   : > { %4142 = vmatmul.msk.f32.gmra.mxu1 %vm283_vm0, %v5999_v62  ;;  %4235 = vmatmul.msk.f32.gmra.mxu0 %vm283_vm0, %v6013_v48 }
 0x36b   : > { %4158 = vmatmul.msk.f32.gmra.mxu2 %vm283_vm0, %v6001_v29 }
 0x36c   : > { %4174 = vmatmul.msk.f32.gmra.mxu3 %vm283_vm0, %v6003_v57 }
 0x372   : > { %4143 = vmatmul.msk.f32.gmra.mxu1 %vm283_vm0, %v6011_v42  ;;  %4236 = vmatmul.msk.f32.gmra.mxu0 %vm283_vm0, %v6025_v59 }
 0x373   : > { %4159 = vmatmul.msk.f32.gmra.mxu2 %vm283_vm0, %v6013_v48 }
 0x374   : > { %4175 = vmatmul.msk.f32.gmra.mxu3 %vm283_vm0, %v6015_v41 }
 0x37a   : > { %4144 = vmatmul.msk.f32.gmra.mxu1 %vm283_vm0, %v6023_v27  ;;  %4237 = vmatmul.msk.f32.gmra.mxu0 %vm283_vm0, %v6037_v52 }
 0x37b   : > { %4160 = vmatmul.msk.f32.gmra.mxu2 %vm283_vm0, %v6025_v59 }
 0x37c   : > { %4176 = vmatmul.msk.f32.gmra.mxu3 %vm283_vm0, %v6027_v34 }
 0x382   : > { %4145 = vmatmul.msk.f32.gmra.mxu1 %vm283_vm0, %v6035_v16  ;;  %4238 = vmatmul.msk.f32.gmra.mxu0 %vm283_vm0, %v6049_v43 }
 0x383   : > { %4161 = vmatmul.msk.f32.gmra.mxu2 %vm283_vm0, %v6037_v52 }
 0x384   : > { %4177 = vmatmul.msk.f32.gmra.mxu3 %vm283_vm0, %v6039_v56 }
 0x38a   : > { %4146 = vmatmul.msk.f32.gmra.mxu1 %vm283_vm0, %v6047_v15  ;;  %4239 = vmatmul.msk.f32.gmra.mxu0 %vm283_vm0, %v6061_v46 }
 0x38b   : > { %4162 = vmatmul.msk.f32.gmra.mxu2 %vm283_vm0, %v6049_v43 }
 0x38c   : > { %4178 = vmatmul.msk.f32.gmra.mxu3 %vm283_vm0, %v6051_v26 }
 0x392   : > { %4147 = vmatmul.msk.f32.gmra.mxu1 %vm283_vm0, %v6059_v6  ;;  %4240 = vmatmul.msk.f32.gmra.mxu0 %vm283_vm0, %v6073_v18 }
 0x393   : > { %4163 = vmatmul.msk.f32.gmra.mxu2 %vm283_vm0, %v6061_v46 }
 0x394   : > { %4179 = vmatmul.msk.f32.gmra.mxu3 %vm283_vm0, %v6063_v28 }
 0x39a   : > { %4148 = vmatmul.msk.f32.gmra.mxu1 %vm283_vm0, %v6071_v10  ;;  %4241 = vmatmul.msk.f32.gmra.mxu0 %vm283_vm0, %v6085_v50 }
 0x39b   : > { %4164 = vmatmul.msk.f32.gmra.mxu2 %vm283_vm0, %v6073_v18 }
 0x39c   : > { %4180 = vmatmul.msk.f32.gmra.mxu3 %vm283_vm0, %v6075_v2 }
 0x3a2   : > { %4149 = vmatmul.msk.f32.gmra.mxu1 %vm283_vm0, %v6083_v22  ;;  %4242 = vmatmul.msk.f32.gmra.mxu0 %vm283_vm0, %v6099_v11 }
 0x3a3   : > { %4165 = vmatmul.msk.f32.gmra.mxu2 %vm283_vm0, %v6085_v50 }
 0x3a4   : > { %4181 = vmatmul.msk.f32.gmra.mxu3 %vm283_vm0, %v6087_v8 }
 0x3aa   : > { %4150 = vmatmul.msk.f32.gmra.mxu1 %vm283_vm0, %v6097_v38  ;;  %4243 = vmatmul.msk.f32.gmra.mxu0 %vm283_vm0, %v6113_v61 }
 0x3ab   : > { %4166 = vmatmul.msk.f32.gmra.mxu2 %vm283_vm0, %v6099_v11 }
 0x3ac   : > { %4182 = vmatmul.msk.f32.gmra.mxu3 %vm283_vm0, %v6101_v60 }
 0x3b2   : > { %4151 = vmatmul.msk.f32.gmra.mxu1 %vm283_vm0, %v6111_v49 }
 0x3b3   : > { %4167 = vmatmul.msk.f32.gmra.mxu2 %vm283_vm0, %v6113_v61 }
 0x3b4   : > { %4183 = vmatmul.msk.f32.gmra.mxu3 %vm283_vm0, %v6115_v20 }
 0x3b7   : > { %v2208_v63 = vpop.f32.mrf.mxu1 }
 0x3ba   : > { %4184 = vmatmul.msk.f32.vlgmr.msrb.gmra.mxu1 %vm283_vm0, %v5953_v14 }
 0x3bb   : > { %4200 = vmatmul.msk.f32.vlgmr.msrb.gmra.mxu2 %vm283_vm0, %v5951_v40 }
 0x3bc   : > { %4216 = vmatmul.msk.f32.vlgmr.msrb.gmra.mxu3 %vm283_vm0, %v5955_v36 }
 0x3be   : > { %v2321_v37 = vpop.f32.mrf.mxu2 }
 0x3bf   : > { %v2322_v0 = vadd.f32 %v2321_v37, %v2208_v63  ;;  %v2211_v54 = vpop.f32.mrf.mxu1  ;;  %v2455_v17 = vpop.f32.mrf.mxu3 }
 0x3c1   : > { %v6133_v32 = vadd.f32 %v2455_v17, %v2322_v0 }
 0x3c2   : > { %4185 = vmatmul.msk.f32.gmra.mxu1 %vm283_vm0, %v5965_v3 }
 0x3c3   : > { %4201 = vmatmul.msk.f32.gmra.mxu2 %vm283_vm0, %v5963_v39 }
 0x3c4   : > { %4217 = vmatmul.msk.f32.gmra.mxu3 %vm283_vm0, %v5967_v55 }
 0x3c6   : > { %v2324_v40 = vpop.f32.mrf.mxu2 }
 0x3c7   : > { %v2325_v14 = vadd.f32 %v2324_v40, %v2211_v54  ;;  %v2214_v36 = vpop.f32.mrf.mxu1  ;;  %v2458_v23 = vpop.f32.mrf.mxu3 }
 0x3c9   : > { %v6143_v47 = vadd.f32 %v2458_v23, %v2325_v14 }
 0x3ca   : > { %4186 = vmatmul.msk.f32.gmra.mxu1 %vm283_vm0, %v5977_v19 }
 0x3cb   : > { %4202 = vmatmul.msk.f32.gmra.mxu2 %vm283_vm0, %v5975_v35 }
 0x3cc   : > { %4218 = vmatmul.msk.f32.gmra.mxu3 %vm283_vm0, %v5979_v45 }
 0x3ce   : > { %v2327_v39 = vpop.f32.mrf.mxu2 }
 0x3cf   : > { %v2328_v3 = vadd.f32 %v2327_v39, %v2214_v36  ;;  %v2217_v55 = vpop.f32.mrf.mxu1  ;;  %v2461_v1 = vpop.f32.mrf.mxu3 }
 0x3d1   : > { %v6153_v30 = vadd.f32 %v2461_v1, %v2328_v3  ;;  %v3138_v1 = vld [vmem:[#allocation9 + $0xe0] sm:$0xff] }
 0x3d2   : > { %4187 = vmatmul.msk.f32.gmra.mxu1 %vm283_vm0, %v5989_v21  ;;  %v3289_v21 = vld [vmem:[#allocation9 + $0x108] sm:$0xff] }
 0x3d3   : > { %4203 = vmatmul.msk.f32.gmra.mxu2 %vm283_vm0, %v5987_v4  ;;  %3205 = vmatpush.msra.mxu1 %v3138_v1 }
 0x3d4   : > { %4219 = vmatmul.msk.f32.gmra.mxu3 %vm283_vm0, %v5991_v33  ;;  %3354 = vmatpush.msra.mxu2 %v3289_v21 }
 0x3d6   : > { %v2330_v19 = vpop.f32.mrf.mxu2 }
 0x3d7   : > { %v2331_v51 = vadd.f32 %v2330_v19, %v2217_v55  ;;  %v2220_v53 = vpop.f32.mrf.mxu1  ;;  %v2464_v9 = vpop.f32.mrf.mxu3 }
 0x3d9   : > { %v6163_v13 = vadd.f32 %v2464_v9, %v2331_v51 }
 0x3da   : > { %4188 = vmatmul.msk.f32.gmra.mxu1 %vm283_vm0, %v6001_v29 }
 0x3db   : > { %4204 = vmatmul.msk.f32.gmra.mxu2 %vm283_vm0, %v5999_v62 }
 0x3dc   : > { %4220 = vmatmul.msk.f32.gmra.mxu3 %vm283_vm0, %v6003_v57 }
 0x3de   : > { %v2333_v24 = vpop.f32.mrf.mxu2 }
 0x3df   : > { %v2334_v31 = vadd.f32 %v2333_v24, %v2220_v53  ;;  %v2223_v12 = vpop.f32.mrf.mxu1  ;;  %v2467_v7 = vpop.f32.mrf.mxu3 }
 0x3e1   : > { %v6173_v5 = vadd.f32 %v2467_v7, %v2334_v31 }
 0x3e2   : > { %4189 = vmatmul.msk.f32.gmra.mxu1 %vm283_vm0, %v6013_v48 }
 0x3e3   : > { %4205 = vmatmul.msk.f32.gmra.mxu2 %vm283_vm0, %v6011_v42 }
 0x3e4   : > { %4221 = vmatmul.msk.f32.gmra.mxu3 %vm283_vm0, %v6015_v41 }
 0x3e6   : > { %v2336_v29 = vpop.f32.mrf.mxu2 }
 0x3e7   : > { %v2337_v63 = vadd.f32 %v2336_v29, %v2223_v12  ;;  %v2226_v25 = vpop.f32.mrf.mxu1  ;;  %v2470_v37 = vpop.f32.mrf.mxu3 }
 0x3e9   : > { %v6183_v0 = vadd.f32 %v2470_v37, %v2337_v63 }
 0x3ea   : > { %4190 = vmatmul.msk.f32.gmra.mxu1 %vm283_vm0, %v6025_v59 }
 0x3eb   : > { %4206 = vmatmul.msk.f32.gmra.mxu2 %vm283_vm0, %v6023_v27 }
 0x3ec   : > { %4222 = vmatmul.msk.f32.gmra.mxu3 %vm283_vm0, %v6027_v34 }
 0x3ee   : > { %v2339_v48 = vpop.f32.mrf.mxu2 }
 0x3ef   : > { %v2340_v44 = vadd.f32 %v2339_v48, %v2226_v25  ;;  %v2229_v54 = vpop.f32.mrf.mxu1  ;;  %v2473_v17 = vpop.f32.mrf.mxu3 }
 0x3f1   : > { %v6193_v40 = vadd.f32 %v2473_v17, %v2340_v44 }
 0x3f2   : > { %4191 = vmatmul.msk.f32.gmra.mxu1 %vm283_vm0, %v6037_v52  ;;  %v3288_v52 = vld [vmem:[#allocation9 + $0x100] sm:$0xff] }
 0x3f3   : > { %4207 = vmatmul.msk.f32.gmra.mxu2 %vm283_vm0, %v6035_v16 }
 0x3f4   : > { %4223 = vmatmul.msk.f32.gmra.mxu3 %vm283_vm0, %v6039_v56  ;;  %3355 = vmatpush.msra.mxu2 %v3288_v52 }
 0x3f6   : > { %v2342_v59 = vpop.f32.mrf.mxu2 }
 0x3f7   : > { %v2343_v14 = vadd.f32 %v2342_v59, %v2229_v54  ;;  %v2232_v36 = vpop.f32.mrf.mxu1  ;;  %v2476_v23 = vpop.f32.mrf.mxu3 }
 0x3f9   : > { %v6203_v39 = vadd.f32 %v2476_v23, %v2343_v14 }
 0x3fa   : > { %4192 = vmatmul.msk.f32.gmra.mxu1 %vm283_vm0, %v6049_v43  ;;  %v2983_v43 = vld [vmem:[#allocation3 + $0x107] sm:$0xff] }
 0x3fb   : > { %4208 = vmatmul.msk.f32.gmra.mxu2 %vm283_vm0, %v6047_v15  ;;  %4244 = vmatmul.msk.f32.gmra.mxu0 %vm283_vm0, %v2983_v43 }
 0x3fc   : > { %4224 = vmatmul.msk.f32.gmra.mxu3 %vm283_vm0, %v6051_v26 }
 0x3fe   : > { %v2345_v3 = vpop.f32.mrf.mxu2 }
 0x3ff   : > { %v2346_v55 = vadd.f32 %v2345_v3, %v2232_v36  ;;  %v2235_v19 = vpop.f32.mrf.mxu1  ;;  %v2479_v51 = vpop.f32.mrf.mxu3 }
 0x401   : > { %v6213_v53 = vadd.f32 %v2479_v51, %v2346_v55 }
 0x402   : > { %4193 = vmatmul.msk.f32.gmra.mxu1 %vm283_vm0, %v6061_v46  ;;  %v2984_v46 = vld [vmem:[#allocation3 + $0x10f] sm:$0xff] }
 0x403   : > { %4209 = vmatmul.msk.f32.gmra.mxu2 %vm283_vm0, %v6059_v6  ;;  %4245 = vmatmul.msk.f32.gmra.mxu0 %vm283_vm0, %v2984_v46 }
 0x404   : > { %4225 = vmatmul.msk.f32.gmra.mxu3 %vm283_vm0, %v6063_v28 }
 0x406   : > { %v2348_v9 = vpop.f32.mrf.mxu2 }
 0x407   : > { %v2349_v21 = vadd.f32 %v2348_v9, %v2235_v19  ;;  %v2238_v24 = vpop.f32.mrf.mxu1  ;;  %v2482_v31 = vpop.f32.mrf.mxu3  ;;  %v6257_v19 = vld [vmem:[#allocation3 + $0x108] sm:$0xff] }
 0x408   : > { %v6261_v9 = vld [vmem:[#allocation3 + $0x109] sm:$0xff] }
 0x409   : > { %v6222_v58 = vadd.f32 %v2482_v31, %v2349_v21 }
 0x40a   : > { %4194 = vmatmul.msk.f32.gmra.mxu1 %vm283_vm0, %v6073_v18  ;;  %v2985_v18 = vld [vmem:[#allocation3 + $0x127] sm:$0xff] }
 0x40b   : > { %4210 = vmatmul.msk.f32.gmra.mxu2 %vm283_vm0, %v6071_v10  ;;  %4246 = vmatmul.msk.f32.gmra.mxu0 %vm283_vm0, %v2985_v18 }
 0x40c   : > { %4226 = vmatmul.msk.f32.gmra.mxu3 %vm283_vm0, %v6075_v2 }
 0x40e   : > { %v2351_v12 = vpop.f32.mrf.mxu2 }
 0x40f   : > { %v2352_v7 = vadd.f32 %v2351_v12, %v2238_v24  ;;  %v2241_v29 = vpop.f32.mrf.mxu1  ;;  %v2485_v63 = vpop.f32.mrf.mxu3  ;;  %v6268_v12 = vld [vmem:[#allocation3 + $0x110] sm:$0xff] }
 0x411   : > { %v6231_v25 = vadd.f32 %v2485_v63, %v2352_v7 }
 0x412   : > { %4195 = vmatmul.msk.f32.gmra.mxu1 %vm283_vm0, %v6085_v50  ;;  %v2986_v50 = vld [vmem:[#allocation3 + $0x12f] sm:$0xff] }
 0x413   : > { %4211 = vmatmul.msk.f32.gmra.mxu2 %vm283_vm0, %v6083_v22  ;;  %4247 = vmatmul.msk.f32.gmra.mxu0 %vm283_vm0, %v2986_v50 }
 0x414   : > { %4227 = vmatmul.msk.f32.gmra.mxu3 %vm283_vm0, %v6087_v8 }
 0x416   : > { %v2354_v37 = vpop.f32.mrf.mxu2 }
 0x417   : > { %v2355_v48 = vadd.f32 %v2354_v37, %v2241_v29  ;;  %v2244_v44 = vpop.f32.mrf.mxu1  ;;  %v2488_v54 = vpop.f32.mrf.mxu3  ;;  %v6272_v29 = vld [vmem:[#allocation3 + $0x111] sm:$0xff] }
 0x419   : > { %v6240_v17 = vadd.f32 %v2488_v54, %v2355_v48 }
 0x41a   : > { %4196 = vmatmul.msk.f32.gmra.mxu1 %vm283_vm0, %v6099_v11 }
 0x41b   : > { %4212 = vmatmul.msk.f32.gmra.mxu2 %vm283_vm0, %v6097_v38 }
 0x41c   : > { %4228 = vmatmul.msk.f32.gmra.mxu3 %vm283_vm0, %v6101_v60 }
 0x41e   : > { %v2357_v59 = vpop.f32.mrf.mxu2 }
 0x41f   : > { %v2358_v14 = vadd.f32 %v2357_v59, %v2244_v44  ;;  %v2247_v36 = vpop.f32.mrf.mxu1  ;;  %v2491_v23 = vpop.f32.mrf.mxu3 }
 0x421   : > { %v6249_v52 = vadd.f32 %v2491_v23, %v2358_v14 }
 0x422   : > { %4197 = vmatmul.msk.f32.gmra.mxu1 %vm283_vm0, %v6113_v61 }
 0x423   : > { %4213 = vmatmul.msk.f32.gmra.mxu2 %vm283_vm0, %v6111_v49 }
 0x424   : > { %4229 = vmatmul.msk.f32.gmra.mxu3 %vm283_vm0, %v6115_v20 }
 0x426   : > { %v2360_v11 = vpop.f32.mrf.mxu2 }
 0x427   : > { %v2361_v3 = vadd.f32 %v2360_v11, %v2247_v36  ;;  %v2250_v55 = vpop.f32.mrf.mxu1  ;;  %v2494_v1 = vpop.f32.mrf.mxu3 }
 0x429   : > { %v6259_v51 = vadd.f32 %v2494_v1, %v2361_v3 }
 0x42a   : > { %4198 = vmatmul.msk.f32.gmra.mxu1 %vm283_vm0, %v2983_v43  ;;  %v3057_v43 = vpop.f32.mrf.mxu0 }
 0x42b   : > { %4214 = vmatmul.msk.f32.gmra.mxu2 %vm283_vm0, %v6257_v19 }
 0x42c   : > { %4230 = vmatmul.msk.f32.gmra.mxu3 %vm283_vm0, %v6261_v9 }
 0x42e   : > { %v2363_v61 = vpop.f32.mrf.mxu2 }
 0x42f   : > { %v2364_v21 = vadd.f32 %v2363_v61, %v2250_v55  ;;  %v2253_v24 = vpop.f32.mrf.mxu1  ;;  %v2497_v31 = vpop.f32.mrf.mxu3 }
 0x431   : > { %v6270_v7 = vadd.f32 %v2497_v31, %v2364_v21 }
 0x432   : > { %4199 = vmatmul.msk.f32.gmra.mxu1 %vm283_vm0, %v2984_v46  ;;  %v3060_v59 = vpop.f32.mrf.mxu0 }
 0x433   : > { %4215 = vmatmul.msk.f32.gmra.mxu2 %vm283_vm0, %v6268_v12 }
 0x434   : > { %4231 = vmatmul.msk.f32.gmra.mxu3 %vm283_vm0, %v6272_v29 }
 0x436   : > { %v2366_v63 = vpop.f32.mrf.mxu2 }
 0x437   : > { %v2367_v18 = vadd.f32 %v2366_v63, %v2253_v24  ;;  %v2500_v37 = vpop.f32.mrf.mxu3  ;;  %v2606_v48 = vpop.f32.mrf.mxu1 }
 0x438   : > { %v2654_v46 = vadd.f32 %v2606_v48, %v6133_v32 }
 0x439   : > { %v6279_v44 = vadd.f32 %v2500_v37, %v2367_v18 }
 0x43a   : > { %4248 = vmatmul.msk.f32.vlgmr.msra.gmra.mxu1 %vm283_vm0, %v5975_v35  ;;  %v3063_v61 = vpop.f32.mrf.mxu0 }
 0x43b   : > { %4264 = vmatmul.msk.f32.vlgmr.msra.gmra.mxu2 %vm283_vm0, %v5979_v45 }
 0x43e   : > { %v2756_v54 = vpop.f32.mrf.mxu2 }
 0x43f   : > { %v2804_v50 = vadd.f32 %v2756_v54, %v2654_v46  ;;  %v2609_v14 = vpop.f32.mrf.mxu1  ;;  %v2906_v36 = vpop.f32.mrf.mxu3 }
 0x440   : > { %v2655_v35 = vadd.f32 %v2609_v14, %v6143_v47 }
 0x441   : > { %v2954_v23 = vadd.f32 %v2906_v36, %v2804_v50 }
 0x442   : > { %4249 = vmatmul.msk.f32.gmra.mxu1 %vm283_vm0, %v5987_v4  ;;  %v3066_v18 = vpop.f32.mrf.mxu0 }
 0x443   : > { %v6286_v11 = vadd.f32 %v3057_v43, %v2954_v23  ;;  %4265 = vmatmul.msk.f32.gmra.mxu2 %vm283_vm0, %v5991_v33 }
 0x446   : > { %v2759_v3 = vpop.f32.mrf.mxu2 }
 0x447   : > { %v2805_v45 = vadd.f32 %v2759_v3, %v2655_v35  ;;  %v2612_v55 = vpop.f32.mrf.mxu1  ;;  %v2909_v32 = vpop.f32.mrf.mxu3 }
 0x448   : > { %v2656_v4 = vadd.f32 %v2612_v55, %v6153_v30 }
 0x449   : > { %v2955_v1 = vadd.f32 %v2909_v32, %v2805_v45 }
 0x44a   : > { %4250 = vmatmul.msk.f32.gmra.mxu1 %vm283_vm0, %v5999_v62  ;;  %v3069_v50 = vpop.f32.mrf.mxu0 }
 0x44b   : > { %v6293_v21 = vadd.f32 %v3060_v59, %v2955_v1  ;;  %4266 = vmatmul.msk.f32.gmra.mxu2 %vm283_vm0, %v6003_v57 }
 0x44e   : > { %v2762_v24 = vpop.f32.mrf.mxu2 }
 0x44f   : > { %v2806_v33 = vadd.f32 %v2762_v24, %v2656_v4  ;;  %v2615_v31 = vpop.f32.mrf.mxu1  ;;  %v2912_v47 = vpop.f32.mrf.mxu3 }
 0x450   : > { %v2657_v62 = vadd.f32 %v2615_v31, %v6163_v13 }
 0x451   : > { %v2956_v43 = vadd.f32 %v2912_v47, %v2806_v33 }
 0x452   : > { %4251 = vmatmul.msk.f32.gmra.mxu1 %vm283_vm0, %v6011_v42  ;;  %v3072_v3 = vpop.f32.mrf.mxu0 }
 0x453   : > { %v6300_v63 = vadd.f32 %v3063_v61, %v2956_v43  ;;  %4267 = vmatmul.msk.f32.gmra.mxu2 %vm283_vm0, %v6015_v41 }
 0x456   : > { %v2765_v37 = vpop.f32.mrf.mxu2 }
 0x457   : > { %v2807_v57 = vadd.f32 %v2765_v37, %v2657_v62  ;;  %v2618_v48 = vpop.f32.mrf.mxu1  ;;  %v2915_v30 = vpop.f32.mrf.mxu3  ;;  %v3285_v37 = vld [vmem:[#allocation3 + $0x129] sm:$0xff] }
 0x458   : > { %v2658_v42 = vadd.f32 %v2618_v48, %v6173_v5 }
 0x459   : > { %v2957_v46 = vadd.f32 %v2915_v30, %v2807_v57  ;;  %v3286_v30 = vld [vmem:[#allocation3 + $0x131] sm:$0xff] }
 0x45a   : > { %4252 = vmatmul.msk.f32.gmra.mxu1 %vm283_vm0, %v6023_v27 }
 0x45b   : > { %v6307_v54 = vadd.f32 %v3066_v18, %v2957_v46  ;;  %4268 = vmatmul.msk.f32.gmra.mxu2 %vm283_vm0, %v6027_v34 }
 0x45e   : > { %v2768_v41 = vpop.f32.mrf.mxu2 }
 0x45f   : > { %v2808_v59 = vadd.f32 %v2768_v41, %v2658_v42  ;;  %v2621_v14 = vpop.f32.mrf.mxu1  ;;  %v2918_v13 = vpop.f32.mrf.mxu3 }
 0x460   : > { %v2659_v27 = vadd.f32 %v2621_v14, %v6183_v0 }
 0x461   : > { %v2958_v36 = vadd.f32 %v2918_v13, %v2808_v59 }
 0x462   : > { %4253 = vmatmul.msk.f32.gmra.mxu1 %vm283_vm0, %v6035_v16 }
 0x463   : > { %v6314_v23 = vadd.f32 %v3069_v50, %v2958_v36  ;;  %4269 = vmatmul.msk.f32.gmra.mxu2 %vm283_vm0, %v6039_v56 }
 0x466   : > { %v2771_v35 = vpop.f32.mrf.mxu2 }
 0x467   : > { %v2809_v34 = vadd.f32 %v2771_v35, %v2659_v27  ;;  %v2624_v5 = vpop.f32.mrf.mxu1  ;;  %v2921_v45 = vpop.f32.mrf.mxu3 }
 0x468   : > { %v2660_v16 = vadd.f32 %v2624_v5, %v6193_v40 }
 0x469   : > { %v2959_v55 = vadd.f32 %v2921_v45, %v2809_v34 }
 0x46a   : > { %4254 = vmatmul.msk.f32.gmra.mxu1 %vm283_vm0, %v6047_v15 }
 0x46b   : > { %v6321_v32 = vadd.f32 %v3072_v3, %v2959_v55  ;;  %4270 = vmatmul.msk.f32.gmra.mxu2 %vm283_vm0, %v6051_v26 }
 0x46e   : > { %v2774_v1 = vpop.f32.mrf.mxu2 }
 0x46f   : > { %v6328_v56 = vadd.f32 %v2774_v1, %v2660_v16  ;;  %v2627_v0 = vpop.f32.mrf.mxu1  ;;  %v2924_v45 = vpop.f32.mrf.mxu3  ;;  %v6393_v16 = vld [vmem:[#allocation10 + $0x2] ss:$0 sm:$0xff] }
 0x470   : > { %v2661_v61 = vadd.f32 %v2627_v0, %v6203_v39  ;;  %v3075_v1 = vpop.f32.mrf.mxu0 }
 0x472   : > { %4255 = vmatmul.msk.f32.gmra.mxu1 %vm283_vm0, %v6059_v6 }
 0x473   : > { %4271 = vmatmul.msk.f32.gmra.mxu2 %vm283_vm0, %v6063_v28 }
 0x476   : > { %v2777_v4 = vpop.f32.mrf.mxu2 }
 0x477   : > { %v6335_v24 = vadd.f32 %v2777_v4, %v2661_v61  ;;  %v2630_v15 = vpop.f32.mrf.mxu1  ;;  %v6396_v61 = vld [vmem:[#allocation10 + $0x3] ss:$0 sm:$0xff] }
 0x478   : > { %v2662_v26 = vadd.f32 %v2630_v15, %v6213_v53 }
 0x47a   : > { %4256 = vmatmul.msk.f32.gmra.mxu1 %vm283_vm0, %v6071_v10 }
 0x47b   : > { %4272 = vmatmul.msk.f32.gmra.mxu2 %vm283_vm0, %v6075_v2 }
 0x47e   : > { %v2780_v40 = vpop.f32.mrf.mxu2 }
 0x47f   : > { %v6342_v33 = vadd.f32 %v2780_v40, %v2662_v26  ;;  %v2633_v6 = vpop.f32.mrf.mxu1  ;;  %v2927_v26 = vpop.f32.mrf.mxu3 }
 0x480   : > { %v2663_v28 = vadd.f32 %v2633_v6, %v6222_v58 }
 0x482   : > { %4257 = vmatmul.msk.f32.gmra.mxu1 %vm283_vm0, %v6083_v22 }
 0x483   : > { %4273 = vmatmul.msk.f32.gmra.mxu2 %vm283_vm0, %v6087_v8 }
 0x486   : > { %v2783_v39 = vpop.f32.mrf.mxu2 }
 0x487   : > { %v6349_v53 = vadd.f32 %v2783_v39, %v2663_v28  ;;  %v2636_v31 = vpop.f32.mrf.mxu1  ;;  %v6802_v28 = vld [vmem:[#allocation23_spill] sm:$0xff] }
 0x488   : > { %v2664_v10 = vadd.f32 %v2636_v31, %v6231_v25  ;;  %v3078_v31 = vpop.f32.mrf.mxu0 }
 0x48a   : > { %4258 = vmatmul.msk.f32.gmra.mxu1 %vm283_vm0, %v6097_v38 }
 0x48b   : > { %4274 = vmatmul.msk.f32.gmra.mxu2 %vm283_vm0, %v6101_v60 }
 0x48e   : > { %v2786_v2 = vpop.f32.mrf.mxu2 }
 0x48f   : > { %v6356_v58 = vadd.f32 %v2786_v2, %v2664_v10  ;;  %v2639_v47 = vpop.f32.mrf.mxu1 }
 0x490   : > { %v2665_v22 = vadd.f32 %v2639_v47, %v6240_v17 }
 0x492   : > { %4259 = vmatmul.msk.f32.gmra.mxu1 %vm283_vm0, %v6111_v49 }
 0x493   : > { %4275 = vmatmul.msk.f32.gmra.mxu2 %vm283_vm0, %v6115_v20 }
 0x496   : > { %v2789_v8 = vpop.f32.mrf.mxu2 }
 0x497   : > { %v6363_v25 = vadd.f32 %v2789_v8, %v2665_v22  ;;  %v2642_v43 = vpop.f32.mrf.mxu1 }
 0x498   : > { %v2666_v38 = vadd.f32 %v2642_v43, %v6249_v52  ;;  %v6406_v43 = vpop.f32.mrf.mxu3 }
 0x49a   : > { %4260 = vmatmul.msk.f32.gmra.mxu1 %vm283_vm0, %v6257_v19  ;;  %v3135_v19 = vld [vmem:[#allocation3 + $0x128] sm:$0xff] }
 0x49b   : > { %4276 = vmatmul.msk.f32.gmra.mxu2 %vm283_vm0, %v6261_v9 }
 0x49e   : > { %v2792_v60 = vpop.f32.mrf.mxu2 }
 0x49f   : > { %v6370_v17 = vadd.f32 %v2792_v60, %v2666_v38  ;;  %v2645_v18 = vpop.f32.mrf.mxu1  ;;  %v6803_v38 = vld [vmem:[#allocation27_spill] sm:$0xff] }
 0x4a0   : > { %v2667_v49 = vadd.f32 %v2645_v18, %v6259_v51  ;;  %v2960_v18 = vadd.f32 %v2924_v45, %v6328_v56 }
 0x4a2   : > { %4261 = vmatmul.msk.f32.gmra.mxu1 %vm283_vm0, %v6268_v12  ;;  %v3136_v12 = vld [vmem:[#allocation3 + $0x130] sm:$0xff] }
 0x4a3   : > { %4277 = vmatmul.msk.f32.gmra.mxu2 %vm283_vm0, %v6272_v29 }
 0x4a6   : > { %v2795_v20 = vpop.f32.mrf.mxu2 }
 0x4a7   : > { %v6377_v52 = vadd.f32 %v2795_v20, %v2667_v49  ;;  %v2648_v62 = vpop.f32.mrf.mxu1  ;;  %v6804_v49 = vld [vmem:[#allocation24_spill] sm:$0xff] }
 0x4a8   : > { %v2668_v9 = vadd.f32 %v2648_v62, %v6270_v7 }
 0x4aa   : > { %4262 = vmatmul.msk.f32.gmra.mxu1 %vm283_vm0, %v3135_v19 }
 0x4ab   : > { %4278 = vmatmul.msk.f32.gmra.mxu2 %vm283_vm0, %v3285_v37 }
 0x4ae   : > { %v2798_v57 = vpop.f32.mrf.mxu2 }
 0x4af   : > { %v6382_v51 = vadd.f32 %v2798_v57, %v2668_v9  ;;  %v2651_v48 = vpop.f32.mrf.mxu1 }
 0x4b0   : > { %v2669_v29 = vadd.f32 %v2651_v48, %v6279_v44 }
 0x4b2   : > { %4263 = vmatmul.msk.f32.gmra.mxu1 %vm283_vm0, %v3136_v12 }
 0x4b3   : > { %4279 = vmatmul.msk.f32.gmra.mxu2 %vm283_vm0, %v3286_v30 }
 0x4b6   : > { %v2801_v46 = vpop.f32.mrf.mxu2 }
 0x4b7   : > { %v6387_v42 = vadd.f32 %v2801_v46, %v2669_v29  ;;  %v3207_v7 = vpop.f32.mrf.mxu1  ;;  %v3111_v29 = vadd.f32 %v3075_v1, %v2960_v18  ;;  %v6414_v46 = vpop.f32.mrf.mxu0 }
 0x4b8   : > { %v3255_v50 = vadd.f32 %v3207_v7, %v6286_v11 }
 0x4be   : > { %v3357_v41 = vpop.f32.mrf.mxu2 }
 0x4bf   : > { %v3405_v59 = vadd.f32 %v3357_v41, %v3255_v50  ;;  %v3210_v14 = vpop.f32.mrf.mxu1 }
 0x4c0   : > { %v3256_v13 = vadd.f32 %v3210_v14, %v6293_v21 }
 0x4c1   : > { %v3426_v0 = vmul.f32 %v6393_v16, %v3405_v59  ;;  %v6805_v59 = vld [vmem:[#allocation28_spill] sm:$0xff] }
 0x4c6   : > { %v3360_v36 = vpop.f32.mrf.mxu2 }
 0x4c7   : > { %v3406_v27 = vadd.f32 %v3360_v36, %v3256_v13  ;;  %v3213_v35 = vpop.f32.mrf.mxu1  ;;  %v2961_v36 = vadd.f32 %v2927_v26, %v6335_v24 }
 0x4c8   : > { %v3257_v44 = vadd.f32 %v3213_v35, %v6300_v63  ;;  %v3447_v63 = vadd.f32 %v6396_v61, %v3426_v0  ;;  %v4712_v35 = vmov 1983009808  }
 0x4c9   : > { %v3427_v40 = vmul.f32 %v6393_v16, %v3406_v27 }
 0x4cb   : > { %v3448_v22 = vadd.f32 %v6396_v61, %v3427_v40  ;;  %v3112_v40 = vadd.f32 %v3078_v31, %v2961_v36 }
 0x4cd   : > { %v3464_v20 = vadd.f32 %v3448_v22, %v6804_v49 }
 0x4ce   : > { %v3363_v34 = vpop.f32.mrf.mxu2 }
 0x4cf   : > { %v3407_v3 = vadd.f32 %v3363_v34, %v3257_v44  ;;  %v3216_v5 = vpop.f32.mrf.mxu1  ;;  %v3480_v7 = vmax.f32 %v3464_v20, 0.0  ;;  %v3501_v44 = vunpack.c.l.s4 %v4712_v35 }
 0x4d0   : > { %v3258_v55 = vadd.f32 %v3216_v5, %v6307_v54  ;;  %v3463_v54 = vadd.f32 %v3447_v63, %v6802_v28  ;;  %v6806_v5 = vld [vmem:[#allocation25_spill] sm:$0xff] }
 0x4d1   : > { %v3428_v37 = vmul.f32 %v6393_v16, %v3407_v3  ;;  %v3610_v27 = vrot.slane %v3480_v7, 4  ;;  %v6421_v3 = vpop.f32.mrf.mxu3  ;;  %v6427_v24 = vunpack.c.0.s8 %v3501_v44 }
 0x4d2   : > { %v3479_v8 = vmax.f32 %v3463_v54, 0.0 }
 0x4d3   : > { %v3449_v56 = vadd.f32 %v6396_v61, %v3428_v37 }
 0x4d4   : > { %v3498_v19 = vrot.slane %v3479_v8, 4 }
 0x4d5   : > { %v3465_v45 = vadd.f32 %v3449_v56, %v6806_v5 }
 0x4d6   : > { %v3366_v11 = vpop.f32.mrf.mxu2 }
 0x4d7   : > { %v3408_v21 = vadd.f32 %v3366_v11, %v3258_v55  ;;  %v3219_v4 = vpop.f32.mrf.mxu1  ;;  %v3481_v26 = vmax.f32 %v3465_v45, 0.0 }
 0x4d8   : > { %v3259_v15 = vadd.f32 %v3219_v4, %v6314_v23 }
 0x4d9   : > { %v3429_v55 = vmul.f32 %v6393_v16, %v3408_v21  ;;  %v6807_v21 = vld [vmem:[#allocation29_spill] sm:$0xff]  ;;  %v2936_v20 = vpop.f32.mrf.mxu3 }
 0x4de   : > { %v3369_v6 = vpop.f32.mrf.mxu2 }
 0x4df   : > { %v3409_v39 = vadd.f32 %v3369_v6, %v3259_v15  ;;  %v3222_v10 = vpop.f32.mrf.mxu1  ;;  %v3450_v6 = vadd.f32 %v6396_v61, %v3429_v55 }
 0x4e0   : > { %v3260_v47 = vadd.f32 %v3222_v10, %v6321_v32 }
 0x4e1   : > { %v3430_v2 = vmul.f32 %v6393_v16, %v3409_v39  ;;  %v3084_v39 = vpop.f32.mrf.mxu0 }
 0x4e3   : > { %v3451_v23 = vadd.f32 %v6396_v61, %v3430_v2 }
 0x4e5   : > { %v3467_v60 = vadd.f32 %v3451_v23, %v6803_v38  ;;  %v6808_v23 = vld [vmem:[#allocation26_spill] sm:$0xff] }
 0x4e6   : > { %v3372_v62 = vpop.f32.mrf.mxu2  ;;  %v3466_v38 = vadd.f32 %v3450_v6, %v6808_v23  ;;  %v2962_v23 = vadd.f32 %v6406_v43, %v6342_v33 }
 0x4e7   : > { %v3483_v9 = vmax.f32 %v3467_v60, 0.0  ;;  %v3410_v32 = vadd.f32 %v3372_v62, %v3260_v47  ;;  %v3225_v57 = vpop.f32.mrf.mxu1 }
 0x4e8   : > { %v3261_v13 = vadd.f32 %v3225_v57, %v3111_v29  ;;  %v3482_v57 = vmax.f32 %v3466_v38, 0.0 }
 0x4e9   : > { %v3495_v48 = vrot.slane %v3483_v9, 4  ;;  %v3499_v12 = vsel %vm3496_vm1, %v3483_v9, %v3498_v19  ;;  %v3431_v30 = vmul.f32 %v6393_v16, %v3410_v32 }
 0x4ea   : > { %v3507_v47 = vperm.slane %v3499_v12, %v6427_v24  ;;  %v3622_v44 = vrot.slane %v3482_v57, 4 }
 0x4eb   : > { %v3497_v50 = vsel %vm3496_vm1, %v3495_v48, %v3479_v8  ;;  %v3452_v41 = vadd.f32 %v6396_v61, %v3431_v30  ;;  %v3510_v8 = vrot.slane %v3481_v26, 4 }
 0x4ec   : > { %v3503_v18 = vperm.slane %v3497_v50, %v6427_v24  ;;  %v3558_v32 = vrot.slane %v3507_v47, 4  ;;  %v6809_v50 = vld [vmem:[#allocation30_spill] sm:$0xff] }
 0x4ed   : > { %v3468_v14 = vadd.f32 %v3452_v41, %v6805_v59  ;;  %v3087_v59 = vpop.f32.mrf.mxu0 }
 0x4ee   : > { %v3375_v34 = vpop.f32.mrf.mxu2  ;;  %v3546_v56 = vrot.slane %v3503_v18, 4 }
 0x4ef   : > { %v3484_v1 = vmax.f32 %v3468_v14, 0.0  ;;  %v3411_v11 = vadd.f32 %v3375_v34, %v3261_v13  ;;  %v3228_v0 = vpop.f32.mrf.mxu1 }
 0x4f0   : > { %v3262_v2 = vadd.f32 %v3228_v0, %v3112_v40 }
 0x4f1   : > { %v3608_v4 = vrot.slane %v3484_v1, 4  ;;  %v3611_v15 = vsel %vm3496_vm1, %v3484_v1, %v3610_v27  ;;  %v3432_v63 = vmul.f32 %v6393_v16, %v3411_v11 }
 0x4f2   : > { %v3619_v14 = vperm.slane %v3611_v15, %v6427_v24  ;;  %v2939_v15 = vpop.f32.mrf.mxu3 }
 0x4f3   : > { %v3609_v28 = vsel %vm3496_vm1, %v3608_v4, %v3480_v7  ;;  %v3453_v54 = vadd.f32 %v6396_v61, %v3432_v63 }
 0x4f4   : > { %v3615_v5 = vperm.slane %v3609_v28, %v6427_v24  ;;  %v3670_v4 = vrot.slane %v3619_v14, 4 }
 0x4f5   : > { %v3469_v10 = vadd.f32 %v3453_v54, %v6807_v21 }
 0x4f6   : > { %v3378_v22 = vpop.f32.mrf.mxu2  ;;  %v3658_v28 = vrot.slane %v3615_v5, 4 }
 0x4f7   : > { %v3485_v31 = vmax.f32 %v3469_v10, 0.0  ;;  %v3412_v60 = vadd.f32 %v3378_v22, %v3262_v2  ;;  %v3231_v49 = vpop.f32.mrf.mxu1 }
 0x4f9   : > { %v3508_v62 = vrot.slane %v3485_v31, 4  ;;  %v3511_v19 = vsel %vm3496_vm1, %v3485_v31, %v3510_v8  ;;  %v3433_v37 = vmul.f32 %v6393_v16, %v3412_v60  ;;  %v3113_v31 = vadd.f32 %v6414_v46, %v2962_v23 }
 0x4fa   : > { %v3519_v9 = vperm.slane %v3511_v19, %v6427_v24  ;;  %v2942_v38 = vpop.f32.mrf.mxu3  ;;  %v2963_v19 = vadd.f32 %v6421_v3, %v6349_v53  ;;  %v6810_v53 = vld [vmem:[#allocation31_spill] sm:$0xff] }
 0x4fb   : > { %v3509_v48 = vsel %vm3496_vm1, %v3508_v62, %v3481_v26  ;;  %v3454_v12 = vadd.f32 %v6396_v61, %v3433_v37 }
 0x4fc   : > { %v3515_v30 = vperm.slane %v3509_v48, %v6427_v24  ;;  %v6443_v29 = vsel %vm3496_vm1, %v3519_v9, %v3558_v32  ;;  %v3556_v7 = vrot.slane %v3519_v9, 4  ;;  %v3114_v32 = vadd.f32 %v3084_v39, %v2963_v19 }
 0x4fd   : > { %v3470_v41 = vadd.f32 %v3454_v12, %v6809_v50  ;;  %v2966_v12 = vadd.f32 %v2942_v38, %v6370_v17 }
 0x4fe   : > { %v3381_v13 = vpop.f32.mrf.mxu2  ;;  %v6448_v36 = vsel %vm3496_vm1, %v3556_v7, %v3507_v47  ;;  %v6451_v27 = vsel %vm3496_vm1, %v3515_v30, %v3546_v56  ;;  %v3544_v35 = vrot.slane %v3515_v30, 4  ;;  %v3090_v47 = vpop.f32.mrf.mxu0 }
 0x4ff   : > { %v3486_v34 = vmax.f32 %v3470_v41, 0.0  ;;  %v3234_v45 = vpop.f32.mrf.mxu1 }
 0x500   : > { %v6455_v55 = vsel %vm3496_vm1, %v3544_v35, %v3503_v18  ;;  %v3263_v18 = vadd.f32 %v3231_v49, %v3113_v31  ;;  %v3264_v7 = vadd.f32 %v3234_v45, %v3114_v32  ;;  %v2964_v49 = vadd.f32 %v2936_v20, %v6356_v58 }
 0x501   : > { %v3620_v1 = vrot.slane %v3486_v34, 4  ;;  %v3623_v11 = vsel %vm3496_vm1, %v3486_v34, %v3622_v44  ;;  %v2965_v34 = vadd.f32 %v2939_v15, %v6363_v25  ;;  %v6812_v25 = vld [vmem:[#allocation32_spill] sm:$0xff] }
 0x502   : > { %v3631_v0 = vperm.slane %v3623_v11, %v6427_v24  ;;  %v3413_v9 = vadd.f32 %v3381_v13, %v3263_v18  ;;  %v2945_v30 = vpop.f32.mrf.mxu3  ;;  %v3115_v13 = vadd.f32 %v3087_v59, %v2964_v49  ;;  %v4713_v49 = vmov 1934713408  }
 0x503   : > { %v3621_v63 = vsel %vm3496_vm1, %v3620_v1, %v3482_v57  ;;  %v2967_v35 = vadd.f32 %v2945_v30, %v6377_v52 }
 0x504   : > { %v3668_v40 = vrot.slane %v3631_v0, 4  ;;  %v6461_v26 = vsel %vm3496_vm1, %v3631_v0, %v3670_v4  ;;  %v3627_v6 = vperm.slane %v3621_v63, %v6427_v24  ;;  %v3434_v57 = vmul.f32 %v6393_v16, %v3413_v9 }
 0x505   : > { %v3116_v63 = vadd.f32 %v3090_v47, %v2965_v34 }
 0x506   : > { %v3384_v54 = vpop.f32.mrf.mxu2  ;;  %v6465_v21 = vsel %vm3496_vm1, %v3668_v40, %v3619_v14  ;;  %v6468_v10 = vsel %vm3496_vm1, %v3627_v6, %v3658_v28  ;;  %v3656_v2 = vrot.slane %v3627_v6, 4  ;;  %v3093_v37 = vpop.f32.mrf.mxu0  ;;  %v3455_v43 = vadd.f32 %v6396_v61, %v3434_v57  ;;  %v6811_v40 = vld [vmem:[#allocation35_spill] sm:$0xff] }
 0x507   : > { %v3237_v22 = vpop.f32.mrf.mxu1  ;;  %v3414_v46 = vadd.f32 %v3384_v54, %v3264_v7  ;;  %v3117_v56 = vadd.f32 %v3093_v37, %v2966_v12  ;;  %v6813_v7 = vld [vmem:[#allocation36_spill] sm:$0xff] }
 0x508   : > { %v6471_v8 = vsel %vm3496_vm1, %v3656_v2, %v3615_v5  ;;  %v3471_v3 = vadd.f32 %v3455_v43, %v6810_v53  ;;  %v3265_v45 = vadd.f32 %v3237_v22, %v3115_v13 }
 0x509   : > { %v3435_v39 = vmul.f32 %v6393_v16, %v3414_v46 }
 0x50a   : > { %v2948_v5 = vpop.f32.mrf.mxu3  ;;  %v3487_v58 = vmax.f32 %v3471_v3, 0.0 }
 0x50b   : > { %v3456_v20 = vadd.f32 %v6396_v61, %v3435_v39  ;;  %v2968_v52 = vadd.f32 %v2948_v5, %v6382_v51 }
 0x50c   : > { %v3522_v54 = vrot.slane %v3487_v58, 4 }
 0x50d   : > { %v3472_v15 = vadd.f32 %v3456_v20, %v6812_v25  ;;  %v6815_v20 = vld [vmem:[#allocation34_spill] sm:$0xff] }
 0x50e   : > { %v3387_v60 = vpop.f32.mrf.mxu2  ;;  %v3096_v50 = vpop.f32.mrf.mxu0 }
 0x50f   : > { %v3240_v62 = vpop.f32.mrf.mxu1  ;;  %v3118_v11 = vadd.f32 %v3096_v50, %v2967_v35  ;;  %v3415_v0 = vadd.f32 %v3387_v60, %v3265_v45  ;;  %v3488_v51 = vmax.f32 %v3472_v15, 0.0 }
 0x510   : > { %v3266_v23 = vadd.f32 %v3240_v62, %v3116_v63 }
 0x511   : > { %v3436_v22 = vmul.f32 %v6393_v16, %v3415_v0  ;;  %v3634_v50 = vrot.slane %v3488_v51, 4  ;;  %v6816_v0 = vld [vmem:[#allocation37_spill] sm:$0xff] }
 0x512   : > { %v2951_v32 = vpop.f32.mrf.mxu3 }
 0x513   : > { %v3457_v57 = vadd.f32 %v6396_v61, %v3436_v22 }
 0x516   : > { %v3390_v48 = vpop.f32.mrf.mxu2  ;;  %v3099_v28 = vpop.f32.mrf.mxu0 }
 0x517   : > { %v3243_v33 = vpop.f32.mrf.mxu1  ;;  %v3416_v60 = vadd.f32 %v3390_v48, %v3266_v23  ;;  %v3119_v9 = vadd.f32 %v3099_v28, %v2968_v52  ;;  %v2969_v48 = vadd.f32 %v2951_v32, %v6387_v42 }
 0x518   : > { %v3267_v41 = vadd.f32 %v3243_v33, %v3117_v56  ;;  %v3549_v56 = vunpack.c.l.s4 %v4713_v49 }
 0x519   : > { %v3437_v62 = vmul.f32 %v6393_v16, %v3416_v60 }
 0x51a   : > { %v6505_v5 = vunpack.c.0.s8 %v3549_v56 }
 0x51b   : > { %v3458_v13 = vadd.f32 %v6396_v61, %v3437_v62 }
 0x51c   : > { %v6516_v52 = vperm.slane %v6448_v36, %v6505_v5  ;;  %v3555_v15 = vperm.slane %v6451_v27, %v6505_v5  ;;  %v3679_v62 = vperm.slane %v6461_v26, %v6505_v5 }
 0x51e   : > { %v3393_v14 = vpop.f32.mrf.mxu2 }
 0x51f   : > { %v3417_v17 = vadd.f32 %v3393_v14, %v3267_v41  ;;  %v3246_v44 = vpop.f32.mrf.mxu1  ;;  %v6814_v41 = vld [vmem:[#allocation33_spill] sm:$0xff]  ;;  %v3102_v14 = vpop.f32.mrf.mxu0 }
 0x520   : > { %v3268_v6 = vadd.f32 %v3246_v44, %v3118_v11  ;;  %v3473_v53 = vadd.f32 %v3457_v57, %v6814_v41  ;;  %v3120_v42 = vadd.f32 %v3102_v14, %v2969_v48  ;;  %v3474_v11 = vadd.f32 %v3458_v13, %v6815_v20 }
 0x521   : > { %v3438_v1 = vmul.f32 %v6393_v16, %v3417_v17  ;;  %v6543_v41 = vperm.slane %v6465_v21, %v6505_v5 }
 0x522   : > { %v3489_v45 = vmax.f32 %v3473_v53, 0.0  ;;  %v3490_v22 = vmax.f32 %v3474_v11, 0.0 }
 0x523   : > { %v3459_v4 = vadd.f32 %v6396_v61, %v3438_v1 }
 0x524   : > { %v3534_v28 = vrot.slane %v3489_v45, 4  ;;  %v3646_v57 = vrot.slane %v3490_v22, 4 }
 0x525   : > { %v3475_v59 = vadd.f32 %v3459_v4, %v6811_v40 }
 0x526   : > { %v3396_v2 = vpop.f32.mrf.mxu2 }
 0x527   : > { %v3491_v38 = vmax.f32 %v3475_v59, 0.0  ;;  %v3418_v31 = vadd.f32 %v3396_v2, %v3268_v6  ;;  %v3249_v18 = vpop.f32.mrf.mxu1  ;;  %v3567_v6 = vperm.slane %v6443_v29, %v6505_v5 }
 0x528   : > { %v3269_v43 = vadd.f32 %v3249_v18, %v3119_v9 }
 0x529   : > { %v3520_v19 = vrot.slane %v3491_v38, 4  ;;  %v3523_v47 = vsel %vm3496_vm1, %v3491_v38, %v3522_v54  ;;  %v3439_v37 = vmul.f32 %v6393_v16, %v3418_v31  ;;  %v3606_v60 = vrot.slane %v3567_v6, 4 }
 0x52a   : > { %v3531_v40 = vperm.slane %v3523_v47, %v6427_v24  ;;  %v3602_v47 = vrot.slane %v6516_v52, 4 }
 0x52b   : > { %v3521_v12 = vsel %vm3496_vm1, %v3520_v19, %v3487_v58  ;;  %v3460_v30 = vadd.f32 %v6396_v61, %v3439_v37  ;;  %v3598_v37 = vrot.slane %v3555_v15, 4 }
 0x52c   : > { %v3527_v2 = vperm.slane %v3521_v12, %v6427_v24  ;;  %v3582_v18 = vrot.slane %v3531_v40, 4  ;;  %v6817_v12 = vld [vmem:[#allocation38_spill] sm:$0xff] }
 0x52d   : > { %v3476_v33 = vadd.f32 %v3460_v30, %v6813_v7 }
 0x52e   : > { %v3399_v46 = vpop.f32.mrf.mxu2 }
 0x52f   : > { %v3492_v3 = vmax.f32 %v3476_v33, 0.0  ;;  %v3419_v39 = vadd.f32 %v3399_v46, %v3269_v43  ;;  %v3252_v34 = vpop.f32.mrf.mxu1 }
 0x530   : > { %v3270_v63 = vadd.f32 %v3252_v34, %v3120_v42  ;;  %v3551_v42 = vperm.slane %v6455_v55, %v6505_v5 }
 0x531   : > { %v3632_v35 = vrot.slane %v3492_v3, 4  ;;  %v3635_v17 = vsel %vm3496_vm1, %v3492_v3, %v3634_v50  ;;  %v3440_v44 = vmul.f32 %v6393_v16, %v3419_v39 }
 0x533   : > { %v3633_v1 = vsel %vm3496_vm1, %v3632_v35, %v3488_v51  ;;  %v3461_v58 = vadd.f32 %v6396_v61, %v3440_v44  ;;  %v3570_v51 = vrot.slane %v3527_v2, 4 }
 0x534   : > { %v3639_v50 = vperm.slane %v3633_v1, %v6427_v24 }
 0x535   : > { %v3477_v4 = vadd.f32 %v3461_v58, %v6816_v0  ;;  %v3714_v0 = vrot.slane %v6543_v41, 4 }
 0x536   : > { %v3402_v59 = vpop.f32.mrf.mxu2  ;;  %v3682_v11 = vrot.slane %v3639_v50, 4 }
 0x537   : > { %v3493_v54 = vmax.f32 %v3477_v4, 0.0  ;;  %v3420_v25 = vadd.f32 %v3402_v59, %v3270_v63 }
 0x539   : > { %v3532_v23 = vrot.slane %v3493_v54, 4  ;;  %v3535_v38 = vsel %vm3496_vm1, %v3493_v54, %v3534_v28  ;;  %v3441_v31 = vmul.f32 %v6393_v16, %v3420_v25 }
 0x53a   : > { %v3543_v29 = vperm.slane %v3535_v38, %v6427_v24 }
 0x53b   : > { %v3533_v36 = vsel %vm3496_vm1, %v3532_v23, %v3489_v45  ;;  %v3462_v19 = vadd.f32 %v6396_v61, %v3441_v31  ;;  %v3643_v61 = vperm.slane %v3635_v17, %v6427_v24  ;;  %v3667_v45 = vperm.slane %v6468_v10, %v6505_v5 }
 0x53c   : > { %v3583_v27 = vsel %vm3496_vm1, %v3543_v29, %v3582_v18  ;;  %v3580_v9 = vrot.slane %v3543_v29, 4  ;;  %v3539_v32 = vperm.slane %v3533_v36, %v6427_v24  ;;  %v3663_v36 = vperm.slane %v6471_v8, %v6505_v5 }
 0x53d   : > { %v3478_v16 = vadd.f32 %v3462_v19, %v6817_v12  ;;  %v3591_v30 = vperm.slane %v3583_v27, %v6505_v5  ;;  %v3694_v21 = vrot.slane %v3643_v61, 4  ;;  %v3710_v23 = vrot.slane %v3667_v45, 4 }
 0x53e   : > { %v3581_v7 = vsel %vm3496_vm1, %v3580_v9, %v3531_v40  ;;  %v3571_v33 = vsel %vm3496_vm1, %v3539_v32, %v3570_v51  ;;  %v3568_v43 = vrot.slane %v3539_v32, 4  ;;  %v3718_v40 = vrot.slane %v3679_v62, 4 }
 0x53f   : > { %v3494_v48 = vmax.f32 %v3478_v16, 0.0  ;;  %v3604_v46 = vrot.slane %v3591_v30, 4  ;;  %v6537_v49 = vperm.slane %v3581_v7, %v6505_v5  ;;  %v3579_v56 = vperm.slane %v3571_v33, %v6505_v5 }
 0x540   : > { %v3569_v26 = vsel %vm3496_vm1, %v3568_v43, %v3527_v2  ;;  %v3607_v53 = vsel %vm3496_vm1, %v3591_v30, %v3606_v60  ;;  %v3594_v2 = vrot.slane %v3551_v42, 4 }
 0x541   : > { %v3644_v3 = vrot.slane %v3494_v48, 4  ;;  %v3647_v39 = vsel %vm3496_vm1, %v3494_v48, %v3646_v57  ;;  %v3605_v14 = vsel %vm3496_vm1, %v3604_v46, %v3567_v6  ;;  %v3603_v13 = vsel %vm3496_vm1, %v6537_v49, %v3602_v47 }
 0x542   : > { %v3655_v35 = vperm.slane %v3647_v39, %v6427_v24  ;;  %3737 = vrot.lane.b32.xlu2 %v3605_v14, %s4714_s14  ;;  %3733 = vrot.lane.b32.xlu0 %v3603_v13, %s4715_s9  ;;  %v3599_v17 = vsel %vm3496_vm1, %v3579_v56, %v3598_v37  ;;  %v3596_v44 = vrot.slane %v3579_v56, 4  ;;  %v3575_v55 = vperm.slane %v3569_v26, %v6505_v5 }
 0x543   : > { %v3645_v34 = vsel %vm3496_vm1, %v3644_v3, %v3490_v22  ;;  %v3706_v47 = vrot.slane %v3663_v36, 4  ;;  %v3600_v48 = vrot.slane %v6537_v49, 4 }
 0x544   : > { %v3651_v1 = vperm.slane %v3645_v34, %v6427_v24  ;;  %v3692_v58 = vrot.slane %v3655_v35, 4  ;;  %v3695_v20 = vsel %vm3496_vm1, %v3655_v35, %v3694_v21  ;;  %v3597_v63 = vsel %vm3496_vm1, %v3596_v44, %v3555_v15 }
 0x545   : > { %v3703_v4 = vperm.slane %v3695_v20, %v6505_v5  ;;  %v3595_v29 = vsel %vm3496_vm1, %v3575_v55, %v3594_v2  ;;  %v3592_v51 = vrot.slane %v3575_v55, 4 }
 0x546   : > { %v3693_v59 = vsel %vm3496_vm1, %v3692_v58, %v3643_v61  ;;  %v3683_v6 = vsel %vm3496_vm1, %v3651_v1, %v3682_v11  ;;  %v3680_v10 = vrot.slane %v3651_v1, 4 }
 0x547   : > { %v3699_v24 = vperm.slane %v3693_v59, %v6505_v5  ;;  %v3716_v28 = vrot.slane %v3703_v4, 4  ;;  %v3691_v54 = vperm.slane %v3683_v6, %v6505_v5  ;;  %v3719_v25 = vsel %vm3496_vm1, %v3703_v4, %v3718_v40 }
 0x548   : > { %v3681_v22 = vsel %vm3496_vm1, %v3680_v10, %v3639_v50 }
 0x549   : > { %v3715_v15 = vsel %vm3496_vm1, %v3699_v24, %v3714_v0  ;;  %v3717_v38 = vsel %vm3496_vm1, %v3716_v28, %v3679_v62  ;;  %v3708_v31 = vrot.slane %v3691_v54, 4  ;;  %v3711_v18 = vsel %vm3496_vm1, %v3691_v54, %v3710_v23 }
 0x54a   : > { %3757 = vrot.lane.b32.xlu1 %v3715_v15, %s4715_s9  ;;  %3729 = vrot.lane.b32.xlu2 %v3599_v17, %s4716_s7  ;;  %v3687_v19 = vperm.slane %v3681_v22, %v6505_v5  ;;  %v3593_v5 = vsel %vm3496_vm1, %v3592_v51, %v3551_v42  ;;  %v3712_v30 = vrot.slane %v3699_v24, 4 }
 0x54b   : > { %3721 = vrot.lane.b32.xlu0 %v3595_v29, %s4715_s9  ;;  %v3709_v60 = vsel %vm3496_vm1, %v3708_v31, %v3667_v45 }
 0x54c   : > { %v3707_v37 = vsel %vm3496_vm1, %v3687_v19, %v3706_v47  ;;  %v3713_v61 = vsel %vm3496_vm1, %v3712_v30, %v6543_v41  ;;  %v3601_v41 = vsel %vm3496_vm1, %v3600_v48, %v6516_v52  ;;  %v3704_v3 = vrot.slane %v3687_v19, 4 }
 0x54e   : > { %v3705_v52 = vsel %vm3496_vm1, %v3704_v3, %v3663_v36 }
 0x552   : > { %3761 = vrot.lane.b32.xlu1 %v3717_v38, %s4714_s14  ;;  %3725 = vrot.lane.b32.xlu2 %v3597_v63, %s4714_s14 }
 0x553   : > { %3749 = vrot.lane.b32.xlu0 %v3709_v60, %s4714_s14 }
 0x55a   : > { %3745 = vrot.lane.b32.xlu1 %v3707_v37, %s4715_s9  ;;  %3765 = vrot.lane.b32.xlu2 %v3719_v25, %s4716_s7 }
 0x55b   : > { %3741 = vrot.lane.b32.xlu0 %v3607_v53, %s4716_s7 }
 0x562   : > { %3753 = vrot.lane.b32.xlu1 %v3711_v18, %s4716_s7 }
 0x59c   : > { %v3738_v27 = vpop.permute.xlu2 %3737 }
 0x5a4   : > { %v3730_v9 = vpop.permute.xlu2 %3729 }
 0x5ac   : > { %v3726_v57 = vpop.permute.xlu2 %3725 }
 0x5b4   : > { %v3734_v32 = vpop.permute.xlu0 %3733  ;;  %v3766_v46 = vpop.permute.xlu2 %3765 }
 0x5b5   : > { %v3773_v53 = vsel %vm283_vm0, %v3601_v41, %v3734_v32 }
 0x5b6   : > { %v3774_v39 = vsel %vm3769_vm3, %v3773_v53, %v3738_v27 }
 0x5bc   : > { %v3758_v12 = vpop.permute.xlu1 %3757 }
 0x5bd   : > { %v3722_v8 = vpop.permute.xlu0 %3721  ;;  %v3779_v33 = vsel %vm283_vm0, %v3713_v61, %v3758_v12 }
 0x5be   : > { %v3768_v16 = vsel %vm283_vm0, %v3593_v5, %v3722_v8 }
 0x5bf   : > { %v3770_v62 = vsel %vm3769_vm3, %v3768_v16, %v3726_v57 }
 0x5c0   : > { %v3772_v7 = vsel %vm3771_vm2, %v3770_v62, %v3730_v9 }
 0x5c1   : > { %3782 = vst [vmem:[%s5068_s6] sm:$0xff] %v3772_v7 }
 0x5c4   : > { %v3762_v43 = vpop.permute.xlu1 %3761 }
 0x5c5   : > { %v3780_v56 = vsel %vm3769_vm3, %v3779_v33, %v3762_v43  ;;  %v3750_v50 = vpop.permute.xlu0 %3749 }
 0x5c6   : > { %v3781_v26 = vsel %vm3771_vm2, %v3780_v56, %v3766_v46 }
 0x5c7   : > { %3785 = vst [vmem:[%s5068_s6 + $0x18] sm:$0xff] %v3781_v26 }
 0x5cc   : > { %v3746_v49 = vpop.permute.xlu1 %3745 }
 0x5cd   : > { %v3742_v14 = vpop.permute.xlu0 %3741  ;;  %v3776_v35 = vsel %vm283_vm0, %v3705_v52, %v3746_v49 }
 0x5ce   : > { %v3775_v13 = vsel %vm3771_vm2, %v3774_v39, %v3742_v14  ;;  %v3777_v21 = vsel %vm3769_vm3, %v3776_v35, %v3750_v50 }
 0x5cf   : > { %3783 = vst [vmem:[%s5068_s6 + $0x8] sm:$0xff] %v3775_v13 }
 0x5d4   : > { %v3754_v17 = vpop.permute.xlu1 %3753 }
 0x5d5   : > { %v3778_v44 = vsel %vm3771_vm2, %v3777_v21, %v3754_v17 }
 0x5d6   : > { %3784 = vst [vmem:[%s5068_s6 + $0x10] sm:$0xff] %v3778_v44 }
 0x5d7   : > { %4597 = shalt.err (!%p4594_p12)
}
 0x5d8   : > { %4315 = dma.vmem_to_hbm [thread:$0]  (%p4812_p6), %s3803_s5, 512, %s3805_s15, %s3787_s29  }
 0x5d9 PF: > { %s6819_s1 = sld [smem:[#allocation17_spill]]  ;;  %p4342_p13 = scmp.ge.s32.totalorder %s4700_s25, 2 }
 0x5db   : > { %p4332_p1 = pnand %p4342_p13, %p4818_p10 }
 0x5dd   : > { %p4333_p4 = pneg %p4332_p1 }
 0x5df   : > { %s3816_s7 = sand.u32 1, %s6819_s1  }
 0x5e0   : > { %s3817_s8 = scalar_lea.sflag [#allocation6], %s3816_s7 }
 0x5e1   : > { %4655 = dma.done.wait (%p4333_p4), %s3817_s8, 512  }
 0x5e2   : > { %4657 = vsyncadd (%p4333_p4), %s3817_s8, 4294966784  ;;  %s22_s25 = sadd.s32 1, %s4700_s25   ;;  %s6821_s21 = sld [smem:[#allocation18_spill]] }
 0x5e3   : > { %p19_p11 = scmp.ge.s32.totalorder %s22_s25, 6   ;;  %s6822_s23 = sld [smem:[#allocation21_spill]] }
 0x5e4   : > { %s6823_s12 = sld [smem:[#allocation22_spill]]  ;;  %s6824_s15 = smov %s4664_s16 }
 0x5e5   : > { %s6825_s16 = smov %s4668_s17  ;;  %s6826_s17 = smov %s4882_s27 }
 0x5e6   : > { %s6827_s18 = smov %s4676_s19  ;;  %s6828_s19 = smov %s4680_s20 }
 0x5e7   : > { %s6829_s20 = smov %s4879_s26  ;;  %s6830_s22 = smov %s4696_s24 }
 0x5e8   :  { %21 = sbr.rel (!%p19_p11) target bundleno = 15 (0xf), region = 137 }
 0x5ea   : > { %s6831_s24 = smov %s6823_s12 }
 0x5ed   :  { %3823 = vsyncpa [#allocation5], 1 }
 0x5ee   :  { %3825 = vsyncpa [#allocation5 + $0x1], 1 }
 0x5ef   :  { %3826 = vsyncpa [#allocation8], 1 }
 0x5f0   :  { %3827 = vsyncpa [#allocation11], 1 }
 0x5f1   :  { %3828 = vsyncpa [#allocation6], 1 }
 0x5f2   :  { %3830 = vsyncpa [#allocation6 + $0x1], 1 }

</bundles_post_ra>
